<compile_context>
chip_gen: v6e
topology: v6e:2x2x1
jax: 0.10.0
libtpu: 0.0.40
codegen_flags: <defaults>
</compile_context>

<pallas_src>
import functools
import math

import jax
import jax.numpy as jnp
from jax import lax
from jax.experimental import pallas as pl
from jax.experimental.pallas import tpu as pltpu


# --------------------------------------------------------------------------- #
# Kernel                                                                       #
# --------------------------------------------------------------------------- #
def self_attn_kernel(q_ref, k_ref, v_ref,
                     wqt_ref, bq_ref, wkt_ref, bk_ref, wvt_ref, bv_ref,
                     o_ref, *, tb, c, approx_recip):
    """One grid step processes TB batches.

    Blocks: q/k/v     (TB*C, H)   [fast path] or (TB, C, H) [C%8!=0 fallback]
            weights   (H, D)      pre-transposed, single-buffered
            biases    (1, D)      f32, single-buffered
            out       (TB, D, C)  f32
    """
    h, d = wqt_ref.shape
    f32 = jnp.float32
    cdt = wqt_ref.dtype            # bf16 (perf) or f32 (precise) MXU operand dtype

    def rows(ref):
        x = ref[...]
        # Fallback path only (C % 8 != 0): merge (TB, C) -> TB*C rows in-kernel.
        return x.reshape(tb * c, h) if x.ndim == 3 else x

    q2, k2, v2 = rows(q_ref), rows(k_ref), rows(v_ref)

    # ---- fused 1x1-conv projections: one (TB*C, H) @ (H, D) MXU matmul each,
    #      f32 accumulation + f32 bias add, then narrowed to the operand dtype.
    pq = (jnp.dot(q2, wqt_ref[...], preferred_element_type=f32) + bq_ref[...]).astype(cdt)
    pk = (jnp.dot(k2, wkt_ref[...], preferred_element_type=f32) + bk_ref[...]).astype(cdt)
    pv = (jnp.dot(v2, wvt_ref[...], preferred_element_type=f32) + bv_ref[...]).astype(cdt)
    # Row (t*C + c) of pq holds proj_query[t, :, c] (per-batch projection, transposed).

    # ---- split fused rows back to per-batch (TB, C, D); a free row-major
    #      re-view when C % 8 == 0 (batch boundaries stay sublane-aligned).
    pq3 = pq.reshape(tb, c, d)
    pk3 = pk.reshape(tb, c, d)
    pv3 = pv.reshape(tb, c, d)

    # ---- batched attention (no per-batch unroll) ----------------------------
    # energy[b, m, n] = sum_c proj_q[b, m, c] * proj_k[b, n, c]
    energy = lax.dot_general(pq3, pk3, (((1,), (1,)), ((0,), (0,))),
                             preferred_element_type=f32)              # (TB, D, D)

    # numerically stable softmax over the last dim, statistics in f32
    e_max = jnp.max(energy, axis=-1, keepdims=True)
    p = jnp.exp(energy - e_max)
    att = p * pl.reciprocal(jnp.sum(p, axis=-1, keepdims=True), approx=approx_recip)

    # out[b, m, c] = sum_n att[b, m, n] * proj_v[b, n, c]
    # (1/sqrt(in_dim) is already folded into the value projection weights/bias.)
    out = lax.dot_general(att.astype(cdt), pv3, (((2,), (2,)), ((0,), (0,))),
                          preferred_element_type=f32)                 # (TB, D, C)

    o_ref[...] = out.astype(o_ref.dtype)                              # single full-block store


# --------------------------------------------------------------------------- #
# Generation-aware tiling helpers                                              #
# --------------------------------------------------------------------------- #
def _vmem_capacity_bytes():
    try:
        return int(pltpu.get_tpu_info().vmem_capacity_bytes)
    except Exception:
        return 64 * 1024 * 1024        # conservative default: v7x (64 MiB / TC)


def _num_tensorcores_per_device():
    """Megacore detection: v4/v5p/v7x expose 2 TensorCores behind one device."""
    try:
        kind = jax.devices()[0].device_kind.lower()
    except Exception:
        return 1
    return 2 if any(t in kind for t in ("v7", "7x", "v4", "v5p")) else 1


def _pick_batch_tile(B, C, H, D, cdt_bytes, min_steps):
    """Largest TB dividing B s.t. the per-step VMEM footprint fits a
    generation-aware budget and the grid keeps >= min_steps steps."""
    phys = _vmem_capacity_bytes()
    budget = min(int(phys * 0.70), 96 * 1024 * 1024)       # ~45 MiB on v7x, ~90 MiB on v5e/v6e
    fixed = 3 * (H * D * cdt_bytes + max(D, 128) * 4)      # single-buffered weights + biases
    per_b = (3 * C * H * cdt_bytes * 2                     # q/k/v blocks (double-buffered)
             + D * C * 4 * 2                               # f32 output block (double-buffered)
             + 3 * C * D * (4 + cdt_bytes)                 # f32 proj accumulators + cdt copies
             + D * D * (2 * 4 + cdt_bytes)                 # energy / p (f32) + att (cdt)
             + D * C * 4)                                  # f32 attention output before store
    best = 1
    for tb in range(1, B + 1):
        if B % tb or (B // tb) < max(1, min_steps):
            continue
        if fixed + int(1.25 * tb * per_b) <= budget:       # 25% slack for vregs / compiler scratch
            best = max(best, tb)
    return best


# --------------------------------------------------------------------------- #
# Wrapper                                                                      #
# --------------------------------------------------------------------------- #
def self_attn(q, k, v, wq, bq, wk, bk, wv, bv, *, precise=False, batch_tile=None):
    """q, k, v: (B, C, H).  wq/wk/wv: (D, H) Conv1d(k=1) weights.  bq/bk/bv: (1, D) or (D,).

    precise=True  -> f32 MXU operands + exact reciprocal (tracks the f32 reference tightly)
    precise=False -> bf16 inputs/MXU operands, f32 accumulation & softmax, approx reciprocal.
    """
    B, C, H = q.shape
    D, in_dim = wq.shape
    assert in_dim == H, "Conv1d in_channels must equal the trailing input dim"
    assert D == H, "out.view(B, C, H) requires out_dim == H"

    cdt = jnp.float32 if precise else jnp.bfloat16
    inv = 1.0 / math.sqrt(in_dim)

    # Pre-transpose the 1x1-conv weights once (no in-kernel transposes) and fold
    # the final 1/sqrt(in_dim) into the value projection (exact rescale).
    wq_t = wq.T.astype(cdt)
    wk_t = wk.T.astype(cdt)
    wv_t = (wv.T * inv).astype(cdt)
    bq32 = bq.reshape(1, D).astype(jnp.float32)
    bk32 = bk.reshape(1, D).astype(jnp.float32)
    bv32 = (bv.reshape(1, D) * inv).astype(jnp.float32)

    n_tc = _num_tensorcores_per_device()
    min_steps = min(B, 2 * n_tc) if n_tc > 1 else 1       # >=2 steps/TC only on megacore parts
    TB = _pick_batch_tile(B, C, H, D, jnp.dtype(cdt).itemsize, min_steps)
    if batch_tile is not None:
        TB = batch_tile
    assert B % TB == 0, "batch tile must divide the batch"

    if C % 8 == 0:
        # Free row-major re-view in the wrapper: the BlockSpec DMA delivers rows
        # already in fused-projection matmul layout (no in-kernel input reshape).
        qx = q.reshape(B * C, H).astype(cdt)
        kx = k.reshape(B * C, H).astype(cdt)
        vx = v.reshape(B * C, H).astype(cdt)
        qkv_spec = lambda: pl.BlockSpec((TB * C, H), lambda b: (b, 0))
    else:
        # Fallback: 3-D blocks are always tile-legal; the kernel re-views them
        # (relayout cost when C % 8 != 0, still correct).
        qx, kx, vx = (t.astype(cdt) for t in (q, k, v))
        qkv_spec = lambda: pl.BlockSpec((TB, C, H), lambda b: (b, 0, 0))

    # Constant-index weight/bias operands never re-fetch: single-buffer them so
    # the dead second pipeline buffer does not eat VMEM (matters most on v7x).
    def wspec(shape):
        return pl.BlockSpec(shape, lambda b: (0,) * len(shape),
                            pipeline_mode=pl.Buffered(1))

    kernel = functools.partial(self_attn_kernel, tb=TB, c=C,
                               approx_recip=not precise)

    phys = _vmem_capacity_bytes()
    out = pl.pallas_call(
        kernel,
        out_shape=jax.ShapeDtypeStruct((B, D, C), jnp.float32),
        grid=(B // TB,),
        in_specs=[
            qkv_spec(), qkv_spec(), qkv_spec(),            # q, k, v
            wspec((H, D)), wspec((1, D)),                  # Wq^T, bq
            wspec((H, D)), wspec((1, D)),                  # Wk^T, bk
            wspec((H, D)), wspec((1, D)),                  # Wv^T * inv, bv * inv
        ],
        out_specs=pl.BlockSpec((TB, D, C), lambda b: (b, 0, 0)),
        compiler_params=pltpu.CompilerParams(
            dimension_semantics=("parallel",),
            # generation-aware scoped-VMEM cap: ~48 MiB on 64 MiB v7x,
            # ~96 MiB on 128 MiB v5e/v6e (v5e's 16 MiB default is too small).
            vmem_limit_bytes=min(int(phys * 0.75), 112 * 1024 * 1024)),
    )(qx, kx, vx, wq_t, bq32, wk_t, bk32, wv_t, bv32)

    # torch: out.view(B, C, H) — raw row-major reinterpret of the (B, D, C)
    # buffer (free in XLA); the /sqrt(in_dim) was folded into the value proj.
    return out.reshape(B, C, H)


# --------------------------------------------------------------------------- #
# Pure-JAX reference (mirrors the PyTorch forward exactly, full f32)           #
# --------------------------------------------------------------------------- #
def self_attn_ref(q, k, v, wq, bq, wk, bk, wv, bv):
    B, C, H = q.shape
    in_dim = wq.shape[1]
    hp = jax.lax.Precision.HIGHEST
    qp = jnp.transpose(q, (0, 2, 1))                       # (B, H, C)
    kp = jnp.transpose(k, (0, 2, 1))
    vp = jnp.transpose(v, (0, 2, 1))
    proj_q = jnp.einsum('oh,bhc->boc', wq, qp, precision=hp) + bq.reshape(-1)[None, :, None]
    proj_k = jnp.einsum('oh,bhc->boc', wk, kp, precision=hp) + bk.reshape(-1)[None, :, None]
    proj_v = jnp.einsum('oh,bhc->boc', wv, vp, precision=hp) + bv.reshape(-1)[None, :, None]
    energy = jnp.einsum('bmc,bnc->bmn', proj_q, proj_k, precision=hp)
    att = jax.nn.softmax(energy, axis=-1)
    out = jnp.einsum('bmn,bnc->bmc', att, proj_v, precision=hp)
    return out.reshape(B, C, H) / math.sqrt(in_dim)


# --------------------------------------------------------------------------- #
# Demo / self-test                                                             #
# --------------------------------------------------------------------------- #
if __name__ == "__main__":
    # Module constraint: in_dim == out_dim == H.  C is chosen as a multiple of
    # 128 so the (B, D, C) output stores are lane-dense (unmasked vst).
    B, C, H = 8, 128, 32
    in_dim = out_dim = H

    key = jax.random.PRNGKey(0)
    kq, kk, kv, k1, k2, k3, k4, k5, k6 = jax.random.split(key, 9)

    q = jax.random.normal(kq, (B, C, H), dtype=jnp.float32)
    k = jax.random.normal(kk, (B, C, H), dtype=jnp.float32)
    v = jax.random.normal(kv, (B, C, H), dtype=jnp.float32)

    # Deterministic Conv1d(kernel_size=1) parameters (synthetic init).
    scale = 1.0 / math.sqrt(in_dim)
    wq = jax.random.uniform(k1, (out_dim, in_dim), jnp.float32, -scale, scale)
    wk = jax.random.uniform(k2, (out_dim, in_dim), jnp.float32, -scale, scale)
    wv = jax.random.uniform(k3, (out_dim, in_dim), jnp.float32, -scale, scale)
    bq = jax.random.uniform(k4, (1, out_dim), jnp.float32, -scale, scale)
    bk = jax.random.uniform(k5, (1, out_dim), jnp.float32, -scale, scale)
    bv = jax.random.uniform(k6, (1, out_dim), jnp.float32, -scale, scale)

    ref = self_attn_ref(q, k, v, wq, bq, wk, bk, wv, bv)

    # Precise path: f32 MXU operands + exact reciprocal.
    out_f32 = jax.block_until_ready(
        self_attn(q, k, v, wq, bq, wk, bk, wv, bv, precise=True))
    assert out_f32.shape == (B, C, H)
    assert jnp.allclose(out_f32, ref, atol=5e-4, rtol=5e-4), "precise-path mismatch"

    # Perf path: bf16 I/O + MXU operands (f32 accumulation / softmax), approx recip.
    out_bf16 = jax.block_until_ready(
        self_attn(q, k, v, wq, bq, wk, bk, wv, bv, precise=False))
    assert out_bf16.shape == (B, C, H)
    assert jnp.allclose(out_bf16, ref, atol=6e-2, rtol=6e-2), "bf16-path mismatch"

    print("KERNEL_OK")
</pallas_src>

<mosaic_0001>
module attributes {stable_mosaic.version = 11 : i64} {
  func.func @self_attn_kernel(%arg0: i32, %arg1: memref<1024x32xf32, #tpu.memory_space<vmem>>, %arg2: memref<1024x32xf32, #tpu.memory_space<vmem>>, %arg3: memref<1024x32xf32, #tpu.memory_space<vmem>>, %arg4: memref<32x32xf32, #tpu.memory_space<vmem>>, %arg5: memref<1x32xf32, #tpu.memory_space<vmem>>, %arg6: memref<32x32xf32, #tpu.memory_space<vmem>>, %arg7: memref<1x32xf32, #tpu.memory_space<vmem>>, %arg8: memref<32x32xf32, #tpu.memory_space<vmem>>, %arg9: memref<1x32xf32, #tpu.memory_space<vmem>>, %arg10: memref<8x32x128xf32, #tpu.memory_space<vmem>>) attributes {dimension_semantics = [#tpu.dimension_semantics<parallel>], iteration_bounds = array<i64: 1>, scalar_prefetch = 0 : i64, scratch_operands = 0 : i64, tpu.core_type = #tpu.core_type<tc>, window_params = [{transform_indices = @transform_0, window_bounds = array<i64: 1024, 32>}, {transform_indices = @transform_1, window_bounds = array<i64: 1024, 32>}, {transform_indices = @transform_2, window_bounds = array<i64: 1024, 32>}, {pipeline_mode = #tpu.pipeline_mode<synchronous>, transform_indices = @transform_3, window_bounds = array<i64: 32, 32>}, {pipeline_mode = #tpu.pipeline_mode<synchronous>, transform_indices = @transform_4, window_bounds = array<i64: 1, 32>}, {pipeline_mode = #tpu.pipeline_mode<synchronous>, transform_indices = @transform_5, window_bounds = array<i64: 32, 32>}, {pipeline_mode = #tpu.pipeline_mode<synchronous>, transform_indices = @transform_6, window_bounds = array<i64: 1, 32>}, {pipeline_mode = #tpu.pipeline_mode<synchronous>, transform_indices = @transform_7, window_bounds = array<i64: 32, 32>}, {pipeline_mode = #tpu.pipeline_mode<synchronous>, transform_indices = @transform_8, window_bounds = array<i64: 1, 32>}, {transform_indices = @transform_9, window_bounds = array<i64: 8, 32, 128>}]} {
    %c0 = arith.constant 0 : index
    %c0_0 = arith.constant 0 : index
    %0 = vector.load %arg1[%c0, %c0_0] : memref<1024x32xf32, #tpu.memory_space<vmem>>, vector<1024x32xf32>
    %c0_1 = arith.constant 0 : index
    %c0_2 = arith.constant 0 : index
    %1 = vector.load %arg2[%c0_1, %c0_2] : memref<1024x32xf32, #tpu.memory_space<vmem>>, vector<1024x32xf32>
    %c0_3 = arith.constant 0 : index
    %c0_4 = arith.constant 0 : index
    %2 = vector.load %arg3[%c0_3, %c0_4] : memref<1024x32xf32, #tpu.memory_space<vmem>>, vector<1024x32xf32>
    %c0_5 = arith.constant 0 : index
    %c0_6 = arith.constant 0 : index
    %3 = vector.load %arg4[%c0_5, %c0_6] : memref<32x32xf32, #tpu.memory_space<vmem>>, vector<32x32xf32>
    %cst = arith.constant dense<0.000000e+00> : vector<1024x32xf32>
    %4 = tpu.matmul %0, %3, %cst {dimension_numbers = #tpu.dot_dimension_numbers<[1], [0], [0], [1], [0, 0, 1, 1], [], []>} : vector<1024x32xf32>, vector<32x32xf32>, vector<1024x32xf32> -> vector<1024x32xf32>
    %c0_7 = arith.constant 0 : index
    %c0_8 = arith.constant 0 : index
    %5 = vector.load %arg5[%c0_7, %c0_8] : memref<1x32xf32, #tpu.memory_space<vmem>>, vector<1x32xf32>
    %6 = vector.broadcast %5 : vector<1x32xf32> to vector<1024x32xf32>
    %7 = arith.addf %4, %6 : vector<1024x32xf32>
    %c0_9 = arith.constant 0 : index
    %c0_10 = arith.constant 0 : index
    %8 = vector.load %arg6[%c0_9, %c0_10] : memref<32x32xf32, #tpu.memory_space<vmem>>, vector<32x32xf32>
    %cst_11 = arith.constant dense<0.000000e+00> : vector<1024x32xf32>
    %9 = tpu.matmul %1, %8, %cst_11 {dimension_numbers = #tpu.dot_dimension_numbers<[1], [0], [0], [1], [0, 0, 1, 1], [], []>} : vector<1024x32xf32>, vector<32x32xf32>, vector<1024x32xf32> -> vector<1024x32xf32>
    %c0_12 = arith.constant 0 : index
    %c0_13 = arith.constant 0 : index
    %10 = vector.load %arg7[%c0_12, %c0_13] : memref<1x32xf32, #tpu.memory_space<vmem>>, vector<1x32xf32>
    %11 = vector.broadcast %10 : vector<1x32xf32> to vector<1024x32xf32>
    %12 = arith.addf %9, %11 : vector<1024x32xf32>
    %c0_14 = arith.constant 0 : index
    %c0_15 = arith.constant 0 : index
    %13 = vector.load %arg8[%c0_14, %c0_15] : memref<32x32xf32, #tpu.memory_space<vmem>>, vector<32x32xf32>
    %cst_16 = arith.constant dense<0.000000e+00> : vector<1024x32xf32>
    %14 = tpu.matmul %2, %13, %cst_16 {dimension_numbers = #tpu.dot_dimension_numbers<[1], [0], [0], [1], [0, 0, 1, 1], [], []>} : vector<1024x32xf32>, vector<32x32xf32>, vector<1024x32xf32> -> vector<1024x32xf32>
    %c0_17 = arith.constant 0 : index
    %c0_18 = arith.constant 0 : index
    %15 = vector.load %arg9[%c0_17, %c0_18] : memref<1x32xf32, #tpu.memory_space<vmem>>, vector<1x32xf32>
    %16 = vector.broadcast %15 : vector<1x32xf32> to vector<1024x32xf32>
    %17 = arith.addf %14, %16 : vector<1024x32xf32>
    %18 = vector.shape_cast %7 : vector<1024x32xf32> to vector<8x128x32xf32>
    %19 = vector.shape_cast %12 : vector<1024x32xf32> to vector<8x128x32xf32>
    %20 = vector.shape_cast %17 : vector<1024x32xf32> to vector<8x128x32xf32>
    %cst_19 = arith.constant dense<0.000000e+00> : vector<8x32x32xf32>
    %21 = tpu.matmul %18, %19, %cst_19 {dimension_numbers = #tpu.dot_dimension_numbers<[1], [1], [2], [2], [0, 0, 0, 2, 1, 2], [0], [0]>} : vector<8x128x32xf32>, vector<8x128x32xf32>, vector<8x32x32xf32> -> vector<8x32x32xf32>
    %cst_20 = arith.constant dense<0xFF800000> : vector<8x32xf32>
    %22 = vector.multi_reduction <maximumf>, %21, %cst_20 [2] : vector<8x32x32xf32> to vector<8x32xf32>
    %23 = vector.shape_cast %22 : vector<8x32xf32> to vector<8x32x1xf32>
    %24 = vector.broadcast %23 : vector<8x32x1xf32> to vector<8x32x32xf32>
    %25 = arith.subf %21, %24 : vector<8x32x32xf32>
    %26 = math.exp %25 : vector<8x32x32xf32>
    %cst_21 = arith.constant dense<0.000000e+00> : vector<8x32xf32>
    %27 = vector.multi_reduction <add>, %26, %cst_21 [2] : vector<8x32x32xf32> to vector<8x32xf32>
    %28 = vector.shape_cast %27 : vector<8x32xf32> to vector<8x32x1xf32>
    %29 = tpu.reciprocal %28 : vector<8x32x1xf32> -> vector<8x32x1xf32>
    %30 = vector.broadcast %29 : vector<8x32x1xf32> to vector<8x32x32xf32>
    %31 = arith.mulf %26, %30 : vector<8x32x32xf32>
    %cst_22 = arith.constant dense<0.000000e+00> : vector<8x32x128xf32>
    %32 = tpu.matmul %31, %20, %cst_22 {dimension_numbers = #tpu.dot_dimension_numbers<[2], [2], [1], [1], [0, 0, 0, 1, 1, 1], [0], [0]>} : vector<8x32x32xf32>, vector<8x128x32xf32>, vector<8x32x128xf32> -> vector<8x32x128xf32>
    %c0_23 = arith.constant 0 : index
    %c0_24 = arith.constant 0 : index
    %c0_25 = arith.constant 0 : index
    %33 = vector.load %arg10[%c0_23, %c0_24, %c0_25] : memref<8x32x128xf32, #tpu.memory_space<vmem>>, vector<8x32x128xf32>
    tpu.vector_store %arg10[%c0_23, %c0_24, %c0_25], %32 {strides = array<i32>} : memref<8x32x128xf32, #tpu.memory_space<vmem>>, vector<8x32x128xf32>,
    return
  }
  func.func @transform_0(%arg0: i32) -> (i32, i32) {
    %c0_i32 = arith.constant 0 : i32
    %c0_i32_0 = arith.constant 0 : i32
    return %arg0, %c0_i32 : i32, i32
  }
  func.func @transform_1(%arg0: i32) -> (i32, i32) {
    %c0_i32 = arith.constant 0 : i32
    %c0_i32_0 = arith.constant 0 : i32
    return %arg0, %c0_i32 : i32, i32
  }
  func.func @transform_2(%arg0: i32) -> (i32, i32) {
    %c0_i32 = arith.constant 0 : i32
    %c0_i32_0 = arith.constant 0 : i32
    return %arg0, %c0_i32 : i32, i32
  }
  func.func @transform_3(%arg0: i32) -> (i32, i32) {
    %c0_i32 = arith.constant 0 : i32
    %c0_i32_0 = arith.constant 0 : i32
    %c0_i32_1 = arith.constant 0 : i32
    return %c0_i32, %c0_i32_0 : i32, i32
  }
  func.func @transform_4(%arg0: i32) -> (i32, i32) {
    %c0_i32 = arith.constant 0 : i32
    %c0_i32_0 = arith.constant 0 : i32
    %c0_i32_1 = arith.constant 0 : i32
    return %c0_i32, %c0_i32_0 : i32, i32
  }
  func.func @transform_5(%arg0: i32) -> (i32, i32) {
    %c0_i32 = arith.constant 0 : i32
    %c0_i32_0 = arith.constant 0 : i32
    %c0_i32_1 = arith.constant 0 : i32
    return %c0_i32, %c0_i32_0 : i32, i32
  }
  func.func @transform_6(%arg0: i32) -> (i32, i32) {
    %c0_i32 = arith.constant 0 : i32
    %c0_i32_0 = arith.constant 0 : i32
    %c0_i32_1 = arith.constant 0 : i32
    return %c0_i32, %c0_i32_0 : i32, i32
  }
  func.func @transform_7(%arg0: i32) -> (i32, i32) {
    %c0_i32 = arith.constant 0 : i32
    %c0_i32_0 = arith.constant 0 : i32
    %c0_i32_1 = arith.constant 0 : i32
    return %c0_i32, %c0_i32_0 : i32, i32
  }
  func.func @transform_8(%arg0: i32) -> (i32, i32) {
    %c0_i32 = arith.constant 0 : i32
    %c0_i32_0 = arith.constant 0 : i32
    %c0_i32_1 = arith.constant 0 : i32
    return %c0_i32, %c0_i32_0 : i32, i32
  }
  func.func @transform_9(%arg0: i32) -> (i32, i32, i32) {
    %c0_i32 = arith.constant 0 : i32
    %c0_i32_0 = arith.constant 0 : i32
    %c0_i32_1 = arith.constant 0 : i32
    return %arg0, %c0_i32, %c0_i32_0 : i32, i32, i32
  }
}

</mosaic_0001>

<bundles_post_ra>
// kernel: tpu_custom_call.1
= control target key start
LH: loop header
LB: loop body
LE: loop exit
PB: predicated region body
PF: predicated region fallthrough
CT: control target
= control target key end

     0   :  { %vm428_vm0 = vcmask 261120   ;;  %s12711_s0 = inlined_call_operand.vmem [shape: f32[1024,32], index: 0, kind: input, shape index: {}]   ;;  %s12712_s1 = inlined_call_operand.vmem [shape: f32[1024,32], index: 1, kind: input, shape index: {}]   ;;  %s12713_s2 = inlined_call_operand.vmem [shape: f32[1024,32], index: 2, kind: input, shape index: {}]   ;;  %s12714_s3 = inlined_call_operand.vmem [shape: f32[32,32], index: 3, kind: input, shape index: {}]   ;;  %s12715_s4 = inlined_call_operand.vmem [shape: f32[1,32], index: 4, kind: input, shape index: {}]   ;;  %s12716_s5 = inlined_call_operand.vmem [shape: f32[32,32], index: 5, kind: input, shape index: {}]   ;;  %s12717_s6 = inlined_call_operand.vmem [shape: f32[1,32], index: 6, kind: input, shape index: {}]   ;;  %s12718_s7 = inlined_call_operand.vmem [shape: f32[32,32], index: 7, kind: input, shape index: {}]   ;;  %s12719_s8 = inlined_call_operand.vmem [shape: f32[1,32], index: 8, kind: input, shape index: {}]   ;;  %s12720_s9 = inlined_call_operand.hbm [shape: f32[8,32,128], index: 9, kind: output, shape index: {}]  }
   0x1   :  { %v420_v0 = vld [vmem:[%s12714_s3 + $0x18] sm:$0xff]  ;;  %v419_v1 = vld [vmem:[%s12714_s3 + $0x10] sm:$0xff]  ;;  %v33_v2 = vld [vmem:[%s12711_s0] sm:$0xff] }
   0x2   :  { %7477 = vmatprep.subr.mxu0 %v420_v0  ;;  %v418_v3 = vld [vmem:[%s12714_s3 + $0x8] sm:$0xff]  ;;  %7485 = vmatprep.mubr.msk.f32.mxu0 %vm428_vm0, %v33_v2  ;;  %v417_v4 = vld [vmem:[%s12714_s3] sm:$0xff]  ;;  %v35_v6 = vld [vmem:[%s12711_s0 + $0x10] sm:$0xff] }
   0x3   :  { %7478 = vmatpush3.msra.mxu0 %v420_v0  ;;  %v34_v5 = vld [vmem:[%s12711_s0 + $0x8] sm:$0xff]  ;;  %v36_v7 = vld [vmem:[%s12711_s0 + $0x18] sm:$0xff]  ;;  %v37_v8 = vld [vmem:[%s12711_s0 + $0x20] sm:$0xff] }
   0x4   :  { %7479 = vmatprep.subr.mxu0 %v419_v1  ;;  %v38_v9 = vld [vmem:[%s12711_s0 + $0x28] sm:$0xff]  ;;  %v39_v10 = vld [vmem:[%s12711_s0 + $0x30] sm:$0xff]  ;;  %v40_v11 = vld [vmem:[%s12711_s0 + $0x38] sm:$0xff] }
   0x5   :  { %7480 = vmatpush3.msra.mxu0 %v419_v1  ;;  %v1521_v12 = vld [vmem:[%s12716_s5 + $0x18] sm:$0xff]  ;;  %v41_v13 = vld [vmem:[%s12711_s0 + $0x40] sm:$0xff]  ;;  %v1520_v14 = vld [vmem:[%s12716_s5 + $0x10] sm:$0xff] }
   0x6   :  { %7481 = vmatprep.subr.mxu0 %v418_v3  ;;  %8685 = vmatprep.subr.mxu1 %v1521_v12  ;;  %v1519_v15 = vld [vmem:[%s12716_s5 + $0x8] sm:$0xff]  ;;  %v169_v16 = vld [vmem:[%s12712_s1 + $0x40] sm:$0xff]  ;;  %v43_v19 = vld [vmem:[%s12711_s0 + $0x50] sm:$0xff] }
   0x7   :  { %7482 = vmatpush3.msra.mxu0 %v418_v3  ;;  %8689 = vmatpush3.msra.mxu1 %v1521_v12  ;;  %v42_v17 = vld [vmem:[%s12711_s0 + $0x48] sm:$0xff]  ;;  %v1518_v18 = vld [vmem:[%s12716_s5] sm:$0xff]  ;;  %v171_v21 = vld [vmem:[%s12712_s1 + $0x50] sm:$0xff] }
   0x8   :  { %7483 = vmatprep.subr.mxu0 %v417_v4  ;;  %8686 = vmatprep.subr.mxu1 %v1520_v14  ;;  %v170_v20 = vld [vmem:[%s12712_s1 + $0x48] sm:$0xff]  ;;  %v44_v22 = vld [vmem:[%s12711_s0 + $0x58] sm:$0xff]  ;;  %v45_v23 = vld [vmem:[%s12711_s0 + $0x60] sm:$0xff] }
   0x9   :  { %7484 = vmatpush3.msra.mxu0 %v417_v4  ;;  %8690 = vmatpush3.msra.mxu1 %v1520_v14  ;;  %v172_v24 = vld [vmem:[%s12712_s1 + $0x58] sm:$0xff]  ;;  %v173_v25 = vld [vmem:[%s12712_s1 + $0x60] sm:$0xff]  ;;  %v46_v26 = vld [vmem:[%s12711_s0 + $0x68] sm:$0xff] }
   0xa   :  { %7486 = vmatmul.mubr.msk.f32.vlgmr.msra.gmra.mxu0 %vm428_vm0, %v34_v5  ;;  %7677 = vmatprep.subr.mxu0 %v1521_v12  ;;  %v47_v27 = vld [vmem:[%s12711_s0 + $0x70] sm:$0xff] }
   0xb   :  { %7488 = vmatprep.mubr.msk.f32.mxu0 %vm428_vm0, %v35_v6  ;;  %7678 = vmatpush3.msra.mxu0 %v1521_v12 }
   0xc   :  { %8687 = vmatprep.subr.mxu1 %v1519_v15  ;;  %7697 = vmatprep.mubr.msk.f32.mxu1 %vm428_vm0, %v169_v16 }
   0xd   :  { %8691 = vmatpush3.msra.mxu1 %v1519_v15  ;;  %7679 = vmatprep.subr.mxu0 %v1520_v14 }
   0xe   :  { %7489 = vmatmul.mubr.msk.f32.gmra.mxu0 %vm428_vm0, %v36_v7  ;;  %8688 = vmatprep.subr.mxu1 %v1518_v18 }
   0xf   :  { %7491 = vmatprep.mubr.msk.f32.mxu0 %vm428_vm0, %v37_v8  ;;  %8692 = vmatpush3.msra.mxu1 %v1518_v18 }
  0x10   :  { %7698 = vmatmul.mubr.msk.f32.vlgmr.msra.gmra.mxu1 %vm428_vm0, %v170_v20  ;;  %7680 = vmatpush3.msra.mxu0 %v1520_v14 }
  0x11   :  { %7700 = vmatprep.mubr.msk.f32.mxu1 %vm428_vm0, %v171_v21  ;;  %7681 = vmatprep.subr.mxu0 %v1519_v15 }
  0x12   :  { %7492 = vmatmul.mubr.msk.f32.gmra.mxu0 %vm428_vm0, %v38_v9 }
  0x13   :  { %7494 = vmatprep.mubr.msk.f32.mxu0 %vm428_vm0, %v39_v10  ;;  %7682 = vmatpush3.msra.mxu0 %v1519_v15 }
  0x14   :  { %7701 = vmatmul.mubr.msk.f32.gmra.mxu1 %vm428_vm0, %v172_v24  ;;  %7683 = vmatprep.subr.mxu0 %v1518_v18 }
  0x16   :  { %7495 = vmatmul.mubr.msk.f32.gmra.mxu0 %vm428_vm0, %v40_v11 }
  0x17   :  { %7497 = vmatprep.mubr.msk.f32.mxu0 %vm428_vm0, %v41_v13 }
  0x1a   :  { %7498 = vmatmul.mubr.msk.f32.gmra.mxu0 %vm428_vm0, %v42_v17 }
  0x1b   :  { %7500 = vmatprep.mubr.msk.f32.mxu0 %vm428_vm0, %v43_v19 }
  0x1e   :  { %7501 = vmatmul.mubr.msk.f32.gmra.mxu0 %vm428_vm0, %v44_v22 }
  0x1f   :  { %7503 = vmatprep.mubr.msk.f32.mxu0 %vm428_vm0, %v45_v23 }
  0x20   :  { %14 = vsyncpa [#allocation3], 0  ;;  %7703 = vmatprep.mubr.msk.f32.mxu1 %vm428_vm0, %v173_v25  ;;  %v174_v28 = vld [vmem:[%s12712_s1 + $0x68] sm:$0xff]  ;;  %7684 = vmatpush3.msra.mxu0 %v1518_v18  ;;  %v175_v29 = vld [vmem:[%s12712_s1 + $0x70] sm:$0xff] }
  0x21   :  { %v48_v30 = vld [vmem:[%s12711_s0 + $0x78] sm:$0xff]  ;;  %v49_v31 = vld [vmem:[%s12711_s0 + $0x80] sm:$0xff]  ;;  %7704 = vmatmul.mubr.msk.f32.gmra.mxu1 %vm428_vm0, %v174_v28  ;;  %v50_v33 = vld [vmem:[%s12711_s0 + $0x88] sm:$0xff] }
  0x22   :  { %7504 = vmatmul.mubr.msk.f32.gmra.mxu0 %vm428_vm0, %v46_v26  ;;  %7706 = vmatprep.mubr.msk.f32.mxu1 %vm428_vm0, %v175_v29  ;;  %v176_v32 = vld [vmem:[%s12712_s1 + $0x78] sm:$0xff]  ;;  %v51_v34 = vld [vmem:[%s12711_s0 + $0x90] sm:$0xff]  ;;  %v53_v36 = vld [vmem:[%s12711_s0 + $0xa0] sm:$0xff] }
  0x23   :  { %7506 = vmatprep.mubr.msk.f32.mxu0 %vm428_vm0, %v47_v27  ;;  %v52_v35 = vld [vmem:[%s12711_s0 + $0x98] sm:$0xff]  ;;  %v54_v37 = vld [vmem:[%s12711_s0 + $0xa8] sm:$0xff]  ;;  %v55_v38 = vld [vmem:[%s12711_s0 + $0xb0] sm:$0xff] }
  0x24   :  { %v56_v39 = vld [vmem:[%s12711_s0 + $0xb8] sm:$0xff]  ;;  %v57_v40 = vld [vmem:[%s12711_s0 + $0xc0] sm:$0xff]  ;;  %v58_v41 = vld [vmem:[%s12711_s0 + $0xc8] sm:$0xff] }
  0x25   :  { %7707 = vmatmul.mubr.msk.f32.gmra.mxu1 %vm428_vm0, %v176_v32  ;;  %v59_v42 = vld [vmem:[%s12711_s0 + $0xd0] sm:$0xff]  ;;  %v60_v43 = vld [vmem:[%s12711_s0 + $0xd8] sm:$0xff]  ;;  %v61_v44 = vld [vmem:[%s12711_s0 + $0xe0] sm:$0xff] }
  0x26   :  { %7507 = vmatmul.mubr.msk.f32.gmra.mxu0 %vm428_vm0, %v48_v30  ;;  %v62_v45 = vld [vmem:[%s12711_s0 + $0xe8] sm:$0xff]  ;;  %v63_v46 = vld [vmem:[%s12711_s0 + $0xf0] sm:$0xff]  ;;  %v64_v47 = vld [vmem:[%s12711_s0 + $0xf8] sm:$0xff] }
  0x27   :  { %7509 = vmatprep.mubr.msk.f32.mxu0 %vm428_vm0, %v49_v31  ;;  %v65_v48 = vld [vmem:[%s12711_s0 + $0x100] sm:$0xff]  ;;  %v66_v49 = vld [vmem:[%s12711_s0 + $0x108] sm:$0xff]  ;;  %v67_v50 = vld [vmem:[%s12711_s0 + $0x110] sm:$0xff] }
  0x28   :  { %v68_v51 = vld [vmem:[%s12711_s0 + $0x118] sm:$0xff]  ;;  %v69_v52 = vld [vmem:[%s12711_s0 + $0x120] sm:$0xff]  ;;  %v70_v53 = vld [vmem:[%s12711_s0 + $0x128] sm:$0xff] }
  0x29   :  { %v71_v54 = vld [vmem:[%s12711_s0 + $0x130] sm:$0xff]  ;;  %v72_v55 = vld [vmem:[%s12711_s0 + $0x138] sm:$0xff]  ;;  %v73_v56 = vld [vmem:[%s12711_s0 + $0x140] sm:$0xff] }
  0x2a   :  { %7510 = vmatmul.mubr.msk.f32.gmra.mxu0 %vm428_vm0, %v50_v33  ;;  %v74_v57 = vld [vmem:[%s12711_s0 + $0x148] sm:$0xff]  ;;  %v75_v58 = vld [vmem:[%s12711_s0 + $0x150] sm:$0xff]  ;;  %v76_v59 = vld [vmem:[%s12711_s0 + $0x158] sm:$0xff] }
  0x2b   :  { %7512 = vmatprep.mubr.msk.f32.mxu0 %vm428_vm0, %v51_v34  ;;  %v77_v60 = vld [vmem:[%s12711_s0 + $0x160] sm:$0xff]  ;;  %v78_v61 = vld [vmem:[%s12711_s0 + $0x168] sm:$0xff]  ;;  %v79_v62 = vld [vmem:[%s12711_s0 + $0x170] sm:$0xff] }
  0x2c   :  { %v80_v63 = vld [vmem:[%s12711_s0 + $0x178] sm:$0xff]  ;;  %v81_v0 = vld [vmem:[%s12711_s0 + $0x180] sm:$0xff]  ;;  %v82_v1 = vld [vmem:[%s12711_s0 + $0x188] sm:$0xff] }
  0x2d   :  { %v83_v2 = vld [vmem:[%s12711_s0 + $0x190] sm:$0xff]  ;;  %v84_v3 = vld [vmem:[%s12711_s0 + $0x198] sm:$0xff]  ;;  %v85_v4 = vld [vmem:[%s12711_s0 + $0x1a0] sm:$0xff] }
  0x2e   :  { %7513 = vmatmul.mubr.msk.f32.gmra.mxu0 %vm428_vm0, %v52_v35  ;;  %v86_v5 = vld [vmem:[%s12711_s0 + $0x1a8] sm:$0xff]  ;;  %v87_v6 = vld [vmem:[%s12711_s0 + $0x1b0] sm:$0xff]  ;;  %v88_v7 = vld [vmem:[%s12711_s0 + $0x1b8] sm:$0xff] }
  0x2f   :  { %7515 = vmatprep.mubr.msk.f32.mxu0 %vm428_vm0, %v53_v36  ;;  %v89_v8 = vld [vmem:[%s12711_s0 + $0x1c0] sm:$0xff]  ;;  %v90_v9 = vld [vmem:[%s12711_s0 + $0x1c8] sm:$0xff]  ;;  %v91_v10 = vld [vmem:[%s12711_s0 + $0x1d0] sm:$0xff] }
  0x30   :  { %v92_v11 = vld [vmem:[%s12711_s0 + $0x1d8] sm:$0xff]  ;;  %v93_v12 = vld [vmem:[%s12711_s0 + $0x1e0] sm:$0xff]  ;;  %v94_v13 = vld [vmem:[%s12711_s0 + $0x1e8] sm:$0xff] }
  0x31   :  { %v95_v14 = vld [vmem:[%s12711_s0 + $0x1f0] sm:$0xff]  ;;  %v96_v15 = vld [vmem:[%s12711_s0 + $0x1f8] sm:$0xff]  ;;  %v97_v16 = vld [vmem:[%s12711_s0 + $0x200] sm:$0xff] }
  0x32   :  { %7516 = vmatmul.mubr.msk.f32.gmra.mxu0 %vm428_vm0, %v54_v37  ;;  %v177_v17 = vld [vmem:[%s12712_s1 + $0x80] sm:$0xff]  ;;  %v98_v18 = vld [vmem:[%s12711_s0 + $0x208] sm:$0xff]  ;;  %v99_v20 = vld [vmem:[%s12711_s0 + $0x210] sm:$0xff] }
  0x33   :  { %7518 = vmatprep.mubr.msk.f32.mxu0 %vm428_vm0, %v55_v38  ;;  %7709 = vmatprep.mubr.msk.f32.mxu1 %vm428_vm0, %v177_v17  ;;  %v178_v19 = vld [vmem:[%s12712_s1 + $0x88] sm:$0xff]  ;;  %v179_v21 = vld [vmem:[%s12712_s1 + $0x90] sm:$0xff]  ;;  %v100_v22 = vld [vmem:[%s12711_s0 + $0x218] sm:$0xff] }
  0x34   :  { %7710 = vmatmul.mubr.msk.f32.gmra.mxu1 %vm428_vm0, %v178_v19  ;;  %v180_v23 = vld [vmem:[%s12712_s1 + $0x98] sm:$0xff]  ;;  %v101_v24 = vld [vmem:[%s12711_s0 + $0x220] sm:$0xff]  ;;  %v102_v26 = vld [vmem:[%s12711_s0 + $0x228] sm:$0xff] }
  0x35   :  { %7712 = vmatprep.mubr.msk.f32.mxu1 %vm428_vm0, %v179_v21  ;;  %v181_v25 = vld [vmem:[%s12712_s1 + $0xa0] sm:$0xff]  ;;  %v182_v27 = vld [vmem:[%s12712_s1 + $0xa8] sm:$0xff]  ;;  %v103_v28 = vld [vmem:[%s12711_s0 + $0x230] sm:$0xff] }
  0x36   :  { %7519 = vmatmul.mubr.msk.f32.gmra.mxu0 %vm428_vm0, %v56_v39  ;;  %v183_v29 = vld [vmem:[%s12712_s1 + $0xb0] sm:$0xff]  ;;  %v104_v30 = vld [vmem:[%s12711_s0 + $0x238] sm:$0xff]  ;;  %v105_v32 = vld [vmem:[%s12711_s0 + $0x240] sm:$0xff] }
  0x37   :  { %7521 = vmatprep.mubr.msk.f32.mxu0 %vm428_vm0, %v57_v40  ;;  %v184_v31 = vld [vmem:[%s12712_s1 + $0xb8] sm:$0xff]  ;;  %v185_v33 = vld [vmem:[%s12712_s1 + $0xc0] sm:$0xff]  ;;  %v106_v34 = vld [vmem:[%s12711_s0 + $0x248] sm:$0xff] }
  0x38   :  { %7713 = vmatmul.mubr.msk.f32.gmra.mxu1 %vm428_vm0, %v180_v23  ;;  %v186_v35 = vld [vmem:[%s12712_s1 + $0xc8] sm:$0xff]  ;;  %v107_v36 = vld [vmem:[%s12711_s0 + $0x250] sm:$0xff]  ;;  %v108_v38 = vld [vmem:[%s12711_s0 + $0x258] sm:$0xff] }
  0x39   :  { %7715 = vmatprep.mubr.msk.f32.mxu1 %vm428_vm0, %v181_v25  ;;  %v187_v37 = vld [vmem:[%s12712_s1 + $0xd0] sm:$0xff]  ;;  %v188_v39 = vld [vmem:[%s12712_s1 + $0xd8] sm:$0xff]  ;;  %v109_v40 = vld [vmem:[%s12711_s0 + $0x260] sm:$0xff] }
  0x3a   :  { %7522 = vmatmul.mubr.msk.f32.gmra.mxu0 %vm428_vm0, %v58_v41  ;;  %v189_v41 = vld [vmem:[%s12712_s1 + $0xe0] sm:$0xff]  ;;  %v210_v19 = vld [vmem:[%s12712_s1 + $0x188] sm:$0xff]  ;;  %v132_v23 = vld [vmem:[%s12711_s0 + $0x318] sm:$0xff] }
  0x3b   :  { %7524 = vmatprep.mubr.msk.f32.mxu0 %vm428_vm0, %v59_v42  ;;  %v110_v42 = vld [vmem:[%s12711_s0 + $0x268] sm:$0xff]  ;;  %v209_v17 = vld [vmem:[%s12712_s1 + $0x180] sm:$0xff] }
  0x3c   :  { %7716 = vmatmul.mubr.msk.f32.gmra.mxu1 %vm428_vm0, %v182_v27 }
  0x3d   :  { %7718 = vmatprep.mubr.msk.f32.mxu1 %vm428_vm0, %v183_v29  ;;  %v134_v29 = vld [vmem:[%s12711_s0 + $0x328] sm:$0xff] }
  0x3e   :  { %7525 = vmatmul.mubr.msk.f32.gmra.mxu0 %vm428_vm0, %v60_v43  ;;  %v190_v43 = vld [vmem:[%s12712_s1 + $0xe8] sm:$0xff] }
  0x3f   :  { %7527 = vmatprep.mubr.msk.f32.mxu0 %vm428_vm0, %v61_v44  ;;  %v111_v44 = vld [vmem:[%s12711_s0 + $0x270] sm:$0xff] }
  0x40   :  { %7719 = vmatmul.mubr.msk.f32.gmra.mxu1 %vm428_vm0, %v184_v31 }
  0x41   :  { %7721 = vmatprep.mubr.msk.f32.mxu1 %vm428_vm0, %v185_v33 }
  0x42   :  { %7528 = vmatmul.mubr.msk.f32.gmra.mxu0 %vm428_vm0, %v62_v45  ;;  %v191_v45 = vld [vmem:[%s12712_s1 + $0xf0] sm:$0xff] }
  0x43   :  { %7530 = vmatprep.mubr.msk.f32.mxu0 %vm428_vm0, %v63_v46  ;;  %v112_v46 = vld [vmem:[%s12711_s0 + $0x278] sm:$0xff] }
  0x44   :  { %7722 = vmatmul.mubr.msk.f32.gmra.mxu1 %vm428_vm0, %v186_v35  ;;  %v136_v35 = vld [vmem:[%s12711_s0 + $0x338] sm:$0xff] }
  0x45   :  { %7724 = vmatprep.mubr.msk.f32.mxu1 %vm428_vm0, %v187_v37 }
  0x46   :  { %7531 = vmatmul.mubr.msk.f32.gmra.mxu0 %vm428_vm0, %v64_v47  ;;  %v192_v47 = vld [vmem:[%s12712_s1 + $0xf8] sm:$0xff] }
  0x47   :  { %7533 = vmatprep.mubr.msk.f32.mxu0 %vm428_vm0, %v65_v48  ;;  %v113_v48 = vld [vmem:[%s12711_s0 + $0x280] sm:$0xff] }
  0x48   :  { %7725 = vmatmul.mubr.msk.f32.gmra.mxu1 %vm428_vm0, %v188_v39 }
  0x49   :  { %7727 = vmatprep.mubr.msk.f32.mxu1 %vm428_vm0, %v189_v41  ;;  %v138_v41 = vld [vmem:[%s12711_s0 + $0x348] sm:$0xff] }
  0x4a   :  { %7534 = vmatmul.mubr.msk.f32.gmra.mxu0 %vm428_vm0, %v66_v49  ;;  %v193_v49 = vld [vmem:[%s12712_s1 + $0x100] sm:$0xff] }
  0x4b   :  { %7536 = vmatprep.mubr.msk.f32.mxu0 %vm428_vm0, %v67_v50  ;;  %v114_v50 = vld [vmem:[%s12711_s0 + $0x288] sm:$0xff] }
  0x4c   :  { %7728 = vmatmul.mubr.msk.f32.gmra.mxu1 %vm428_vm0, %v190_v43 }
  0x4d   :  { %7730 = vmatprep.mubr.msk.f32.mxu1 %vm428_vm0, %v191_v45 }
  0x4e   :  { %7537 = vmatmul.mubr.msk.f32.gmra.mxu0 %vm428_vm0, %v68_v51  ;;  %v194_v51 = vld [vmem:[%s12712_s1 + $0x108] sm:$0xff] }
  0x4f   :  { %7539 = vmatprep.mubr.msk.f32.mxu0 %vm428_vm0, %v69_v52  ;;  %v115_v52 = vld [vmem:[%s12711_s0 + $0x290] sm:$0xff] }
  0x50   :  { %7731 = vmatmul.mubr.msk.f32.gmra.mxu1 %vm428_vm0, %v192_v47  ;;  %v140_v47 = vld [vmem:[%s12711_s0 + $0x358] sm:$0xff] }
  0x51   :  { %7733 = vmatprep.mubr.msk.f32.mxu1 %vm428_vm0, %v193_v49 }
  0x52   :  { %7540 = vmatmul.mubr.msk.f32.gmra.mxu0 %vm428_vm0, %v70_v53  ;;  %v195_v53 = vld [vmem:[%s12712_s1 + $0x110] sm:$0xff] }
  0x53   :  { %7542 = vmatprep.mubr.msk.f32.mxu0 %vm428_vm0, %v71_v54  ;;  %v116_v54 = vld [vmem:[%s12711_s0 + $0x298] sm:$0xff] }
  0x54   :  { %7734 = vmatmul.mubr.msk.f32.gmra.mxu1 %vm428_vm0, %v194_v51 }
  0x55   :  { %7736 = vmatprep.mubr.msk.f32.mxu1 %vm428_vm0, %v195_v53 }
  0x56   :  { %7543 = vmatmul.mubr.msk.f32.gmra.mxu0 %vm428_vm0, %v72_v55  ;;  %v196_v55 = vld [vmem:[%s12712_s1 + $0x118] sm:$0xff] }
  0x57   :  { %7545 = vmatprep.mubr.msk.f32.mxu0 %vm428_vm0, %v73_v56  ;;  %v117_v56 = vld [vmem:[%s12711_s0 + $0x2a0] sm:$0xff] }
  0x58   :  { %7737 = vmatmul.mubr.msk.f32.gmra.mxu1 %vm428_vm0, %v196_v55  ;;  %v142_v55 = vld [vmem:[%s12711_s0 + $0x368] sm:$0xff] }
  0x5a   :  { %7546 = vmatmul.mubr.msk.f32.gmra.mxu0 %vm428_vm0, %v74_v57  ;;  %v197_v57 = vld [vmem:[%s12712_s1 + $0x120] sm:$0xff] }
  0x5b   :  { %7548 = vmatprep.mubr.msk.f32.mxu0 %vm428_vm0, %v75_v58  ;;  %v118_v58 = vld [vmem:[%s12711_s0 + $0x2a8] sm:$0xff]  ;;  %7739 = vmatprep.mubr.msk.f32.mxu1 %vm428_vm0, %v197_v57 }
  0x5e   :  { %7549 = vmatmul.mubr.msk.f32.gmra.mxu0 %vm428_vm0, %v76_v59  ;;  %v198_v59 = vld [vmem:[%s12712_s1 + $0x128] sm:$0xff] }
  0x5f   :  { %7551 = vmatprep.mubr.msk.f32.mxu0 %vm428_vm0, %v77_v60  ;;  %v119_v60 = vld [vmem:[%s12711_s0 + $0x2b0] sm:$0xff]  ;;  %7740 = vmatmul.mubr.msk.f32.gmra.mxu1 %vm428_vm0, %v198_v59 }
  0x62   :  { %7552 = vmatmul.mubr.msk.f32.gmra.mxu0 %vm428_vm0, %v78_v61  ;;  %v199_v61 = vld [vmem:[%s12712_s1 + $0x130] sm:$0xff] }
  0x63   :  { %7554 = vmatprep.mubr.msk.f32.mxu0 %vm428_vm0, %v79_v62  ;;  %v120_v62 = vld [vmem:[%s12711_s0 + $0x2b8] sm:$0xff]  ;;  %7742 = vmatprep.mubr.msk.f32.mxu1 %vm428_vm0, %v199_v61 }
  0x66   :  { %7555 = vmatmul.mubr.msk.f32.gmra.mxu0 %vm428_vm0, %v80_v63  ;;  %v200_v63 = vld [vmem:[%s12712_s1 + $0x138] sm:$0xff] }
  0x67   :  { %7557 = vmatprep.mubr.msk.f32.mxu0 %vm428_vm0, %v81_v0  ;;  %v121_v0 = vld [vmem:[%s12711_s0 + $0x2c0] sm:$0xff]  ;;  %7743 = vmatmul.mubr.msk.f32.gmra.mxu1 %vm428_vm0, %v200_v63  ;;  %v144_v63 = vld [vmem:[%s12711_s0 + $0x378] sm:$0xff] }
  0x6a   :  { %7558 = vmatmul.mubr.msk.f32.gmra.mxu0 %vm428_vm0, %v82_v1  ;;  %v201_v1 = vld [vmem:[%s12712_s1 + $0x140] sm:$0xff] }
  0x6b   :  { %7560 = vmatprep.mubr.msk.f32.mxu0 %vm428_vm0, %v83_v2  ;;  %v122_v2 = vld [vmem:[%s12711_s0 + $0x2c8] sm:$0xff]  ;;  %7745 = vmatprep.mubr.msk.f32.mxu1 %vm428_vm0, %v201_v1 }
  0x6e   :  { %7561 = vmatmul.mubr.msk.f32.gmra.mxu0 %vm428_vm0, %v84_v3  ;;  %v202_v3 = vld [vmem:[%s12712_s1 + $0x148] sm:$0xff] }
  0x6f   :  { %7563 = vmatprep.mubr.msk.f32.mxu0 %vm428_vm0, %v85_v4  ;;  %v123_v4 = vld [vmem:[%s12711_s0 + $0x2d0] sm:$0xff]  ;;  %7746 = vmatmul.mubr.msk.f32.gmra.mxu1 %vm428_vm0, %v202_v3 }
  0x72   :  { %7564 = vmatmul.mubr.msk.f32.gmra.mxu0 %vm428_vm0, %v86_v5  ;;  %v203_v5 = vld [vmem:[%s12712_s1 + $0x150] sm:$0xff] }
  0x73   :  { %7566 = vmatprep.mubr.msk.f32.mxu0 %vm428_vm0, %v87_v6  ;;  %v124_v6 = vld [vmem:[%s12711_s0 + $0x2d8] sm:$0xff]  ;;  %7748 = vmatprep.mubr.msk.f32.mxu1 %vm428_vm0, %v203_v5  ;;  %v9848_v5 = vld [vmem:[%s12717_s6] ss:$0 sm:$0xff] }
  0x76   :  { %7567 = vmatmul.mubr.msk.f32.gmra.mxu0 %vm428_vm0, %v88_v7  ;;  %v204_v7 = vld [vmem:[%s12712_s1 + $0x158] sm:$0xff] }
  0x77   :  { %7569 = vmatprep.mubr.msk.f32.mxu0 %vm428_vm0, %v89_v8  ;;  %v125_v8 = vld [vmem:[%s12711_s0 + $0x2e0] sm:$0xff]  ;;  %7749 = vmatmul.mubr.msk.f32.gmra.mxu1 %vm428_vm0, %v204_v7 }
  0x78   :  { %v225_v7 = vld [vmem:[%s12712_s1 + $0x200] sm:$0xff] }
  0x7a   :  { %7570 = vmatmul.mubr.msk.f32.gmra.mxu0 %vm428_vm0, %v90_v9  ;;  %v205_v9 = vld [vmem:[%s12712_s1 + $0x160] sm:$0xff] }
  0x7b   :  { %7572 = vmatprep.mubr.msk.f32.mxu0 %vm428_vm0, %v91_v10  ;;  %v126_v10 = vld [vmem:[%s12711_s0 + $0x2e8] sm:$0xff]  ;;  %7751 = vmatprep.mubr.msk.f32.mxu1 %vm428_vm0, %v205_v9 }
  0x7c   :  { %v226_v9 = vld [vmem:[%s12712_s1 + $0x208] sm:$0xff] }
  0x7e   :  { %7573 = vmatmul.mubr.msk.f32.gmra.mxu0 %vm428_vm0, %v92_v11  ;;  %v206_v11 = vld [vmem:[%s12712_s1 + $0x168] sm:$0xff] }
  0x7f   :  { %7575 = vmatprep.mubr.msk.f32.mxu0 %vm428_vm0, %v93_v12  ;;  %v127_v12 = vld [vmem:[%s12711_s0 + $0x2f0] sm:$0xff]  ;;  %7752 = vmatmul.mubr.msk.f32.gmra.mxu1 %vm428_vm0, %v206_v11 }
  0x80   :  { %v147_v11 = vld [vmem:[%s12711_s0 + $0x390] sm:$0xff] }
  0x82   :  { %7576 = vmatmul.mubr.msk.f32.gmra.mxu0 %vm428_vm0, %v94_v13  ;;  %v207_v13 = vld [vmem:[%s12712_s1 + $0x170] sm:$0xff] }
  0x83   :  { %7578 = vmatprep.mubr.msk.f32.mxu0 %vm428_vm0, %v95_v14  ;;  %v128_v14 = vld [vmem:[%s12711_s0 + $0x2f8] sm:$0xff]  ;;  %7754 = vmatprep.mubr.msk.f32.mxu1 %vm428_vm0, %v207_v13 }
  0x86   :  { %7579 = vmatmul.mubr.msk.f32.gmra.mxu0 %vm428_vm0, %v96_v15  ;;  %v208_v15 = vld [vmem:[%s12712_s1 + $0x178] sm:$0xff] }
  0x87   :  { %7581 = vmatprep.mubr.msk.f32.mxu0 %vm428_vm0, %v97_v16  ;;  %v129_v16 = vld [vmem:[%s12711_s0 + $0x300] sm:$0xff]  ;;  %7755 = vmatmul.mubr.msk.f32.gmra.mxu1 %vm428_vm0, %v208_v15 }
  0x88   :  { %7757 = vmatprep.mubr.msk.f32.mxu1 %vm428_vm0, %v209_v17  ;;  %v148_v17 = vld [vmem:[%s12711_s0 + $0x398] sm:$0xff] }
  0x8a   :  { %7582 = vmatmul.mubr.msk.f32.gmra.mxu0 %vm428_vm0, %v98_v18  ;;  %v130_v18 = vld [vmem:[%s12711_s0 + $0x308] sm:$0xff] }
  0x8b   :  { %7584 = vmatprep.mubr.msk.f32.mxu0 %vm428_vm0, %v99_v20  ;;  %v131_v20 = vld [vmem:[%s12711_s0 + $0x310] sm:$0xff]  ;;  %7758 = vmatmul.mubr.msk.f32.gmra.mxu1 %vm428_vm0, %v210_v19 }
  0x8e   :  { %7585 = vmatmul.mubr.msk.f32.gmra.mxu0 %vm428_vm0, %v100_v22  ;;  %v211_v22 = vld [vmem:[%s12712_s1 + $0x190] sm:$0xff] }
  0x8f   :  { %7587 = vmatprep.mubr.msk.f32.mxu0 %vm428_vm0, %v101_v24  ;;  %7760 = vmatprep.mubr.msk.f32.mxu1 %vm428_vm0, %v211_v22  ;;  %v212_v24 = vld [vmem:[%s12712_s1 + $0x198] sm:$0xff]  ;;  %v9884_v22 = vld [vmem:[%s12715_s4] ss:$0 sm:$0xff] }
  0x90   :  { %7761 = vmatmul.mubr.msk.f32.gmra.mxu1 %vm428_vm0, %v212_v24  ;;  %v149_v24 = vld [vmem:[%s12711_s0 + $0x3a0] sm:$0xff] }
  0x92   :  { %7588 = vmatmul.mubr.msk.f32.gmra.mxu0 %vm428_vm0, %v102_v26  ;;  %v133_v26 = vld [vmem:[%s12711_s0 + $0x320] sm:$0xff] }
  0x93   :  { %7590 = vmatprep.mubr.msk.f32.mxu0 %vm428_vm0, %v103_v28  ;;  %v213_v28 = vld [vmem:[%s12712_s1 + $0x1a0] sm:$0xff] }
  0x94   :  { %7763 = vmatprep.mubr.msk.f32.mxu1 %vm428_vm0, %v213_v28 }
  0x96   :  { %7591 = vmatmul.mubr.msk.f32.gmra.mxu0 %vm428_vm0, %v104_v30  ;;  %v214_v30 = vld [vmem:[%s12712_s1 + $0x1a8] sm:$0xff] }
  0x97   :  { %7593 = vmatprep.mubr.msk.f32.mxu0 %vm428_vm0, %v105_v32  ;;  %v135_v32 = vld [vmem:[%s12711_s0 + $0x330] sm:$0xff]  ;;  %7764 = vmatmul.mubr.msk.f32.gmra.mxu1 %vm428_vm0, %v214_v30 }
  0x9a   :  { %7594 = vmatmul.mubr.msk.f32.gmra.mxu0 %vm428_vm0, %v106_v34  ;;  %v215_v34 = vld [vmem:[%s12712_s1 + $0x1b0] sm:$0xff] }
  0x9b   :  { %7596 = vmatprep.mubr.msk.f32.mxu0 %vm428_vm0, %v107_v36  ;;  %7766 = vmatprep.mubr.msk.f32.mxu1 %vm428_vm0, %v215_v34  ;;  %v216_v36 = vld [vmem:[%s12712_s1 + $0x1b8] sm:$0xff] }
  0x9c   :  { %7767 = vmatmul.mubr.msk.f32.gmra.mxu1 %vm428_vm0, %v216_v36 }
  0x9e   :  { %7597 = vmatmul.mubr.msk.f32.gmra.mxu0 %vm428_vm0, %v108_v38  ;;  %v137_v38 = vld [vmem:[%s12711_s0 + $0x340] sm:$0xff] }
  0x9f   :  { %7599 = vmatprep.mubr.msk.f32.mxu0 %vm428_vm0, %v109_v40  ;;  %v217_v40 = vld [vmem:[%s12712_s1 + $0x1c0] sm:$0xff] }
  0xa0   :  { %7769 = vmatprep.mubr.msk.f32.mxu1 %vm428_vm0, %v217_v40  ;;  %v151_v40 = vld [vmem:[%s12711_s0 + $0x3b0] sm:$0xff] }
  0xa2   :  { %7600 = vmatmul.mubr.msk.f32.gmra.mxu0 %vm428_vm0, %v110_v42  ;;  %v218_v42 = vld [vmem:[%s12712_s1 + $0x1c8] sm:$0xff] }
  0xa3   :  { %7602 = vmatprep.mubr.msk.f32.mxu0 %vm428_vm0, %v111_v44  ;;  %v139_v44 = vld [vmem:[%s12711_s0 + $0x350] sm:$0xff]  ;;  %7770 = vmatmul.mubr.msk.f32.gmra.mxu1 %vm428_vm0, %v218_v42 }
  0xa6   :  { %7603 = vmatmul.mubr.msk.f32.gmra.mxu0 %vm428_vm0, %v112_v46  ;;  %v219_v46 = vld [vmem:[%s12712_s1 + $0x1d0] sm:$0xff] }
  0xa7   :  { %7605 = vmatprep.mubr.msk.f32.mxu0 %vm428_vm0, %v113_v48  ;;  %7772 = vmatprep.mubr.msk.f32.mxu1 %vm428_vm0, %v219_v46  ;;  %v220_v48 = vld [vmem:[%s12712_s1 + $0x1d8] sm:$0xff] }
  0xa8   :  { %7773 = vmatmul.mubr.msk.f32.gmra.mxu1 %vm428_vm0, %v220_v48  ;;  %v152_v48 = vld [vmem:[%s12711_s0 + $0x3b8] sm:$0xff] }
  0xaa   :  { %7606 = vmatmul.mubr.msk.f32.gmra.mxu0 %vm428_vm0, %v114_v50  ;;  %v141_v50 = vld [vmem:[%s12711_s0 + $0x360] sm:$0xff] }
  0xab   :  { %7608 = vmatprep.mubr.msk.f32.mxu0 %vm428_vm0, %v115_v52 }
  0xae   :  { %7609 = vmatmul.mubr.msk.f32.gmra.mxu0 %vm428_vm0, %v116_v54  ;;  %v221_v54 = vld [vmem:[%s12712_s1 + $0x1e0] sm:$0xff] }
  0xaf   :  { %7611 = vmatprep.mubr.msk.f32.mxu0 %vm428_vm0, %v117_v56  ;;  %7775 = vmatprep.mubr.msk.f32.mxu1 %vm428_vm0, %v221_v54  ;;  %v222_v56 = vld [vmem:[%s12712_s1 + $0x1e8] sm:$0xff]  ;;  %v153_v54 = vld [vmem:[%s12711_s0 + $0x3c0] sm:$0xff] }
  0xb0   :  { %7776 = vmatmul.mubr.msk.f32.gmra.mxu1 %vm428_vm0, %v222_v56 }
  0xb2   :  { %7612 = vmatmul.mubr.msk.f32.gmra.mxu0 %vm428_vm0, %v118_v58  ;;  %v143_v58 = vld [vmem:[%s12711_s0 + $0x370] sm:$0xff] }
  0xb3   :  { %7614 = vmatprep.mubr.msk.f32.mxu0 %vm428_vm0, %v119_v60 }
  0xb6   :  { %7615 = vmatmul.mubr.msk.f32.gmra.mxu0 %vm428_vm0, %v120_v62  ;;  %v223_v62 = vld [vmem:[%s12712_s1 + $0x1f0] sm:$0xff] }
  0xb7   :  { %7617 = vmatprep.mubr.msk.f32.mxu0 %vm428_vm0, %v121_v0  ;;  %7778 = vmatprep.mubr.msk.f32.mxu1 %vm428_vm0, %v223_v62  ;;  %v224_v0 = vld [vmem:[%s12712_s1 + $0x1f8] sm:$0xff]  ;;  %v230_v62 = vld [vmem:[%s12712_s1 + $0x228] sm:$0xff] }
  0xb8   :  { %7779 = vmatmul.mubr.msk.f32.gmra.mxu1 %vm428_vm0, %v224_v0  ;;  %v231_v0 = vld [vmem:[%s12712_s1 + $0x230] sm:$0xff] }
  0xb9   :  { %7781 = vmatprep.mubr.msk.f32.mxu1 %vm428_vm0, %v225_v7  ;;  %v157_v7 = vld [vmem:[%s12711_s0 + $0x3e0] sm:$0xff] }
  0xba   :  { %7618 = vmatmul.mubr.msk.f32.gmra.mxu0 %vm428_vm0, %v122_v2  ;;  %v145_v2 = vld [vmem:[%s12711_s0 + $0x380] sm:$0xff] }
  0xbb   :  { %7620 = vmatprep.mubr.msk.f32.mxu0 %vm428_vm0, %v123_v4 }
  0xbc   :  { %7782 = vmatmul.mubr.msk.f32.gmra.mxu1 %vm428_vm0, %v226_v9 }
  0xbe   :  { %7621 = vmatmul.mubr.msk.f32.gmra.mxu0 %vm428_vm0, %v124_v6 }
  0xbf   :  { %7623 = vmatprep.mubr.msk.f32.mxu0 %vm428_vm0, %v125_v8  ;;  %v146_v8 = vld [vmem:[%s12711_s0 + $0x388] sm:$0xff] }
  0xc2   :  { %7624 = vmatmul.mubr.msk.f32.gmra.mxu0 %vm428_vm0, %v126_v10 }
  0xc3   :  { %7626 = vmatprep.mubr.msk.f32.mxu0 %vm428_vm0, %v127_v12 }
  0xc6   :  { %7627 = vmatmul.mubr.msk.f32.gmra.mxu0 %vm428_vm0, %v128_v14 }
  0xc7   :  { %7629 = vmatprep.mubr.msk.f32.mxu0 %vm428_vm0, %v129_v16  ;;  %v227_v16 = vld [vmem:[%s12712_s1 + $0x210] sm:$0xff] }
  0xc8   :  { %7784 = vmatprep.mubr.msk.f32.mxu1 %vm428_vm0, %v227_v16  ;;  %v159_v16 = vld [vmem:[%s12711_s0 + $0x3f0] sm:$0xff] }
  0xca   :  { %v9698_v21 = vpop.f32.mrf.mxu0  ;;  %7630 = vmatmul.mubr.msk.f32.gmra.mxu0 %vm428_vm0, %v130_v18 }
  0xcb   :  { %7632 = vmatprep.mubr.msk.f32.mxu0 %vm428_vm0, %v131_v20  ;;  %v228_v20 = vld [vmem:[%s12712_s1 + $0x218] sm:$0xff] }
  0xcc   :  { %v9712_v25 = vpop.f32.mrf.mxu0  ;;  %7785 = vmatmul.mubr.msk.f32.gmra.mxu1 %vm428_vm0, %v228_v20 }
  0xce   :  { %v9718_v27 = vpop.f32.mrf.mxu0  ;;  %7633 = vmatmul.mubr.msk.f32.gmra.mxu0 %vm428_vm0, %v132_v23 }
  0xcf   :  { %7635 = vmatprep.mubr.msk.f32.mxu0 %vm428_vm0, %v133_v26  ;;  %v880_v26 = vadd.f32 %v9884_v22, %v9712_v25 }
  0xd0   :  { %v9732_v31 = vpop.f32.mrf.mxu0  ;;  %v9797_v51 = vpop.f32.mrf.mxu1 }
  0xd2   :  { %v9738_v33 = vpop.f32.mrf.mxu0  ;;  %7636 = vmatmul.mubr.msk.f32.gmra.mxu0 %vm428_vm0, %v134_v29  ;;  %v9803_v53 = vpop.f32.mrf.mxu1 }
  0xd3   :  { %7638 = vmatprep.mubr.msk.f32.mxu0 %vm428_vm0, %v135_v32  ;;  %v229_v32 = vld [vmem:[%s12712_s1 + $0x220] sm:$0xff]  ;;  %v2020_v56 = vadd.f32 %v9848_v5, %v9803_v53  ;;  %v155_v53 = vld [vmem:[%s12711_s0 + $0x3d0] sm:$0xff] }
  0xd4   :  { %v9752_v37 = vpop.f32.mrf.mxu0  ;;  %v7702_v59 = vpop.f32.mrf.mxu1  ;;  %7787 = vmatprep.mubr.msk.f32.mxu1 %vm428_vm0, %v229_v32  ;;  %v237_v32 = vld [vmem:[%s12712_s1 + $0x260] sm:$0xff] }
  0xd5   :  { %v2035_v36 = vadd.f32 %v7702_v59, %v9848_v5  ;;  %7788 = vmatmul.mubr.msk.f32.gmra.mxu1 %vm428_vm0, %v230_v62  ;;  %v900_v9 = vadd.f32 %v9884_v22, %v9752_v37  ;;  %v243_v62 = vld [vmem:[%s12712_s1 + $0x290] sm:$0xff] }
  0xd6   :  { %v9758_v39 = vpop.f32.mrf.mxu0  ;;  %7639 = vmatmul.mubr.msk.f32.gmra.mxu0 %vm428_vm0, %v136_v35  ;;  %v2029_v61 = vpop.f32.mrf.mxu1  ;;  %v150_v35 = vld [vmem:[%s12711_s0 + $0x3a8] sm:$0xff]  ;;  %7790 = vmatprep.mubr.msk.f32.mxu1 %vm428_vm0, %v231_v0 }
  0xd7   :  { %7641 = vmatprep.mubr.msk.f32.mxu0 %vm428_vm0, %v137_v38  ;;  %v2030_v42 = vadd.f32 %v9848_v5, %v2029_v61  ;;  %v154_v61 = vld [vmem:[%s12711_s0 + $0x3c8] sm:$0xff] }
  0xd8   :  { %v9772_v43 = vpop.f32.mrf.mxu0 }
  0xda   :  { %v9778_v45 = vpop.f32.mrf.mxu0  ;;  %7642 = vmatmul.mubr.msk.f32.gmra.mxu0 %vm428_vm0, %v138_v41  ;;  %v885_v41 = vadd.f32 %v9698_v21, %v9884_v22  ;;  %v2025_v21 = vadd.f32 %v9797_v51, %v9848_v5 }
  0xdb   :  { %7644 = vmatprep.mubr.msk.f32.mxu0 %vm428_vm0, %v139_v44 }
  0xdc   :  { %v9792_v49 = vpop.f32.mrf.mxu0 }
  0xde   :  { %v9800_v52 = vpop.f32.mrf.mxu0  ;;  %7645 = vmatmul.mubr.msk.f32.gmra.mxu0 %vm428_vm0, %v140_v47 }
  0xdf   :  { %7647 = vmatprep.mubr.msk.f32.mxu0 %vm428_vm0, %v141_v50 }
  0xe0   :  { %v9816_v57 = vpop.f32.mrf.mxu0 }
  0xe1   :  { %v7705_v3 = vpop.f32.mrf.mxu1 }
  0xe2   :  { %v9822_v60 = vpop.f32.mrf.mxu0  ;;  %7648 = vmatmul.mubr.msk.f32.gmra.mxu0 %vm428_vm0, %v142_v55  ;;  %v2045_v18 = vadd.f32 %v7705_v3, %v9848_v5  ;;  %v890_v55 = vadd.f32 %v9884_v22, %v9732_v31 }
  0xe3   :  { %7650 = vmatprep.mubr.msk.f32.mxu0 %vm428_vm0, %v143_v58  ;;  %v2039_v6 = vpop.f32.mrf.mxu1 }
  0xe4   :  { %v9836_v1 = vpop.f32.mrf.mxu0  ;;  %v2040_v29 = vadd.f32 %v9848_v5, %v2039_v6 }
  0xe5   :  { %v7708_v12 = vpop.f32.mrf.mxu1 }
  0xe6   :  { %v9842_v4 = vpop.f32.mrf.mxu0  ;;  %7651 = vmatmul.mubr.msk.f32.gmra.mxu0 %vm428_vm0, %v144_v63  ;;  %v2055_v13 = vadd.f32 %v7708_v12, %v9848_v5  ;;  %v895_v63 = vadd.f32 %v9718_v27, %v9884_v22  ;;  %v156_v27 = vld [vmem:[%s12711_s0 + $0x3d8] sm:$0xff] }
  0xe7   :  { %7653 = vmatprep.mubr.msk.f32.mxu0 %vm428_vm0, %v145_v2  ;;  %v2049_v15 = vpop.f32.mrf.mxu1 }
  0xe8   :  { %v9861_v10 = vpop.f32.mrf.mxu0  ;;  %v2050_v19 = vadd.f32 %v9848_v5, %v2049_v15  ;;  %8077 = vmatprep.subr.mxu1 %v2055_v13  ;;  %v158_v15 = vld [vmem:[%s12711_s0 + $0x3e8] sm:$0xff] }
  0xe9   :  { %8078 = vmatpush3.msra.mxu1 %v2055_v13 }
  0xea   :  { %v7511_v14 = vpop.f32.mrf.mxu0  ;;  %7654 = vmatmul.mubr.msk.f32.gmra.mxu0 %vm428_vm0, %v146_v8  ;;  %8079 = vmatprep.subr.mxu1 %v2050_v19  ;;  %v232_v8 = vld [vmem:[%s12712_s1 + $0x238] sm:$0xff] }
  0xeb   :  { %7656 = vmatprep.mubr.msk.f32.mxu0 %vm428_vm0, %v147_v11  ;;  %8080 = vmatpush3.msra.mxu1 %v2050_v19  ;;  %v965_v34 = vadd.f32 %v7511_v14, %v9884_v22  ;;  %v233_v11 = vld [vmem:[%s12712_s1 + $0x240] sm:$0xff]  ;;  %v235_v19 = vld [vmem:[%s12712_s1 + $0x250] sm:$0xff] }
  0xec   :  { %v959_v23 = vpop.f32.mrf.mxu0  ;;  %8081 = vmatprep.subr.mxu1 %v2045_v18  ;;  %7791 = vmatmul.mubr.msk.f32.gmra.mxu1 %vm428_vm0, %v232_v8 }
  0xed   :  { %v960_v28 = vadd.f32 %v9884_v22, %v959_v23  ;;  %8082 = vmatpush3.msra.mxu1 %v2045_v18  ;;  %v8698_v47 = vpack.i.bf16 %v965_v34, %v885_v41  ;;  %7793 = vmatprep.mubr.msk.f32.mxu1 %vm428_vm0, %v233_v11  ;;  %v905_v18 = vadd.f32 %v9738_v33, %v9884_v22 }
  0xee   :  { %v7514_v30 = vpop.f32.mrf.mxu0  ;;  %7657 = vmatmul.mubr.msk.f32.gmra.mxu0 %vm428_vm0, %v148_v17  ;;  %8083 = vmatprep.subr.mxu1 %v2040_v29  ;;  %v234_v17 = vld [vmem:[%s12712_s1 + $0x248] sm:$0xff]  ;;  %v915_v41 = vadd.f32 %v9758_v39, %v9884_v22 }
  0xef   :  { %7659 = vmatprep.mubr.msk.f32.mxu0 %vm428_vm0, %v149_v24  ;;  %v8696_v25 = vpack.i.bf16 %v960_v28, %v880_v26  ;;  %8084 = vmatpush3.msra.mxu1 %v2040_v29  ;;  %v975_v51 = vadd.f32 %v7514_v30, %v9884_v22  ;;  %v160_v26 = vld [vmem:[%s12711_s0 + $0x3f8] sm:$0xff]  ;;  %v161_v28 = vld [vmem:[%s12712_s1] sm:$0xff]  ;;  %v910_v30 = vadd.f32 %v9884_v22, %v9772_v43 }
  0xf0   :  { %v969_v38 = vpop.f32.mrf.mxu0  ;;  %8085 = vmatprep.subr.mxu1 %v2035_v36  ;;  %7794 = vmatmul.mubr.msk.f32.gmra.mxu1 %vm428_vm0, %v234_v17  ;;  %v236_v29 = vld [vmem:[%s12712_s1 + $0x258] sm:$0xff]  ;;  %v940_v17 = vadd.f32 %v9884_v22, %v9836_v1  ;;  %v250_v1 = vld [vmem:[%s12712_s1 + $0x2c8] sm:$0xff] }
  0xf1   :  { %8697 = vxpose.xlu0.b32.start [1/16] (narrow) %v8696_v25, 32  ;;  %v970_v46 = vadd.f32 %v9884_v22, %v969_v38  ;;  %8086 = vmatpush3.msra.mxu1 %v2035_v36  ;;  %v8702_v5 = vpack.i.bf16 %v975_v51, %v895_v63  ;;  %v162_v36 = vld [vmem:[%s12712_s1 + $0x8] sm:$0xff]  ;;  %v163_v38 = vld [vmem:[%s12712_s1 + $0x10] sm:$0xff] }
  0xf2   :  { %v7517_v44 = vpop.f32.mrf.mxu0  ;;  %7660 = vmatmul.mubr.msk.f32.gmra.mxu0 %vm428_vm0, %v150_v35  ;;  %8087 = vmatprep.subr.mxu1 %v2030_v42 }
  0xf3   :  { %7662 = vmatprep.mubr.msk.f32.mxu0 %vm428_vm0, %v151_v40  ;;  %8088 = vmatpush3.msra.mxu1 %v2030_v42  ;;  %v8700_v59 = vpack.i.bf16 %v970_v46, %v890_v55  ;;  %v985_v13 = vadd.f32 %v7517_v44, %v9884_v22  ;;  %v238_v40 = vld [vmem:[%s12712_s1 + $0x268] sm:$0xff]  ;;  %v239_v42 = vld [vmem:[%s12712_s1 + $0x270] sm:$0xff]  ;;  %v241_v55 = vld [vmem:[%s12712_s1 + $0x280] sm:$0xff] }
  0xf4   :  { %v979_v50 = vpop.f32.mrf.mxu0  ;;  %8089 = vmatprep.subr.mxu1 %v2025_v21  ;;  %7796 = vmatprep.mubr.msk.f32.mxu1 %vm428_vm0, %v235_v19 }
  0xf5   :  { %8699 = vxpose.xlu0.b32.cont [2/16] (narrow) %v8698_v47, 32  ;;  %8090 = vmatpush3.msra.mxu1 %v2025_v21  ;;  %v980_v3 = vadd.f32 %v9884_v22, %v979_v50  ;;  %v8706_v24 = vpack.i.bf16 %v985_v13, %v905_v18  ;;  %v165_v21 = vld [vmem:[%s12712_s1 + $0x20] sm:$0xff]  ;;  %v240_v50 = vld [vmem:[%s12712_s1 + $0x278] sm:$0xff]  ;;  %v935_v13 = vadd.f32 %v9800_v52, %v9884_v22 }
  0xf6   :  { %v7520_v58 = vpop.f32.mrf.mxu0  ;;  %7663 = vmatmul.mubr.msk.f32.gmra.mxu0 %vm428_vm0, %v152_v48  ;;  %8091 = vmatprep.subr.mxu1 %v2020_v56  ;;  %v164_v48 = vld [vmem:[%s12712_s1 + $0x18] sm:$0xff]  ;;  %v249_v18 = vld [vmem:[%s12712_s1 + $0x2c0] sm:$0xff] }
  0xf7   :  { %7665 = vmatprep.mubr.msk.f32.mxu0 %vm428_vm0, %v153_v54  ;;  %8092 = vmatpush3.msra.mxu1 %v2020_v56  ;;  %v8704_v14 = vpack.i.bf16 %v980_v3, %v900_v9  ;;  %v995_v25 = vadd.f32 %v7520_v58, %v9884_v22  ;;  %v920_v54 = vadd.f32 %v9884_v22, %v9792_v49  ;;  %v168_v3 = vld [vmem:[%s12712_s1 + $0x38] sm:$0xff] }
  0xf8   :  { %v989_v31 = vpop.f32.mrf.mxu0  ;;  %7797 = vmatmul.mubr.msk.f32.gmra.mxu1 %vm428_vm0, %v236_v29  ;;  %v248_v52 = vld [vmem:[%s12712_s1 + $0x2b8] sm:$0xff] }
  0xf9   :  { %8701 = vxpose.xlu0.b32.cont [3/16] (narrow) %v8700_v59, 32  ;;  %v990_v23 = vadd.f32 %v9884_v22, %v989_v31  ;;  %7799 = vmatprep.mubr.msk.f32.mxu1 %vm428_vm0, %v237_v32  ;;  %v8710_v47 = vpack.i.bf16 %v995_v25, %v915_v41  ;;  %v166_v59 = vld [vmem:[%s12712_s1 + $0x28] sm:$0xff]  ;;  %v950_v25 = vadd.f32 %v9884_v22, %v9861_v10 }
  0xfa   :  { %v9944_v2 = vpop.f32.mrf.mxu0  ;;  %7666 = vmatmul.mubr.msk.f32.gmra.mxu0 %vm428_vm0, %v154_v61  ;;  %v167_v61 = vld [vmem:[%s12712_s1 + $0x30] sm:$0xff]  ;;  %v242_v31 = vld [vmem:[%s12712_s1 + $0x288] sm:$0xff]  ;;  %v955_v41 = vadd.f32 %v9842_v4, %v9884_v22 }
  0xfb   :  { %7668 = vmatprep.mubr.msk.f32.mxu0 %vm428_vm0, %v155_v53  ;;  %v8708_v35 = vpack.i.bf16 %v990_v23, %v910_v30  ;;  %v1005_v58 = vadd.f32 %v9944_v2, %v9884_v22  ;;  %v925_v53 = vadd.f32 %v9778_v45, %v9884_v22  ;;  %v254_v10 = vld [vmem:[%s12712_s1 + $0x2e8] sm:$0xff] }
  0xfc   :  { %v999_v6 = vpop.f32.mrf.mxu0  ;;  %7800 = vmatmul.mubr.msk.f32.gmra.mxu1 %vm428_vm0, %v238_v40 }
  0xfd   :  { %8703 = vxpose.xlu0.b32.cont [4/16] (narrow) %v8702_v5, 32  ;;  %v1000_v46 = vadd.f32 %v9884_v22, %v999_v6  ;;  %7802 = vmatprep.mubr.msk.f32.mxu1 %vm428_vm0, %v239_v42  ;;  %v8714_v2 = vpack.i.bf16 %v1005_v58, %v925_v53  ;;  %v244_v5 = vld [vmem:[%s12712_s1 + $0x298] sm:$0xff]  ;;  %v245_v6 = vld [vmem:[%s12712_s1 + $0x2a0] sm:$0xff]  ;;  %v255_v42 = vld [vmem:[%s12712_s1 + $0x2f0] sm:$0xff] }
  0xfe   :  { %v9965_v12 = vpop.f32.mrf.mxu0  ;;  %7669 = vmatmul.mubr.msk.f32.gmra.mxu0 %vm428_vm0, %v156_v27  ;;  %v930_v27 = vadd.f32 %v9884_v22, %v9816_v57  ;;  %v246_v57 = vld [vmem:[%s12712_s1 + $0x2a8] sm:$0xff] }
  0xff   :  { %7671 = vmatprep.mubr.msk.f32.mxu0 %vm428_vm0, %v157_v7  ;;  %v8712_v51 = vpack.i.bf16 %v1000_v46, %v920_v54  ;;  %v1015_v8 = vadd.f32 %v9965_v12, %v9884_v22 }
 0x100   :  { %v9974_v37 = vpop.f32.mrf.mxu0  ;;  %7803 = vmatmul.mubr.msk.f32.gmra.mxu1 %vm428_vm0, %v240_v50  ;;  %v257_v50 = vld [vmem:[%s12712_s1 + $0x300] sm:$0xff] }
 0x101   :  { %8705 = vxpose.xlu0.b32.cont [5/16] (narrow) %v8704_v14, 32  ;;  %7805 = vmatprep.mubr.msk.f32.mxu1 %vm428_vm0, %v241_v55  ;;  %v1010_v0 = vadd.f32 %v9884_v22, %v9974_v37  ;;  %v247_v14 = vld [vmem:[%s12712_s1 + $0x2b0] sm:$0xff]  ;;  %v8718_v37 = vpack.i.bf16 %v1015_v8, %v935_v13 }
 0x102   :  { %v9988_v20 = vpop.f32.mrf.mxu0  ;;  %7672 = vmatmul.mubr.msk.f32.gmra.mxu0 %vm428_vm0, %v158_v15 }
 0x103   :  { %7674 = vmatprep.mubr.msk.f32.mxu0 %vm428_vm0, %v159_v16  ;;  %v8716_v9 = vpack.i.bf16 %v1010_v0, %v930_v27  ;;  %v1025_v23 = vadd.f32 %v9988_v20, %v9884_v22 }
 0x104   :  { %v9997_v33 = vpop.f32.mrf.mxu0  ;;  %7806 = vmatmul.mubr.msk.f32.gmra.mxu1 %vm428_vm0, %v242_v31 }
 0x105   :  { %8707 = vxpose.xlu0.b32.cont [6/16] (narrow) %v8706_v24, 32  ;;  %7808 = vmatprep.mubr.msk.f32.mxu1 %vm428_vm0, %v243_v62  ;;  %v1020_v15 = vadd.f32 %v9884_v22, %v9997_v33  ;;  %v945_v33 = vadd.f32 %v9822_v60, %v9884_v22  ;;  %v252_v60 = vld [vmem:[%s12712_s1 + $0x2d8] sm:$0xff] }
 0x106   :  { %v10011_v34 = vpop.f32.mrf.mxu0  ;;  %7675 = vmatmul.mubr.msk.f32.gmra.mxu0 %vm428_vm0, %v160_v26 }
 0x107   :  { %7685 = vmatprep.mubr.msk.f32.mxu0 %vm428_vm0, %v161_v28  ;;  %v8720_v24 = vpack.i.bf16 %v1020_v15, %v940_v17  ;;  %v251_v28 = vld [vmem:[%s12712_s1 + $0x2d0] sm:$0xff]  ;;  %v8722_v30 = vpack.i.bf16 %v1025_v23, %v945_v33  ;;  %v265_v17 = vld [vmem:[%s12712_s1 + $0x340] sm:$0xff]  ;;  %v266_v33 = vld [vmem:[%s12712_s1 + $0x348] sm:$0xff] }
 0x108   :  { %v10020_v43 = vpop.f32.mrf.mxu0  ;;  %7809 = vmatmul.mubr.msk.f32.gmra.mxu1 %vm428_vm0, %v244_v5 }
 0x109   :  { %8709 = vxpose.xlu0.b32.cont [7/16] (narrow) %v8708_v35, 32  ;;  %7811 = vmatprep.mubr.msk.f32.mxu1 %vm428_vm0, %v245_v6  ;;  %v1030_v29 = vadd.f32 %v9884_v22, %v10020_v43  ;;  %v253_v35 = vld [vmem:[%s12712_s1 + $0x2e0] sm:$0xff]  ;;  %v1035_v43 = vadd.f32 %v10011_v34, %v9884_v22 }
 0x10a   :  { %v10034_v44 = vpop.f32.mrf.mxu0  ;;  %7686 = vmatmul.mubr.msk.f32.vlgmr.msra.gmra.mxu0 %vm428_vm0, %v162_v36 }
 0x10b   :  { %7688 = vmatprep.mubr.msk.f32.mxu0 %vm428_vm0, %v163_v38  ;;  %v8724_v38 = vpack.i.bf16 %v1030_v29, %v950_v25  ;;  %v8726_v46 = vpack.i.bf16 %v1035_v43, %v955_v41  ;;  %v269_v43 = vld [vmem:[%s12712_s1 + $0x360] sm:$0xff] }
 0x10c   :  { %v10043_v39 = vpop.f32.mrf.mxu0  ;;  %7812 = vmatmul.mubr.msk.f32.gmra.mxu1 %vm428_vm0, %v246_v57  ;;  %v263_v57 = vld [vmem:[%s12712_s1 + $0x330] sm:$0xff] }
 0x10d   :  { %8711 = vxpose.xlu0.b32.cont [8/16] (narrow) %v8710_v47, 32  ;;  %7814 = vmatprep.mubr.msk.f32.mxu1 %vm428_vm0, %v247_v14 }
 0x10e   :  { %v10057_v56 = vpop.f32.mrf.mxu0  ;;  %7689 = vmatmul.mubr.msk.f32.gmra.mxu0 %vm428_vm0, %v164_v48  ;;  %v256_v48 = vld [vmem:[%s12712_s1 + $0x2f8] sm:$0xff] }
 0x10f   :  { %7691 = vmatprep.mubr.msk.f32.mxu0 %vm428_vm0, %v165_v21  ;;  %v1040_v21 = vadd.f32 %v9884_v22, %v10043_v39  ;;  %v258_v39 = vld [vmem:[%s12712_s1 + $0x308] sm:$0xff] }
 0x110   :  { %v10067_v49 = vpop.f32.mrf.mxu0  ;;  %7815 = vmatmul.mubr.msk.f32.gmra.mxu1 %vm428_vm0, %v248_v52  ;;  %v264_v52 = vld [vmem:[%s12712_s1 + $0x338] sm:$0xff] }
 0x111   :  { %8713 = vxpose.xlu0.b32.cont [9/16] (narrow) %v8712_v51, 32  ;;  %7817 = vmatprep.mubr.msk.f32.mxu1 %vm428_vm0, %v249_v18 }
 0x112   :  { %v10081_v63 = vpop.f32.mrf.mxu0  ;;  %7692 = vmatmul.mubr.msk.f32.gmra.mxu0 %vm428_vm0, %v166_v59  ;;  %v1045_v59 = vadd.f32 %v10034_v44, %v9884_v22  ;;  %v1050_v44 = vadd.f32 %v9884_v22, %v10067_v49  ;;  %v1055_v49 = vadd.f32 %v10057_v56, %v9884_v22 }
 0x113   :  { %7694 = vmatprep.mubr.msk.f32.mxu0 %vm428_vm0, %v167_v61  ;;  %v259_v61 = vld [vmem:[%s12712_s1 + $0x310] sm:$0xff] }
 0x114   :  { %v10091_v45 = vpop.f32.mrf.mxu0  ;;  %7818 = vmatmul.mubr.msk.f32.gmra.mxu1 %vm428_vm0, %v250_v1 }
 0x115   :  { %8715 = vxpose.xlu0.b32.cont [10/16] (narrow) %v8714_v2, 32  ;;  %7820 = vmatprep.mubr.msk.f32.mxu1 %vm428_vm0, %v251_v28  ;;  %v260_v2 = vld [vmem:[%s12712_s1 + $0x318] sm:$0xff]  ;;  %v1060_v56 = vadd.f32 %v9884_v22, %v10091_v45  ;;  %v1065_v45 = vadd.f32 %v10081_v63, %v9884_v22  ;;  %v267_v28 = vld [vmem:[%s12712_s1 + $0x350] sm:$0xff] }
 0x116   :  { %v10102_v7 = vpop.f32.mrf.mxu0  ;;  %7695 = vmatmul.mubr.msk.f32.gmra.mxu0 %vm428_vm0, %v168_v3  ;;  %v261_v3 = vld [vmem:[%s12712_s1 + $0x320] sm:$0xff]  ;;  %v268_v63 = vld [vmem:[%s12712_s1 + $0x358] sm:$0xff] }
 0x118   :  { %v10108_v11 = vpop.f32.mrf.mxu0  ;;  %7821 = vmatmul.mubr.msk.f32.gmra.mxu1 %vm428_vm0, %v252_v60 }
 0x119   :  { %8717 = vxpose.xlu0.b32.cont [11/16] (narrow) %v8716_v9, 32  ;;  %7823 = vmatprep.mubr.msk.f32.mxu1 %vm428_vm0, %v253_v35  ;;  %v262_v9 = vld [vmem:[%s12712_s1 + $0x328] sm:$0xff]  ;;  %v1070_v35 = vadd.f32 %v9884_v22, %v10108_v11 }
 0x11a   :  { %v10119_v12 = vpop.f32.mrf.mxu0  ;;  %v270_v11 = vld [vmem:[%s12712_s1 + $0x368] sm:$0xff] }
 0x11c   :  { %v10124_v16 = vpop.f32.mrf.mxu0  ;;  %7824 = vmatmul.mubr.msk.f32.gmra.mxu1 %vm428_vm0, %v254_v10 }
 0x11d   :  { %8719 = vxpose.xlu0.b32.cont [12/16] (narrow) %v8718_v37, 32  ;;  %7826 = vmatprep.mubr.msk.f32.mxu1 %vm428_vm0, %v255_v42 }
 0x11e   :  { %v10135_v19 = vpop.f32.mrf.mxu0 }
 0x120   :  { %v10140_v26 = vpop.f32.mrf.mxu0  ;;  %7827 = vmatmul.mubr.msk.f32.gmra.mxu1 %vm428_vm0, %v256_v48 }
 0x121   :  { %8721 = vxpose.xlu0.b32.cont [13/16] (narrow) %v8720_v24, 32  ;;  %7829 = vmatprep.mubr.msk.f32.mxu1 %vm428_vm0, %v257_v50 }
 0x122   :  { %v10151_v20 = vpop.f32.mrf.mxu0 }
 0x124   :  { %v10156_v32 = vpop.f32.mrf.mxu0  ;;  %7830 = vmatmul.mubr.msk.f32.gmra.mxu1 %vm428_vm0, %v258_v39 }
 0x125   :  { %8723 = vxpose.xlu0.b32.cont [14/16] (narrow) %v8722_v30, 32  ;;  %7832 = vmatprep.mubr.msk.f32.mxu1 %vm428_vm0, %v259_v61 }
 0x126   :  { %v10167_v36 = vpop.f32.mrf.mxu0 }
 0x128   :  { %v10172_v40 = vpop.f32.mrf.mxu0  ;;  %7833 = vmatmul.mubr.msk.f32.gmra.mxu1 %vm428_vm0, %v260_v2  ;;  %v275_v2 = vld [vmem:[%s12712_s1 + $0x390] sm:$0xff] }
 0x129   :  { %8725 = vxpose.xlu0.b32.cont [15/16] (narrow) %v8724_v38, 32  ;;  %7835 = vmatprep.mubr.msk.f32.mxu1 %vm428_vm0, %v261_v3 }
 0x12a   :  { %v7559_v34 = vpop.f32.mrf.mxu0 }
 0x12b   :  { %v1125_v55 = vadd.f32 %v7559_v34, %v9884_v22  ;;  %v10276_v34 = vpop.f32.mrf.mxu1 }
 0x12c   :  { %v1119_v47 = vpop.f32.mrf.mxu0  ;;  %7836 = vmatmul.mubr.msk.f32.gmra.mxu1 %vm428_vm0, %v262_v9  ;;  %v1090_v9 = vadd.f32 %v9884_v22, %v10140_v26  ;;  %v278_v26 = vld [vmem:[%s12712_s1 + $0x3a8] sm:$0xff] }
 0x12d   :  { %v1120_v4 = vadd.f32 %v9884_v22, %v1119_v47  ;;  %8727 = vxpose.xlu0.b32.end [16/16] (narrow) %v8726_v46, 32  ;;  %v8750_v62 = vpack.i.bf16 %v1125_v55, %v1045_v59  ;;  %7838 = vmatprep.mubr.msk.f32.mxu1 %vm428_vm0, %v263_v57  ;;  %v1075_v46 = vadd.f32 %v10102_v7, %v9884_v22  ;;  %v271_v47 = vld [vmem:[%s12712_s1 + $0x370] sm:$0xff]  ;;  %v272_v7 = vld [vmem:[%s12712_s1 + $0x378] sm:$0xff] }
 0x12e   :  { %v7562_v54 = vpop.f32.mrf.mxu0 }
 0x12f   :  { %v8748_v58 = vpack.i.bf16 %v1120_v4, %v1040_v21  ;;  %v1135_v27 = vadd.f32 %v7562_v54, %v9884_v22  ;;  %v10285_v21 = vpop.f32.mrf.mxu1 }
 0x130   :  { %v1129_v51 = vpop.f32.mrf.mxu0  ;;  %7839 = vmatmul.mubr.msk.f32.gmra.mxu1 %vm428_vm0, %v264_v52 }
 0x131   :  { %8749 = vxpose.xlu1.b32.start [1/16] (narrow) %v8748_v58, 32  ;;  %v1130_v53 = vadd.f32 %v9884_v22, %v1129_v51  ;;  %v8754_v15 = vpack.i.bf16 %v1135_v27, %v1055_v49  ;;  %7841 = vmatprep.mubr.msk.f32.mxu1 %vm428_vm0, %v265_v17  ;;  %v10295_v55 = vpop.f32.mrf.mxu1  ;;  %v1080_v58 = vadd.f32 %v9884_v22, %v10124_v16  ;;  %v273_v51 = vld [vmem:[%s12712_s1 + $0x380] sm:$0xff]  ;;  %v274_v16 = vld [vmem:[%s12712_s1 + $0x388] sm:$0xff]  ;;  %v279_v17 = vld [vmem:[%s12712_s1 + $0x3b0] sm:$0xff] }
 0x132   :  { %v7565_v31 = vpop.f32.mrf.mxu0  ;;  %v277_v49 = vld [vmem:[%s12712_s1 + $0x3a0] sm:$0xff] }
 0x133   :  { %v8752_v6 = vpack.i.bf16 %v1130_v53, %v1050_v44  ;;  %v1145_v23 = vadd.f32 %v7565_v31, %v9884_v22  ;;  %v10304_v59 = vpop.f32.mrf.mxu1 }
 0x134   :  { %v1139_v0 = vpop.f32.mrf.mxu0  ;;  %7842 = vmatmul.mubr.msk.f32.gmra.mxu1 %vm428_vm0, %v266_v33 }
 0x135   :  { %8751 = vxpose.xlu1.b32.cont [2/16] (narrow) %v8750_v62, 32  ;;  %v1140_v14 = vadd.f32 %v9884_v22, %v1139_v0  ;;  %v8758_v60 = vpack.i.bf16 %v1145_v23, %v1065_v45  ;;  %7844 = vmatprep.mubr.msk.f32.mxu1 %vm428_vm0, %v267_v28  ;;  %v10314_v62 = vpop.f32.mrf.mxu1  ;;  %v1085_v0 = vadd.f32 %v10119_v12, %v9884_v22  ;;  %v276_v12 = vld [vmem:[%s12712_s1 + $0x398] sm:$0xff] }
 0x136   :  { %v7568_v5 = vpop.f32.mrf.mxu0  ;;  %v1100_v28 = vadd.f32 %v9884_v22, %v10156_v32  ;;  %v282_v32 = vld [vmem:[%s12712_s1 + $0x3c8] sm:$0xff] }
 0x137   :  { %v8756_v24 = vpack.i.bf16 %v1140_v14, %v1060_v56  ;;  %v1155_v10 = vadd.f32 %v7568_v5, %v9884_v22  ;;  %v10323_v3 = vpop.f32.mrf.mxu1  ;;  %v1095_v56 = vadd.f32 %v10135_v19, %v9884_v22  ;;  %v280_v19 = vld [vmem:[%s12712_s1 + $0x3b8] sm:$0xff] }
 0x138   :  { %v1149_v8 = vpop.f32.mrf.mxu0  ;;  %7845 = vmatmul.mubr.msk.f32.gmra.mxu1 %vm428_vm0, %v268_v63 }
 0x139   :  { %8753 = vxpose.xlu1.b32.cont [3/16] (narrow) %v8752_v6, 32  ;;  %v1150_v30 = vadd.f32 %v9884_v22, %v1149_v8  ;;  %7847 = vmatprep.mubr.msk.f32.mxu1 %vm428_vm0, %v269_v43  ;;  %v8762_v50 = vpack.i.bf16 %v1155_v10, %v1075_v46  ;;  %v10333_v8 = vpop.f32.mrf.mxu1 }
 0x13a   :  { %v7571_v13 = vpop.f32.mrf.mxu0 }
 0x13b   :  { %v8760_v41 = vpack.i.bf16 %v1150_v30, %v1070_v35  ;;  %v1165_v61 = vadd.f32 %v7571_v13, %v9884_v22  ;;  %v10342_v13 = vpop.f32.mrf.mxu1  ;;  %v281_v30 = vld [vmem:[%s12712_s1 + $0x3c0] sm:$0xff] }
 0x13c   :  { %v1159_v37 = vpop.f32.mrf.mxu0  ;;  %7848 = vmatmul.mubr.msk.f32.gmra.mxu1 %vm428_vm0, %v270_v11 }
 0x13d   :  { %8755 = vxpose.xlu1.b32.cont [4/16] (narrow) %v8754_v15, 32  ;;  %v1160_v4 = vadd.f32 %v9884_v22, %v1159_v37  ;;  %7850 = vmatprep.mubr.msk.f32.mxu1 %vm428_vm0, %v271_v47  ;;  %v8766_v27 = vpack.i.bf16 %v1165_v61, %v1085_v0  ;;  %v10353_v52 = vpop.f32.mrf.mxu1 }
 0x13e   :  { %v10238_v18 = vpop.f32.mrf.mxu0 }
 0x13f   :  { %v8764_v31 = vpack.i.bf16 %v1160_v4, %v1080_v58  ;;  %v1175_v14 = vadd.f32 %v10238_v18, %v9884_v22  ;;  %v10362_v23 = vpop.f32.mrf.mxu1  ;;  %v1110_v58 = vadd.f32 %v9884_v22, %v10172_v40  ;;  %v286_v40 = vld [vmem:[%s12712_s1 + $0x3e8] sm:$0xff] }
 0x140   :  { %v1169_v1 = vpop.f32.mrf.mxu0  ;;  %7851 = vmatmul.mubr.msk.f32.gmra.mxu1 %vm428_vm0, %v272_v7 }
 0x141   :  { %8757 = vxpose.xlu1.b32.cont [5/16] (narrow) %v8756_v24, 32  ;;  %7853 = vmatprep.mubr.msk.f32.mxu1 %vm428_vm0, %v273_v51  ;;  %v1170_v5 = vadd.f32 %v9884_v22, %v1169_v1  ;;  %v8770_v1 = vpack.i.bf16 %v1175_v14, %v1095_v56  ;;  %v10373_v45 = vpop.f32.mrf.mxu1  ;;  %v288_v14 = vld [vmem:[%s12712_s1 + $0x3f8] sm:$0xff] }
 0x142   :  { %v10251_v29 = vpop.f32.mrf.mxu0 }
 0x143   :  { %v8768_v15 = vpack.i.bf16 %v1170_v5, %v1090_v9  ;;  %v1185_v63 = vadd.f32 %v10251_v29, %v9884_v22  ;;  %v283_v29 = vld [vmem:[%s12712_s1 + $0x3d0] sm:$0xff]  ;;  %v1115_v5 = vadd.f32 %v10167_v36, %v9884_v22 }
 0x144   :  { %v10255_v25 = vpop.f32.mrf.mxu0  ;;  %7854 = vmatmul.mubr.msk.f32.gmra.mxu1 %vm428_vm0, %v274_v16 }
 0x145   :  { %8759 = vxpose.xlu1.b32.cont [6/16] (narrow) %v8758_v60, 32  ;;  %7856 = vmatprep.mubr.msk.f32.mxu1 %vm428_vm0, %v275_v2  ;;  %v1180_v24 = vadd.f32 %v9884_v22, %v10255_v25  ;;  %v10382_v25 = vpop.f32.mrf.mxu1 }
 0x146   :  { %v10266_v38 = vpop.f32.mrf.mxu0 }
 0x147   :  { %v8772_v35 = vpack.i.bf16 %v1180_v24, %v1100_v28  ;;  %v10393_v10 = vpop.f32.mrf.mxu1 }
 0x148   :  { %v10270_v42 = vpop.f32.mrf.mxu0  ;;  %7857 = vmatmul.mubr.msk.f32.gmra.mxu1 %vm428_vm0, %v276_v12 }
 0x149   :  { %8761 = vxpose.xlu1.b32.cont [7/16] (narrow) %v8760_v41, 32  ;;  %7859 = vmatprep.mubr.msk.f32.mxu1 %vm428_vm0, %v277_v49  ;;  %v1105_v41 = vadd.f32 %v10151_v20, %v9884_v22  ;;  %v10402_v46 = vpop.f32.mrf.mxu1  ;;  %v1190_v47 = vadd.f32 %v9884_v22, %v10270_v42  ;;  %v284_v20 = vld [vmem:[%s12712_s1 + $0x3d8] sm:$0xff]  ;;  %v285_v42 = vld [vmem:[%s12712_s1 + $0x3e0] sm:$0xff] }
 0x14a   :  { %v10283_v48 = vpop.f32.mrf.mxu0 }
 0x14b   :  { %v8774_v4 = vpack.i.bf16 %v1185_v63, %v1105_v41  ;;  %v10413_v7 = vpop.f32.mrf.mxu1  ;;  %v8776_v16 = vpack.i.bf16 %v1190_v47, %v1110_v58 }
 0x14c   :  { %v10289_v54 = vpop.f32.mrf.mxu0  ;;  %7860 = vmatmul.mubr.msk.f32.gmra.mxu1 %vm428_vm0, %v278_v26 }
 0x14d   :  { %8763 = vxpose.xlu1.b32.cont [8/16] (narrow) %v8762_v50, 32  ;;  %7862 = vmatprep.mubr.msk.f32.mxu1 %vm428_vm0, %v279_v17  ;;  %v10422_v61 = vpop.f32.mrf.mxu1  ;;  %v1200_v36 = vadd.f32 %v9884_v22, %v10289_v54  ;;  %v1205_v54 = vadd.f32 %v10283_v48, %v9884_v22 }
 0x14e   :  { %v10302_v39 = vpop.f32.mrf.mxu0 }
 0x14f   :  { %v10433_v2 = vpop.f32.mrf.mxu1 }
 0x150   :  { %v10308_v53 = vpop.f32.mrf.mxu0  ;;  %7863 = vmatmul.mubr.msk.f32.gmra.mxu1 %vm428_vm0, %v280_v19  ;;  %12733 = vst [vmem:[#allocation5_spill] sm:$0xff] %v10433_v2 }
 0x151   :  { %8765 = vxpose.xlu1.b32.cont [9/16] (narrow) %v8764_v31, 32  ;;  %7865 = vmatprep.mubr.msk.f32.mxu1 %vm428_vm0, %v281_v30  ;;  %v1195_v31 = vadd.f32 %v10266_v38, %v9884_v22  ;;  %v287_v38 = vld [vmem:[%s12712_s1 + $0x3f0] sm:$0xff]  ;;  %v10441_v9 = vpop.f32.mrf.mxu1 }
 0x152   :  { %v10321_v44 = vpop.f32.mrf.mxu0  ;;  %12734 = vst [vmem:[#allocation6_spill] sm:$0xff] %v10441_v9 }
 0x153   :  { %v8778_v12 = vpack.i.bf16 %v1195_v31, %v1115_v5  ;;  %v10452_v56 = vpop.f32.mrf.mxu1 }
 0x154   :  { %v10327_v6 = vpop.f32.mrf.mxu0  ;;  %7866 = vmatmul.mubr.msk.f32.gmra.mxu1 %vm428_vm0, %v282_v32  ;;  %12735 = vst [vmem:[#allocation7_spill] sm:$0xff] %v10452_v56 }
 0x155   :  { %8767 = vxpose.xlu1.b32.cont [10/16] (narrow) %v8766_v27, 32  ;;  %7868 = vmatprep.mubr.msk.f32.mxu1 %vm428_vm0, %v283_v29  ;;  %v10457_v28 = vpop.f32.mrf.mxu1 }
 0x156   :  { %v10340_v57 = vpop.f32.mrf.mxu0  ;;  %12736 = vst [vmem:[#allocation8_spill] sm:$0xff] %v10457_v28 }
 0x158   :  { %v10347_v37 = vpop.f32.mrf.mxu0  ;;  %7869 = vmatmul.mubr.msk.f32.gmra.mxu1 %vm428_vm0, %v284_v20  ;;  %v1210_v20 = vadd.f32 %v9884_v22, %v10308_v53 }
 0x159   :  { %8769 = vxpose.xlu1.b32.cont [11/16] (narrow) %v8768_v15, 32  ;;  %7871 = vmatprep.mubr.msk.f32.mxu1 %vm428_vm0, %v285_v42 }
 0x15a   :  { %v10360_v18 = vpop.f32.mrf.mxu0 }
 0x15c   :  { %v10367_v33 = vpop.f32.mrf.mxu0  ;;  %7872 = vmatmul.mubr.msk.f32.gmra.mxu1 %vm428_vm0, %v286_v40 }
 0x15d   :  { %8771 = vxpose.xlu1.b32.cont [12/16] (narrow) %v8770_v1, 32  ;;  %7874 = vmatprep.mubr.msk.f32.mxu1 %vm428_vm0, %v287_v38  ;;  %v1215_v38 = vadd.f32 %v10302_v39, %v9884_v22 }
 0x15e   :  { %v10380_v60 = vpop.f32.mrf.mxu0 }
 0x160   :  { %v10387_v43 = vpop.f32.mrf.mxu0  ;;  %7875 = vmatmul.mubr.msk.f32.gmra.mxu1 %vm428_vm0, %v288_v14 }
 0x161   :  { %8773 = vxpose.xlu1.b32.cont [13/16] (narrow) %v8772_v35, 32  ;;  %v10463_v35 = vpop.f32.mrf.mxu1 }
 0x162   :  { %v10400_v11 = vpop.f32.mrf.mxu0 }
 0x163   :  { %v10466_v47 = vpop.f32.mrf.mxu1 }
 0x164   :  { %v10407_v50 = vpop.f32.mrf.mxu0 }
 0x165   :  { %8775 = vxpose.xlu1.b32.cont [14/16] (narrow) %v8774_v4, 32  ;;  %v10472_v42 = vpop.f32.mrf.mxu1 }
 0x166   :  { %v10420_v51 = vpop.f32.mrf.mxu0 }
 0x167   :  { %v10475_v40 = vpop.f32.mrf.mxu1 }
 0x168   :  { %v10427_v0 = vpop.f32.mrf.mxu0 }
 0x169   :  { %8777 = vxpose.xlu1.b32.cont [15/16] (narrow) %v8776_v16, 32 }
 0x16a   :  { %v7607_v27 = vpop.f32.mrf.mxu0 }
 0x16b   :  { %v1285_v1 = vadd.f32 %v7607_v27, %v9884_v22 }
 0x16c   :  { %v1279_v49 = vpop.f32.mrf.mxu0 }
 0x16d   :  { %v1280_v15 = vadd.f32 %v9884_v22, %v1279_v49  ;;  %8779 = vxpose.xlu1.b32.end [16/16] (narrow) %v8778_v12, 32  ;;  %v10450_v26 = vpop.trf.xlu0  ;;  %v8802_v41 = vpack.i.bf16 %v1285_v1, %v1205_v54  ;;  %v10481_v12 = vpop.f32.mrf.mxu1 }
 0x16e   :  { %v7610_v17 = vpop.f32.mrf.mxu0  ;;  %v8729_v24 = vunpack.i.l.bf16 %v10450_v26 }
 0x16f   :  { %v8800_v19 = vpack.i.bf16 %v1280_v15, %v1200_v36  ;;  %v1295_v31 = vadd.f32 %v7610_v17, %v9884_v22  ;;  %v10484_v36 = vpop.f32.mrf.mxu1  ;;  %v1220_v17 = vadd.f32 %v9884_v22, %v10327_v6 }
 0x170   :  { %v1289_v30 = vpop.f32.mrf.mxu0  ;;  %8109 = vmatprep.mubr.f32.mxu1 %v8729_v24 }
 0x171   :  { %8801 = vxpose.xlu0.b32.start [1/16] (narrow) %v8800_v19, 32  ;;  %v10461_v63 = vpop.trf.xlu0  ;;  %v1290_v29 = vadd.f32 %v9884_v22, %v1289_v30  ;;  %v8806_v49 = vpack.i.bf16 %v1295_v31, %v1215_v38  ;;  %v10488_v24 = vpop.f32.mrf.mxu1 }
 0x172   :  { %v7613_v32 = vpop.f32.mrf.mxu0 }
 0x173   :  { %v8804_v16 = vpack.i.bf16 %v1290_v29, %v1210_v20  ;;  %v1305_v39 = vadd.f32 %v7613_v32, %v9884_v22  ;;  %v10491_v30 = vpop.f32.mrf.mxu1  ;;  %v1230_v32 = vadd.f32 %v9884_v22, %v10347_v37 }
 0x174   :  { %v1299_v4 = vpop.f32.mrf.mxu0 }
 0x175   :  { %8803 = vxpose.xlu0.b32.cont [2/16] (narrow) %v8802_v41, 32  ;;  %v10470_v58 = vpop.trf.xlu0  ;;  %v1300_v14 = vadd.f32 %v9884_v22, %v1299_v4  ;;  %v1225_v41 = vadd.f32 %v10321_v44, %v9884_v22  ;;  %v10495_v29 = vpop.f32.mrf.mxu1 }
 0x176   :  { %v7616_v48 = vpop.f32.mrf.mxu0 }
 0x177   :  { %v8808_v19 = vpack.i.bf16 %v1300_v14, %v1220_v17  ;;  %v8810_v20 = vpack.i.bf16 %v1305_v39, %v1225_v41  ;;  %v10498_v31 = vpop.f32.mrf.mxu1  ;;  %v1315_v44 = vadd.f32 %v7616_v48, %v9884_v22  ;;  %v1240_v48 = vadd.f32 %v9884_v22, %v10367_v33 }
 0x178   :  { %v1309_v5 = vpop.f32.mrf.mxu0 }
 0x179   :  { %8805 = vxpose.xlu0.b32.cont [3/16] (narrow) %v8804_v16, 32  ;;  %v10479_v27 = vpop.trf.xlu0  ;;  %v1310_v6 = vadd.f32 %v9884_v22, %v1309_v5  ;;  %v10502_v38 = vpop.f32.mrf.mxu1  ;;  %v1235_v5 = vadd.f32 %v10340_v57, %v9884_v22 }
 0x17a   :  { %v7619_v53 = vpop.f32.mrf.mxu0 }
 0x17b   :  { %v8812_v14 = vpack.i.bf16 %v1310_v6, %v1230_v32  ;;  %v10507_v17 = vpop.f32.mrf.mxu1  ;;  %v8814_v37 = vpack.i.bf16 %v1315_v44, %v1235_v5  ;;  %v1325_v57 = vadd.f32 %v7619_v53, %v9884_v22  ;;  %v1250_v53 = vadd.f32 %v9884_v22, %v10387_v43 }
 0x17c   :  { %v1319_v15 = vpop.f32.mrf.mxu0 }
 0x17d   :  { %8807 = vxpose.xlu0.b32.cont [4/16] (narrow) %v8806_v49, 32  ;;  %v10511_v39 = vpop.f32.mrf.mxu1 }
 0x17e   :  { %v7622_v1 = vpop.f32.mrf.mxu0  ;;  %12737 = vst [vmem:[#allocation9_spill] sm:$0xff] %v10511_v39 }
 0x17f   :  { %v10516_v9 = vpop.f32.mrf.mxu1 }
 0x180   :  { %v1329_v54 = vpop.f32.mrf.mxu0  ;;  %12738 = vst [vmem:[#allocation10_spill] sm:$0xff] %v10516_v9 }
 0x181   :  { %8809 = vxpose.xlu0.b32.cont [5/16] (narrow) %v8808_v19, 32  ;;  %v10522_v6 = vpop.f32.mrf.mxu1 }
 0x182   :  { %v7625_v4 = vpop.f32.mrf.mxu0  ;;  %12739 = vst [vmem:[#allocation11_spill] sm:$0xff] %v10522_v6 }
 0x183   :  { %v10527_v39 = vpop.f32.mrf.mxu1 }
 0x184   :  { %v1339_v16 = vpop.f32.mrf.mxu0  ;;  %12740 = vst [vmem:[#allocation12_spill] sm:$0xff] %v10527_v39 }
 0x185   :  { %8811 = vxpose.xlu0.b32.cont [6/16] (narrow) %v8810_v20, 32  ;;  %v1320_v20 = vadd.f32 %v9884_v22, %v1319_v15  ;;  %v1245_v15 = vadd.f32 %v10360_v18, %v9884_v22  ;;  %v10533_v5 = vpop.f32.mrf.mxu1  ;;  %v1335_v18 = vadd.f32 %v7622_v1, %v9884_v22  ;;  %v1260_v1 = vadd.f32 %v9884_v22, %v10407_v50 }
 0x186   :  { %v10504_v49 = vpop.f32.mrf.mxu0  ;;  %12741 = vst [vmem:[#allocation13_spill] sm:$0xff] %v10533_v5 }
 0x187   :  { %v8818_v33 = vpack.i.bf16 %v1325_v57, %v1245_v15  ;;  %v10538_v6 = vpop.f32.mrf.mxu1 }
 0x188   :  { %v1349_v19 = vpop.f32.mrf.mxu0  ;;  %12742 = vst [vmem:[#allocation14_spill] sm:$0xff] %v10538_v6 }
 0x189   :  { %8813 = vxpose.xlu0.b32.cont [7/16] (narrow) %v8812_v14, 32  ;;  %v8816_v14 = vpack.i.bf16 %v1320_v20, %v1240_v48  ;;  %v10544_v20 = vpop.f32.mrf.mxu1 }
 0x18a   :  { %v10513_v41 = vpop.f32.mrf.mxu0  ;;  %12743 = vst [vmem:[#allocation15_spill] sm:$0xff] %v10544_v20 }
 0x18b   :  { %v10549_v39 = vpop.f32.mrf.mxu1 }
 0x18c   :  { %v10518_v2 = vpop.f32.mrf.mxu0  ;;  %12744 = vst [vmem:[#allocation16_spill] sm:$0xff] %v10549_v39 }
 0x18d   :  { %8815 = vxpose.xlu0.b32.cont [8/16] (narrow) %v8814_v37, 32  ;;  %v1330_v37 = vadd.f32 %v9884_v22, %v1329_v54  ;;  %v1255_v54 = vadd.f32 %v10380_v60, %v9884_v22  ;;  %v10555_v15 = vpop.f32.mrf.mxu1  ;;  %v1345_v60 = vadd.f32 %v7625_v4, %v9884_v22 }
 0x18e   :  { %v10524_v32 = vpop.f32.mrf.mxu0  ;;  %12745 = vst [vmem:[#allocation17_spill] sm:$0xff] %v10555_v15 }
 0x18f   :  { %v8822_v43 = vpack.i.bf16 %v1335_v18, %v1255_v54  ;;  %v10560_v5 = vpop.f32.mrf.mxu1 }
 0x190   :  { %v10529_v44 = vpop.f32.mrf.mxu0  ;;  %12746 = vst [vmem:[#allocation18_spill] sm:$0xff] %v10560_v5 }
 0x191   :  { %8817 = vxpose.xlu0.b32.cont [9/16] (narrow) %v8816_v14, 32  ;;  %v8820_v14 = vpack.i.bf16 %v1330_v37, %v1250_v53  ;;  %v10566_v37 = vpop.f32.mrf.mxu1 }
 0x192   :  { %v10535_v9 = vpop.f32.mrf.mxu0  ;;  %12747 = vst [vmem:[#allocation19_spill] sm:$0xff] %v10566_v37 }
 0x193   :  { %v10571_v39 = vpop.f32.mrf.mxu1 }
 0x194   :  { %v10540_v28 = vpop.f32.mrf.mxu0  ;;  %12748 = vst [vmem:[#allocation20_spill] sm:$0xff] %v10571_v39 }
 0x195   :  { %8819 = vxpose.xlu0.b32.cont [10/16] (narrow) %v8818_v33, 32  ;;  %v1340_v33 = vadd.f32 %v9884_v22, %v1339_v16  ;;  %v10578_v16 = vld [vmem:[%s12715_s4] ss:$0 sm:$0xff]  ;;  %v10582_v54 = vpop.f32.mrf.mxu1 }
 0x196   :  { %v10546_v48 = vpop.f32.mrf.mxu0  ;;  %v1265_v50 = vadd.f32 %v10578_v16, %v10400_v11  ;;  %12749 = vst [vmem:[#allocation21_spill] sm:$0xff] %v10582_v54  ;;  %v1350_v22 = vadd.f32 %v10578_v16, %v1349_v19  ;;  %v1355_v11 = vadd.f32 %v10578_v16, %v10504_v49  ;;  %v1275_v19 = vadd.f32 %v10578_v16, %v10420_v51 }
 0x197   :  { %v10587_v4 = vpop.f32.mrf.mxu1  ;;  %v1360_v54 = vadd.f32 %v10578_v16, %v10518_v2 }
 0x198   :  { %v10551_v57 = vpop.f32.mrf.mxu0  ;;  %v8826_v5 = vpack.i.bf16 %v1345_v60, %v1265_v50  ;;  %12750 = vst [vmem:[#allocation22_spill] sm:$0xff] %v10587_v4  ;;  %v8830_v4 = vpack.i.bf16 %v1355_v11, %v1275_v19  ;;  %v1365_v11 = vadd.f32 %v10578_v16, %v10513_v41 }
 0x199   :  { %8821 = vxpose.xlu0.b32.cont [11/16] (narrow) %v8820_v14, 32  ;;  %v8824_v14 = vpack.i.bf16 %v1340_v33, %v1260_v1  ;;  %v1270_v1 = vadd.f32 %v10578_v16, %v10427_v0  ;;  %v10593_v15 = vpop.f32.mrf.mxu1 }
 0x19a   :  { %v10557_v6 = vpop.f32.mrf.mxu0  ;;  %12751 = vst [vmem:[#allocation23_spill] sm:$0xff] %v10593_v15 }
 0x19b   :  { %v10599_v37 = vpop.f32.mrf.mxu1 }
 0x19c   :  { %v10562_v20 = vpop.f32.mrf.mxu0  ;;  %12752 = vst [vmem:[#allocation24_spill] sm:$0xff] %v10599_v37 }
 0x19d   :  { %8823 = vxpose.xlu0.b32.cont [12/16] (narrow) %v8822_v43, 32  ;;  %v10605_v0 = vpop.f32.mrf.mxu1 }
 0x19e   :  { %v10568_v53 = vpop.f32.mrf.mxu0  ;;  %12753 = vst [vmem:[#allocation25_spill] sm:$0xff] %v10605_v0 }
 0x19f   :  { %v10613_v56 = vpop.f32.mrf.mxu1 }
 0x1a0   :  { %v10573_v18 = vpop.f32.mrf.mxu0  ;;  %12754 = vst [vmem:[#allocation26_spill] sm:$0xff] %v10613_v56 }
 0x1a1   :  { %8825 = vxpose.xlu0.b32.cont [13/16] (narrow) %v8824_v14, 32  ;;  %v8828_v14 = vpack.i.bf16 %v1350_v22, %v1270_v1 }
 0x1a2   :  { %v10584_v43 = vpop.f32.mrf.mxu0 }
 0x1a4   :  { %v10589_v33 = vpop.f32.mrf.mxu0 }
 0x1a5   :  { %8827 = vxpose.xlu0.b32.cont [14/16] (narrow) %v8826_v5, 32 }
 0x1a6   :  { %v10595_v39 = vpop.f32.mrf.mxu0 }
 0x1a8   :  { %v10601_v60 = vpop.f32.mrf.mxu0 }
 0x1a9   :  { %8829 = vxpose.xlu0.b32.cont [15/16] (narrow) %v8828_v14, 32 }
 0x1aa   :  { %v7655_v50 = vpop.f32.mrf.mxu0 }
 0x1ab   :  { %v1445_v1 = vadd.f32 %v10578_v16, %v7655_v50  ;;  %v1370_v50 = vadd.f32 %v10578_v16, %v10529_v44 }
 0x1ac   :  { %v1439_v5 = vpop.f32.mrf.mxu0 }
 0x1ad   :  { %v1440_v15 = vadd.f32 %v10578_v16, %v1439_v5  ;;  %8831 = vxpose.xlu0.b32.end [16/16] (narrow) %v8830_v4, 32  ;;  %v10610_v49 = vpop.trf.xlu1  ;;  %v8854_v2 = vpack.i.bf16 %v1445_v1, %v1365_v11  ;;  %v10620_v4 = vpop.f32.mrf.mxu1  ;;  %v1375_v1 = vadd.f32 %v10578_v16, %v10524_v32 }
 0x1ae   :  { %v7658_v22 = vpop.f32.mrf.mxu0  ;;  %12756 = vst [vmem:[#allocation28_spill] sm:$0xff] %v10620_v4 }
 0x1af   :  { %v8852_v37 = vpack.i.bf16 %v1440_v15, %v1360_v54  ;;  %v1455_v56 = vadd.f32 %v10578_v16, %v7658_v22  ;;  %v1380_v22 = vadd.f32 %v10578_v16, %v10540_v28 }
 0x1b0   :  { %v1449_v51 = vpop.f32.mrf.mxu0 }
 0x1b1   :  { %8853 = vxpose.xlu1.b32.start [1/16] (narrow) %v8852_v37, 32  ;;  %v10617_v14 = vpop.trf.xlu1  ;;  %v1450_v5 = vadd.f32 %v10578_v16, %v1449_v51  ;;  %v10627_v37 = vpop.f32.mrf.mxu1  ;;  %v8858_v4 = vpack.i.bf16 %v1455_v56, %v1375_v1  ;;  %v1385_v56 = vadd.f32 %v10578_v16, %v10535_v9 }
 0x1b2   :  { %12755 = vst [vmem:[#allocation27_spill] sm:$0xff] %v10617_v14  ;;  %v7661_v19 = vpop.f32.mrf.mxu0  ;;  %12758 = vst [vmem:[#allocation30_spill] sm:$0xff] %v10627_v37 }
 0x1b3   :  { %v8856_v41 = vpack.i.bf16 %v1450_v5, %v1370_v50  ;;  %v1465_v32 = vadd.f32 %v10578_v16, %v7661_v19 }
 0x1b4   :  { %v1459_v0 = vpop.f32.mrf.mxu0 }
 0x1b5   :  { %8855 = vxpose.xlu1.b32.cont [2/16] (narrow) %v8854_v2, 32  ;;  %v10624_v15 = vpop.trf.xlu1  ;;  %v1460_v44 = vadd.f32 %v10578_v16, %v1459_v0  ;;  %v10634_v2 = vpop.f32.mrf.mxu1 }
 0x1b6   :  { %12757 = vst [vmem:[#allocation29_spill] sm:$0xff] %v10624_v15  ;;  %v7664_v54 = vpop.f32.mrf.mxu0  ;;  %12759 = vst [vmem:[#allocation31_spill] sm:$0xff] %v10634_v2  ;;  %v8862_v2 = vpack.i.bf16 %v1465_v32, %v1385_v56  ;;  %v1395_v32 = vadd.f32 %v10578_v16, %v10546_v48  ;;  %v289_v48 = vld [vmem:[%s12713_s2] sm:$0xff] }
 0x1b7   :  { %v10640_v50 = vpop.f32.mrf.mxu1  ;;  %v1475_v9 = vadd.f32 %v10578_v16, %v7664_v54  ;;  %7885 = vmatprep.mubr.msk.f32.mxu0 %vm428_vm0, %v289_v48 }
 0x1b8   :  { %v1469_v14 = vpop.f32.mrf.mxu0  ;;  %12760 = vst [vmem:[#allocation32_spill] sm:$0xff] %v10640_v50  ;;  %v1390_v50 = vadd.f32 %v10578_v16, %v10551_v57  ;;  %v2621_v57 = vld [vmem:[%s12718_s7 + $0x18] sm:$0xff] }
 0x1b9   :  { %8857 = vxpose.xlu1.b32.cont [3/16] (narrow) %v8856_v41, 32  ;;  %v10631_v51 = vpop.trf.xlu1  ;;  %v8860_v41 = vpack.i.bf16 %v1460_v44, %v1380_v22  ;;  %v10647_v1 = vpop.f32.mrf.mxu1  ;;  %v1470_v28 = vadd.f32 %v10578_v16, %v1469_v14  ;;  %v8866_v54 = vpack.i.bf16 %v1475_v9, %v1395_v32  ;;  %7877 = vmatprep.subr.mxu0 %v2621_v57  ;;  %v2618_v32 = vld [vmem:[%s12718_s7] sm:$0xff] }
 0x1ba   :  { %v7667_v11 = vpop.f32.mrf.mxu0  ;;  %12761 = vst [vmem:[#allocation33_spill] sm:$0xff] %v10647_v1  ;;  %7878 = vmatpush3.msra.mxu0 %v2621_v57 }
 0x1bb   :  { %v10656_v44 = vpop.f32.mrf.mxu1  ;;  %v8864_v22 = vpack.i.bf16 %v1470_v28, %v1390_v50  ;;  %v1485_v57 = vadd.f32 %v10578_v16, %v7667_v11 }
 0x1bc   :  { %v1479_v15 = vpop.f32.mrf.mxu0  ;;  %12762 = vst [vmem:[#allocation34_spill] sm:$0xff] %v10656_v44  ;;  %v1400_v44 = vadd.f32 %v10578_v16, %v10562_v20  ;;  %v290_v20 = vld [vmem:[%s12713_s2 + $0x8] sm:$0xff] }
 0x1bd   :  { %8859 = vxpose.xlu1.b32.cont [4/16] (narrow) %v8858_v4, 32  ;;  %v10665_v56 = vpop.f32.mrf.mxu1  ;;  %v1480_v50 = vadd.f32 %v10578_v16, %v1479_v15 }
 0x1be   :  { %v10638_v5 = vpop.f32.mrf.mxu0  ;;  %12763 = vst [vmem:[#allocation35_spill] sm:$0xff] %v10665_v56 }
 0x1bf   :  { %v10685_v9 = vpop.f32.mrf.mxu1  ;;  %v8868_v1 = vpack.i.bf16 %v1480_v50, %v1400_v44 }
 0x1c0   :  { %v1489_v37 = vpop.f32.mrf.mxu0  ;;  %12764 = vst [vmem:[#allocation36_spill] sm:$0xff] %v10685_v9 }
 0x1c1   :  { %8861 = vxpose.xlu1.b32.cont [5/16] (narrow) %v8860_v41, 32  ;;  %v10699_v9 = vpop.f32.mrf.mxu1  ;;  %v1490_v44 = vadd.f32 %v10578_v16, %v1489_v37  ;;  %v1495_v37 = vadd.f32 %v10578_v16, %v10638_v5  ;;  %v1415_v5 = vadd.f32 %v10578_v16, %v10568_v53  ;;  %v296_v53 = vld [vmem:[%s12713_s2 + $0x38] sm:$0xff] }
 0x1c2   :  { %v10645_v0 = vpop.f32.mrf.mxu0 }
 0x1c4   :  { %v10650_v4 = vpop.f32.mrf.mxu0 }
 0x1c5   :  { %8863 = vxpose.xlu1.b32.cont [6/16] (narrow) %v8862_v2, 32  ;;  %v2620_v2 = vld [vmem:[%s12718_s7 + $0x10] sm:$0xff] }
 0x1c6   :  { %v10654_v19 = vpop.f32.mrf.mxu0  ;;  %7879 = vmatprep.subr.mxu0 %v2620_v2 }
 0x1c7   :  { %7880 = vmatpush3.msra.mxu0 %v2620_v2  ;;  %v291_v2 = vld [vmem:[%s12713_s2 + $0x10] sm:$0xff] }
 0x1c8   :  { %v10659_v41 = vpop.f32.mrf.mxu0 }
 0x1c9   :  { %8865 = vxpose.xlu1.b32.cont [7/16] (narrow) %v8864_v22, 32  ;;  %v2619_v22 = vld [vmem:[%s12718_s7 + $0x8] sm:$0xff] }
 0x1ca   :  { %v10663_v14 = vpop.f32.mrf.mxu0  ;;  %7881 = vmatprep.subr.mxu0 %v2619_v22 }
 0x1cb   :  { %7882 = vmatpush3.msra.mxu0 %v2619_v22  ;;  %v293_v22 = vld [vmem:[%s12713_s2 + $0x20] sm:$0xff] }
 0x1cc   :  { %v10677_v28 = vpop.f32.mrf.mxu0  ;;  %7883 = vmatprep.subr.mxu0 %v2618_v32 }
 0x1cd   :  { %8867 = vxpose.xlu1.b32.cont [8/16] (narrow) %v8866_v54, 32  ;;  %v1405_v54 = vadd.f32 %v10578_v16, %v10557_v6  ;;  %7884 = vmatpush3.msra.mxu0 %v2618_v32  ;;  %v292_v6 = vld [vmem:[%s12713_s2 + $0x18] sm:$0xff] }
 0x1ce   :  { %v7690_v15 = vpop.f32.mrf.mxu0  ;;  %7886 = vmatmul.mubr.msk.f32.vlgmr.msra.gmra.mxu0 %vm428_vm0, %v290_v20 }
 0x1cf   :  { %v8870_v11 = vpack.i.bf16 %v1485_v57, %v1405_v54  ;;  %7888 = vmatprep.mubr.msk.f32.mxu0 %vm428_vm0, %v291_v2  ;;  %v10712_v57 = vpop.f32.mrf.mxu1  ;;  %v10719_v54 = vld [vmem:[%s12717_s6] ss:$0 sm:$0xff] }
 0x1d0   :  { %v1989_v56 = vpop.f32.mrf.mxu0  ;;  %12765 = vst [vmem:[#allocation37_spill] sm:$0xff] %v10712_v57 }
 0x1d1   :  { %8869 = vxpose.xlu1.b32.cont [9/16] (narrow) %v8868_v1, 32  ;;  %v1410_v1 = vadd.f32 %v10578_v16, %v10573_v18 }
 0x1d2   :  { %v7693_v48 = vpop.f32.mrf.mxu0  ;;  %7889 = vmatmul.mubr.msk.f32.gmra.mxu0 %vm428_vm0, %v292_v6  ;;  %v10733_v6 = vpop.f32.mrf.mxu1 }
 0x1d3   :  { %v8872_v20 = vpack.i.bf16 %v1490_v44, %v1410_v1  ;;  %7891 = vmatprep.mubr.msk.f32.mxu0 %vm428_vm0, %v293_v22  ;;  %v295_v1 = vld [vmem:[%s12713_s2 + $0x30] sm:$0xff]  ;;  %v1500_v22 = vadd.f32 %v10578_v16, %v10650_v4  ;;  %v2005_v57 = vadd.f32 %v10719_v54, %v7693_v48  ;;  %v297_v4 = vld [vmem:[%s12713_s2 + $0x40] sm:$0xff] }
 0x1d4   :  { %v1999_v50 = vpop.f32.mrf.mxu0  ;;  %v10749_v48 = vpop.f32.mrf.mxu1 }
 0x1d5   :  { %8871 = vxpose.xlu1.b32.cont [10/16] (narrow) %v8870_v11, 32  ;;  %v294_v11 = vld [vmem:[%s12713_s2 + $0x28] sm:$0xff] }
 0x1d6   :  { %v7696_v32 = vpop.f32.mrf.mxu0  ;;  %7892 = vmatmul.mubr.msk.f32.gmra.mxu0 %vm428_vm0, %v294_v11  ;;  %v1995_v11 = vadd.f32 %v10719_v54, %v7690_v15  ;;  %v10765_v15 = vpop.f32.mrf.mxu1 }
 0x1d7   :  { %v2015_v2 = vadd.f32 %v10719_v54, %v7696_v32  ;;  %v8874_v32 = vpack.i.bf16 %v1495_v37, %v1415_v5  ;;  %7894 = vmatprep.mubr.msk.f32.mxu0 %vm428_vm0, %v295_v1  ;;  %v2000_v37 = vadd.f32 %v10719_v54, %v1999_v50  ;;  %v1425_v50 = vadd.f32 %v10578_v16, %v10584_v43  ;;  %v300_v43 = vld [vmem:[%s12713_s2 + $0x58] sm:$0xff] }
 0x1d8   :  { %v2009_v18 = vpop.f32.mrf.mxu0  ;;  %v1985_v1 = vadd.f32 %v10719_v54, %v10663_v14  ;;  %v301_v14 = vld [vmem:[%s12713_s2 + $0x60] sm:$0xff] }
 0x1d9   :  { %v2010_v44 = vadd.f32 %v10719_v54, %v2009_v18  ;;  %8093 = vmatprep.subr.mxu1 %v2015_v2  ;;  %8873 = vxpose.xlu1.b32.cont [11/16] (narrow) %v8872_v20, 32  ;;  %v1420_v20 = vadd.f32 %v10578_v16, %v10589_v33  ;;  %v298_v33 = vld [vmem:[%s12713_s2 + $0x48] sm:$0xff] }
 0x1da   :  { %8094 = vmatpush3.msra.mxu1 %v2015_v2  ;;  %v1505_v2 = vadd.f32 %v10578_v16, %v10645_v0  ;;  %7895 = vmatmul.mubr.msk.f32.gmra.mxu0 %vm428_vm0, %v296_v53  ;;  %v299_v0 = vld [vmem:[%s12713_s2 + $0x50] sm:$0xff]  ;;  %v10786_v53 = vpop.f32.mrf.mxu1 }
 0x1db   :  { %8095 = vmatprep.subr.mxu1 %v2010_v44  ;;  %v8876_v18 = vpack.i.bf16 %v1500_v22, %v1420_v20  ;;  %7897 = vmatprep.mubr.msk.f32.mxu0 %vm428_vm0, %v297_v4  ;;  %v8734_v22 = vunpack.i.l.bf16 %v10461_v63  ;;  %v8744_v4 = vunpack.i.l.bf16 %v10479_v27 }
 0x1dc   :  { %8096 = vmatpush3.msra.mxu1 %v2010_v44  ;;  %v8878_v5 = vpack.i.bf16 %v1505_v2, %v1425_v50  ;;  %v1510_v44 = vadd.f32 %v10578_v16, %v10659_v41  ;;  %v2135_v41 = vadd.f32 %v10719_v54, %v10413_v7  ;;  %v1435_v7 = vadd.f32 %v10578_v16, %v10595_v39  ;;  %v10801_v2 = vpop.f32.mrf.mxu1 }
 0x1dd   :  { %8097 = vmatprep.subr.mxu1 %v2005_v57  ;;  %8875 = vxpose.xlu1.b32.cont [12/16] (narrow) %v8874_v32, 32  ;;  %v1980_v32 = vadd.f32 %v10719_v54, %v10677_v28  ;;  %v8739_v28 = vunpack.i.l.bf16 %v10470_v58  ;;  %v2125_v39 = vadd.f32 %v10719_v54, %v10393_v10  ;;  %v304_v10 = vld [vmem:[%s12713_s2 + $0x78] sm:$0xff] }
 0x1de   :  { %8098 = vmatpush3.msra.mxu1 %v2005_v57  ;;  %v1990_v57 = vadd.f32 %v10719_v54, %v1989_v56  ;;  %7898 = vmatmul.mubr.msk.f32.gmra.mxu0 %vm428_vm0, %v298_v33  ;;  %v1430_v56 = vadd.f32 %v10578_v16, %v10601_v60  ;;  %v1515_v60 = vadd.f32 %v10578_v16, %v10654_v19  ;;  %v8732_v16 = vunpack.i.h.bf16 %v10450_v26  ;;  %v10814_v50 = vpop.f32.mrf.mxu1 }
 0x1df   :  { %8099 = vmatprep.subr.mxu1 %v2000_v37  ;;  %7900 = vmatprep.mubr.msk.f32.mxu0 %vm428_vm0, %v299_v0  ;;  %v2130_v19 = vadd.f32 %v10719_v54, %v10422_v61  ;;  %v303_v61 = vld [vmem:[%s12713_s2 + $0x70] sm:$0xff]  ;;  %v2120_v33 = vadd.f32 %v10719_v54, %v10402_v46  ;;  %v2115_v26 = vadd.f32 %v10719_v54, %v10373_v45 }
 0x1e0   :  { %8100 = vmatpush3.msra.mxu1 %v2000_v37  ;;  %v8880_v20 = vpack.i.bf16 %v1510_v44, %v1430_v56  ;;  %v302_v37 = vld [vmem:[%s12713_s2 + $0x68] sm:$0xff]  ;;  %v10827_v0 = vpop.f32.mrf.mxu1  ;;  %v2100_v45 = vadd.f32 %v10719_v54, %v10362_v23  ;;  %v2080_v23 = vadd.f32 %v10719_v54, %v10323_v3  ;;  %v2065_v3 = vadd.f32 %v10719_v54, %v10276_v34 }
 0x1e1   :  { %8101 = vmatprep.subr.mxu1 %v1995_v11  ;;  %8877 = vxpose.xlu1.b32.cont [13/16] (narrow) %v8876_v18, 32  ;;  %v8882_v18 = vpack.i.bf16 %v1515_v60, %v1435_v7  ;;  %v8742_v34 = vunpack.i.h.bf16 %v10470_v58  ;;  %v2210_v60 = vadd.f32 %v10719_v54, %v10507_v17  ;;  %v2200_v58 = vadd.f32 %v10719_v54, %v10498_v31 }
 0x1e2   :  { %8102 = vmatpush3.msra.mxu1 %v1995_v11  ;;  %7901 = vmatmul.mubr.msk.f32.gmra.mxu0 %vm428_vm0, %v300_v43  ;;  %v10833_v44 = vpop.f32.mrf.mxu1  ;;  %v2185_v31 = vadd.f32 %v10719_v54, %v10481_v12  ;;  %v2180_v7 = vadd.f32 %v10719_v54, %v10484_v36  ;;  %v2165_v12 = vadd.f32 %v10719_v54, %v10463_v35  ;;  %v12768_v35 = vld [vmem:[#allocation5_spill] sm:$0xff] }
 0x1e3   :  { %8103 = vmatprep.subr.mxu1 %v1990_v57  ;;  %7903 = vmatprep.mubr.msk.f32.mxu0 %vm428_vm0, %v301_v14  ;;  %v2215_v14 = vadd.f32 %v10719_v54, %v10502_v38  ;;  %v8747_v38 = vunpack.i.h.bf16 %v10479_v27  ;;  %v2190_v27 = vadd.f32 %v10719_v54, %v10491_v30  ;;  %v2170_v30 = vadd.f32 %v10719_v54, %v10475_v40  ;;  %v12767_v40 = vld [vmem:[#allocation8_spill] sm:$0xff] }
 0x1e4   :  { %8104 = vmatpush3.msra.mxu1 %v1990_v57  ;;  %v2110_v57 = vadd.f32 %v10719_v54, %v10382_v25  ;;  %v2090_v25 = vadd.f32 %v10719_v54, %v10342_v13  ;;  %v10839_v43 = vpop.f32.mrf.mxu1  ;;  %v2160_v36 = vadd.f32 %v10719_v54, %v10466_v47  ;;  %v12769_v47 = vld [vmem:[#allocation6_spill] sm:$0xff] }
 0x1e5   :  { %8105 = vmatprep.subr.mxu1 %v1985_v1  ;;  %8879 = vxpose.xlu1.b32.cont [14/16] (narrow) %v8878_v5, 32  ;;  %v2105_v5 = vadd.f32 %v10719_v54, %v10353_v52  ;;  %v2085_v52 = vadd.f32 %v10719_v54, %v10314_v62 }
 0x1e6   :  { %8106 = vmatpush3.msra.mxu1 %v1985_v1  ;;  %7904 = vmatmul.mubr.msk.f32.gmra.mxu0 %vm428_vm0, %v302_v37  ;;  %v2095_v1 = vadd.f32 %v10719_v54, %v10333_v8  ;;  %v10845_v56 = vpop.f32.mrf.mxu1  ;;  %v2075_v8 = vadd.f32 %v10719_v54, %v10295_v55  ;;  %v2060_v55 = vadd.f32 %v10719_v54, %v10285_v21  ;;  %v8781_v21 = vunpack.i.l.bf16 %v10610_v49 }
 0x1e7   :  { %8107 = vmatprep.subr.mxu1 %v1980_v32  ;;  %7906 = vmatprep.mubr.msk.f32.mxu0 %vm428_vm0, %v303_v61  ;;  %v2145_v61 = vadd.f32 %v10719_v54, %v12768_v35  ;;  %v12782_v35 = vld [vmem:[#allocation13_spill] sm:$0xff] }
 0x1e8   :  { %8108 = vmatpush3.msra.mxu1 %v1980_v32  ;;  %v2070_v32 = vadd.f32 %v10719_v54, %v10304_v59  ;;  %v10853_v62 = vpop.f32.mrf.mxu1  ;;  %v8737_v59 = vunpack.i.h.bf16 %v10461_v63  ;;  %v2205_v63 = vadd.f32 %v10719_v54, %v10495_v29 }
 0x1e9   :  { %8115 = vmatprep.subr.mxu1 %v2135_v41  ;;  %8881 = vxpose.xlu1.b32.cont [15/16] (narrow) %v8880_v20, 32 }
 0x1ea   :  { %8110 = vmatmul.mubr.f32.vlgmr.msra.gmra.mxu1 %v8734_v22  ;;  %7907 = vmatmul.mubr.msk.f32.gmra.mxu0 %vm428_vm0, %v304_v10  ;;  %v10863_v22 = vpop.f32.mrf.mxu1  ;;  %v12770_v10 = vld [vmem:[#allocation23_spill] sm:$0xff] }
 0x1eb   :  { %8116 = vmatpush3.msra.mxu1 %v2135_v41  ;;  %8112 = vmatprep.mubr.f32.mxu1 %v8739_v28  ;;  %v2195_v28 = vadd.f32 %v10719_v54, %v10488_v24  ;;  %v2175_v24 = vadd.f32 %v10719_v54, %v10472_v42  ;;  %v12766_v42 = vld [vmem:[#allocation7_spill] sm:$0xff] }
 0x1ec   :  { %8117 = vmatprep.subr.mxu1 %v2130_v19  ;;  %v10869_v20 = vpop.f32.mrf.mxu1 }
 0x1ed   :  { %8118 = vmatpush3.msra.mxu1 %v2130_v19  ;;  %8883 = vxpose.xlu1.b32.end [16/16] (narrow) %v8882_v18, 32  ;;  %v10810_v11 = vpop.trf.xlu0  ;;  %v2155_v18 = vadd.f32 %v10719_v54, %v12766_v42 }
 0x1ee   :  { %8113 = vmatmul.mubr.f32.gmra.mxu1 %v8744_v4  ;;  %8119 = vmatprep.subr.mxu1 %v2125_v39  ;;  %v10877_v17 = vpop.f32.mrf.mxu1 }
 0x1ef   :  { %8120 = vmatpush3.msra.mxu1 %v2125_v39  ;;  %8147 = vmatprep.mubr.f32.mxu1 %v8732_v16  ;;  %v2150_v39 = vadd.f32 %v10719_v54, %v12767_v40 }
 0x1f0   :  { %8121 = vmatprep.subr.mxu1 %v2120_v33  ;;  %v10883_v29 = vpop.f32.mrf.mxu1 }
 0x1f1   :  { %8122 = vmatpush3.msra.mxu1 %v2120_v33  ;;  %v10823_v46 = vpop.trf.xlu0  ;;  %v2140_v33 = vadd.f32 %v10719_v54, %v12769_v47  ;;  %v12783_v47 = vld [vmem:[#allocation14_spill] sm:$0xff] }
 0x1f2   :  { %8123 = vmatprep.subr.mxu1 %v2115_v26  ;;  %v10889_v37 = vpop.f32.mrf.mxu1 }
 0x1f3   :  { %8124 = vmatpush3.msra.mxu1 %v2115_v26  ;;  %v2295_v26 = vadd.f32 %v10719_v54, %v12770_v10 }
 0x1f4   :  { %8125 = vmatprep.subr.mxu1 %v2110_v57  ;;  %v10895_v19 = vpop.f32.mrf.mxu1 }
 0x1f5   :  { %8126 = vmatpush3.msra.mxu1 %v2110_v57  ;;  %v10849_v13 = vpop.trf.xlu0  ;;  %v12771_v57 = vld [vmem:[#allocation27_spill] sm:$0xff] }
 0x1f6   :  { %8127 = vmatprep.subr.mxu1 %v2105_v5  ;;  %v10901_v4 = vpop.f32.mrf.mxu1 }
 0x1f7   :  { %8128 = vmatpush3.msra.mxu1 %v2105_v5  ;;  %v8786_v5 = vunpack.i.l.bf16 %v12771_v57 }
 0x1f8   :  { %8129 = vmatprep.subr.mxu1 %v2100_v45  ;;  %v10907_v16 = vpop.f32.mrf.mxu1 }
 0x1f9   :  { %8130 = vmatpush3.msra.mxu1 %v2100_v45  ;;  %v10857_v41 = vpop.trf.xlu0 }
 0x1fa   :  { %8131 = vmatprep.subr.mxu1 %v2095_v1  ;;  %v10916_v45 = vpop.f32.mrf.mxu1 }
 0x1fb   :  { %8132 = vmatpush3.msra.mxu1 %v2095_v1  ;;  %v12772_v1 = vld [vmem:[#allocation29_spill] sm:$0xff] }
 0x1fc   :  { %8133 = vmatprep.subr.mxu1 %v2090_v25 }
 0x1fd   :  { %8134 = vmatpush3.msra.mxu1 %v2090_v25  ;;  %v8791_v25 = vunpack.i.l.bf16 %v12772_v1 }
 0x1fe   :  { %8135 = vmatprep.subr.mxu1 %v2085_v52 }
 0x1ff   :  { %8136 = vmatpush3.msra.mxu1 %v2085_v52  ;;  %v12773_v52 = vld [vmem:[#allocation24_spill] sm:$0xff] }
 0x200   :  { %8137 = vmatprep.subr.mxu1 %v2080_v23 }
 0x201   :  { %8138 = vmatpush3.msra.mxu1 %v2080_v23  ;;  %v2290_v23 = vadd.f32 %v10719_v54, %v12773_v52 }
 0x202   :  { %8139 = vmatprep.subr.mxu1 %v2075_v8 }
 0x203   :  { %8140 = vmatpush3.msra.mxu1 %v2075_v8  ;;  %v8796_v8 = vunpack.i.l.bf16 %v10631_v51 }
 0x204   :  { %8141 = vmatprep.subr.mxu1 %v2070_v32 }
 0x205   :  { %8142 = vmatpush3.msra.mxu1 %v2070_v32  ;;  %v10922_v32 = vpop.f32.mrf.mxu1 }
 0x206   :  { %8143 = vmatprep.subr.mxu1 %v2065_v3 }
 0x207   :  { %8144 = vmatpush3.msra.mxu1 %v2065_v3  ;;  %v12774_v3 = vld [vmem:[#allocation21_spill] sm:$0xff] }
 0x208   :  { %8145 = vmatprep.subr.mxu1 %v2060_v55 }
 0x209   :  { %8146 = vmatpush3.msra.mxu1 %v2060_v55  ;;  %v2285_v55 = vadd.f32 %v10719_v54, %v12774_v3 }
 0x20a   :  { %8148 = vmatmul.mubr.f32.vlgmr.msra.gmra.mxu1 %v8737_v59  ;;  %8153 = vmatprep.subr.mxu1 %v2215_v14 }
 0x20b   :  { %8154 = vmatpush3.msra.mxu1 %v2215_v14  ;;  %8150 = vmatprep.mubr.f32.mxu1 %v8742_v34  ;;  %v8784_v14 = vunpack.i.h.bf16 %v10610_v49  ;;  %v12775_v34 = vld [vmem:[#allocation22_spill] sm:$0xff] }
 0x20c   :  { %8155 = vmatprep.subr.mxu1 %v2210_v60 }
 0x20d   :  { %8156 = vmatpush3.msra.mxu1 %v2210_v60  ;;  %v2280_v60 = vadd.f32 %v10719_v54, %v12775_v34  ;;  %v12787_v34 = vld [vmem:[#allocation10_spill] sm:$0xff] }
 0x20e   :  { %8157 = vmatprep.subr.mxu1 %v2205_v63  ;;  %8151 = vmatmul.mubr.f32.gmra.mxu1 %v8747_v38  ;;  %v12776_v38 = vld [vmem:[#allocation19_spill] sm:$0xff] }
 0x20f   :  { %8158 = vmatpush3.msra.mxu1 %v2205_v63  ;;  %8185 = vmatprep.mubr.f32.mxu1 %v8781_v21  ;;  %v10931_v21 = vpop.f32.mrf.mxu1  ;;  %v2275_v63 = vadd.f32 %v10719_v54, %v12776_v38  ;;  %v2375_v38 = vadd.f32 %v10719_v54, %v10765_v15  ;;  %v308_v15 = vld [vmem:[%s12713_s2 + $0x98] sm:$0xff] }
 0x210   :  { %8159 = vmatprep.subr.mxu1 %v2200_v58 }
 0x211   :  { %8160 = vmatpush3.msra.mxu1 %v2200_v58 }
 0x212   :  { %8161 = vmatprep.subr.mxu1 %v2195_v28 }
 0x213   :  { %8162 = vmatpush3.msra.mxu1 %v2195_v28  ;;  %v12777_v28 = vld [vmem:[#allocation20_spill] sm:$0xff] }
 0x214   :  { %8163 = vmatprep.subr.mxu1 %v2190_v27  ;;  %v2270_v49 = vadd.f32 %v10719_v54, %v12777_v28  ;;  %v8789_v28 = vunpack.i.h.bf16 %v12771_v57 }
 0x215   :  { %8164 = vmatpush3.msra.mxu1 %v2190_v27  ;;  %v10939_v27 = vpop.f32.mrf.mxu1 }
 0x216   :  { %8165 = vmatprep.subr.mxu1 %v2185_v31 }
 0x217   :  { %8166 = vmatpush3.msra.mxu1 %v2185_v31  ;;  %v12778_v31 = vld [vmem:[#allocation17_spill] sm:$0xff] }
 0x218   :  { %8167 = vmatprep.subr.mxu1 %v2180_v7 }
 0x219   :  { %8168 = vmatpush3.msra.mxu1 %v2180_v7  ;;  %v2265_v7 = vadd.f32 %v10719_v54, %v12778_v31  ;;  %v8794_v31 = vunpack.i.h.bf16 %v12772_v1  ;;  %v2365_v1 = vadd.f32 %v10719_v54, %v10733_v6 }
 0x21a   :  { %8169 = vmatprep.subr.mxu1 %v2175_v24 }
 0x21b   :  { %8170 = vmatpush3.msra.mxu1 %v2175_v24  ;;  %v12779_v24 = vld [vmem:[#allocation18_spill] sm:$0xff] }
 0x21c   :  { %8171 = vmatprep.subr.mxu1 %v2170_v30 }
 0x21d   :  { %8172 = vmatpush3.msra.mxu1 %v2170_v30  ;;  %v2260_v30 = vadd.f32 %v10719_v54, %v12779_v24  ;;  %v8833_v24 = vunpack.i.l.bf16 %v10810_v11 }
 0x21e   :  { %8173 = vmatprep.subr.mxu1 %v2165_v12 }
 0x21f   :  { %8174 = vmatpush3.msra.mxu1 %v2165_v12  ;;  %v10945_v12 = vpop.f32.mrf.mxu1 }
 0x220   :  { %8175 = vmatprep.subr.mxu1 %v2160_v36 }
 0x221   :  { %8176 = vmatpush3.msra.mxu1 %v2160_v36  ;;  %v12780_v36 = vld [vmem:[#allocation15_spill] sm:$0xff] }
 0x222   :  { %8177 = vmatprep.subr.mxu1 %v2155_v18  ;;  %v2255_v42 = vadd.f32 %v10719_v54, %v12780_v36  ;;  %v8799_v36 = vunpack.i.h.bf16 %v10631_v51 }
 0x223   :  { %8178 = vmatpush3.msra.mxu1 %v2155_v18  ;;  %v12781_v18 = vld [vmem:[#allocation16_spill] sm:$0xff] }
 0x224   :  { %8179 = vmatprep.subr.mxu1 %v2150_v39  ;;  %v2250_v40 = vadd.f32 %v10719_v54, %v12781_v18  ;;  %v2360_v18 = vadd.f32 %v10719_v54, %v10749_v48  ;;  %v312_v48 = vld [vmem:[%s12713_s2 + $0xb8] sm:$0xff] }
 0x225   :  { %8180 = vmatpush3.msra.mxu1 %v2150_v39  ;;  %v10951_v39 = vpop.f32.mrf.mxu1 }
 0x226   :  { %8181 = vmatprep.subr.mxu1 %v2145_v61 }
 0x227   :  { %8182 = vmatpush3.msra.mxu1 %v2145_v61  ;;  %v2245_v61 = vadd.f32 %v10719_v54, %v12782_v35  ;;  %v10957_v10 = vpop.f32.mrf.mxu1  ;;  %v311_v35 = vld [vmem:[%s12713_s2 + $0xb0] sm:$0xff] }
 0x228   :  { %8183 = vmatprep.subr.mxu1 %v2140_v33 }
 0x229   :  { %8184 = vmatpush3.msra.mxu1 %v2140_v33  ;;  %v2240_v33 = vadd.f32 %v10719_v54, %v12783_v47 }
 0x22a   :  { %8186 = vmatmul.mubr.f32.vlgmr.msra.gmra.mxu1 %v8786_v5  ;;  %8191 = vmatprep.subr.mxu1 %v2295_v26 }
 0x22b   :  { %8192 = vmatpush3.msra.mxu1 %v2295_v26  ;;  %8188 = vmatprep.mubr.f32.mxu1 %v8791_v25  ;;  %v12784_v26 = vld [vmem:[#allocation11_spill] sm:$0xff]  ;;  %v12785_v25 = vld [vmem:[#allocation12_spill] sm:$0xff] }
 0x22c   :  { %8193 = vmatprep.subr.mxu1 %v2290_v23  ;;  %v2235_v5 = vadd.f32 %v10719_v54, %v12784_v26  ;;  %v2230_v52 = vadd.f32 %v10719_v54, %v12785_v25  ;;  %v314_v25 = vld [vmem:[%s12713_s2 + $0xc8] sm:$0xff] }
 0x22d   :  { %8194 = vmatpush3.msra.mxu1 %v2290_v23  ;;  %v10927_v59 = vpop.trf.xlu1  ;;  %v10963_v23 = vpop.f32.mrf.mxu1 }
 0x22e   :  { %8195 = vmatprep.subr.mxu1 %v2285_v55  ;;  %8189 = vmatmul.mubr.f32.gmra.mxu1 %v8796_v8  ;;  %v12786_v8 = vld [vmem:[#allocation9_spill] sm:$0xff] }
 0x22f   :  { %8196 = vmatpush3.msra.mxu1 %v2285_v55  ;;  %8223 = vmatprep.mubr.f32.mxu1 %v8784_v14  ;;  %v2225_v3 = vadd.f32 %v10719_v54, %v12786_v8  ;;  %v305_v55 = vld [vmem:[%s12713_s2 + $0x80] sm:$0xff]  ;;  %v306_v14 = vld [vmem:[%s12713_s2 + $0x88] sm:$0xff] }
 0x230   :  { %8197 = vmatprep.subr.mxu1 %v2280_v60  ;;  %7909 = vmatprep.mubr.msk.f32.mxu0 %vm428_vm0, %v305_v55  ;;  %v12791_v55 = vld [vmem:[#allocation33_spill] sm:$0xff] }
 0x231   :  { %8198 = vmatpush3.msra.mxu1 %v2280_v60  ;;  %v10935_v58 = vpop.trf.xlu1  ;;  %v2220_v60 = vadd.f32 %v10719_v54, %v12787_v34  ;;  %7910 = vmatmul.mubr.msk.f32.gmra.mxu0 %vm428_vm0, %v306_v14  ;;  %v2335_v14 = vadd.f32 %v10719_v54, %v12791_v55  ;;  %v315_v34 = vld [vmem:[%s12713_s2 + $0xd0] sm:$0xff]  ;;  %v8838_v55 = vunpack.i.l.bf16 %v10823_v46 }
 0x232   :  { %8199 = vmatprep.subr.mxu1 %v2275_v63 }
 0x233   :  { %8200 = vmatpush3.msra.mxu1 %v2275_v63  ;;  %v10978_v63 = vpop.f32.mrf.mxu1 }
 0x234   :  { %8201 = vmatprep.subr.mxu1 %v2270_v49 }
 0x235   :  { %8202 = vmatpush3.msra.mxu1 %v2270_v49  ;;  %v307_v49 = vld [vmem:[%s12713_s2 + $0x90] sm:$0xff]  ;;  %v10992_v57 = vpop.f32.mrf.mxu1 }
 0x236   :  { %8203 = vmatprep.subr.mxu1 %v2265_v7  ;;  %7912 = vmatprep.mubr.msk.f32.mxu0 %vm428_vm0, %v307_v49 }
 0x237   :  { %8204 = vmatpush3.msra.mxu1 %v2265_v7  ;;  %v2370_v7 = vadd.f32 %v10719_v54, %v10786_v53  ;;  %7913 = vmatmul.mubr.msk.f32.gmra.mxu0 %vm428_vm0, %v308_v15  ;;  %v309_v53 = vld [vmem:[%s12713_s2 + $0xa0] sm:$0xff]  ;;  %v11010_v6 = vpop.f32.mrf.mxu1 }
 0x238   :  { %8205 = vmatprep.subr.mxu1 %v2260_v30  ;;  %7915 = vmatprep.mubr.msk.f32.mxu0 %vm428_vm0, %v309_v53 }
 0x239   :  { %8206 = vmatpush3.msra.mxu1 %v2260_v30  ;;  %v10995_v30 = vpop.trf.xlu1 }
 0x23a   :  { %8207 = vmatprep.subr.mxu1 %v2255_v42 }
 0x23b   :  { %8208 = vmatpush3.msra.mxu1 %v2255_v42  ;;  %v310_v42 = vld [vmem:[%s12713_s2 + $0xa8] sm:$0xff] }
 0x23c   :  { %8209 = vmatprep.subr.mxu1 %v2250_v40  ;;  %7916 = vmatmul.mubr.msk.f32.gmra.mxu0 %vm428_vm0, %v310_v42  ;;  %v12795_v42 = vld [vmem:[#allocation28_spill] sm:$0xff] }
 0x23d   :  { %8210 = vmatpush3.msra.mxu1 %v2250_v40  ;;  %v11012_v51 = vpop.trf.xlu1  ;;  %v2355_v40 = vadd.f32 %v10719_v54, %v10699_v9  ;;  %7918 = vmatprep.mubr.msk.f32.mxu0 %vm428_vm0, %v311_v35  ;;  %v12789_v9 = vld [vmem:[#allocation35_spill] sm:$0xff]  ;;  %v320_v35 = vld [vmem:[%s12713_s2 + $0xf8] sm:$0xff] }
 0x23e   :  { %8211 = vmatprep.subr.mxu1 %v2245_v61  ;;  %v2345_v26 = vadd.f32 %v10719_v54, %v12789_v9  ;;  %v12797_v9 = vld [vmem:[#allocation25_spill] sm:$0xff] }
 0x23f   :  { %8212 = vmatpush3.msra.mxu1 %v2245_v61  ;;  %v12788_v61 = vld [vmem:[#allocation37_spill] sm:$0xff] }
 0x240   :  { %8213 = vmatprep.subr.mxu1 %v2240_v33  ;;  %v2350_v47 = vadd.f32 %v10719_v54, %v12788_v61  ;;  %7919 = vmatmul.mubr.msk.f32.gmra.mxu0 %vm428_vm0, %v312_v48  ;;  %v12796_v48 = vld [vmem:[#allocation30_spill] sm:$0xff] }
 0x241   :  { %8214 = vmatpush3.msra.mxu1 %v2240_v33  ;;  %v11026_v33 = vpop.f32.mrf.mxu1  ;;  %v2310_v61 = vadd.f32 %v10719_v54, %v12796_v48 }
 0x242   :  { %8215 = vmatprep.subr.mxu1 %v2235_v5 }
 0x243   :  { %8216 = vmatpush3.msra.mxu1 %v2235_v5  ;;  %v313_v5 = vld [vmem:[%s12713_s2 + $0xc0] sm:$0xff] }
 0x244   :  { %8217 = vmatprep.subr.mxu1 %v2230_v52  ;;  %7921 = vmatprep.mubr.msk.f32.mxu0 %vm428_vm0, %v313_v5  ;;  %v12798_v5 = vld [vmem:[#allocation26_spill] sm:$0xff] }
 0x245   :  { %8218 = vmatpush3.msra.mxu1 %v2230_v52  ;;  %v12790_v52 = vld [vmem:[#allocation36_spill] sm:$0xff]  ;;  %7922 = vmatmul.mubr.msk.f32.gmra.mxu0 %vm428_vm0, %v314_v25  ;;  %v2300_v25 = vadd.f32 %v10719_v54, %v12798_v5  ;;  %v326_v5 = vld [vmem:[%s12713_s2 + $0x128] sm:$0xff] }
 0x246   :  { %8219 = vmatprep.subr.mxu1 %v2225_v3  ;;  %v2340_v8 = vadd.f32 %v10719_v54, %v12790_v52  ;;  %7924 = vmatprep.mubr.msk.f32.mxu0 %vm428_vm0, %v315_v34  ;;  %v2455_v52 = vadd.f32 %v10719_v54, %v10907_v16  ;;  %v2450_v34 = vadd.f32 %v10719_v54, %v10916_v45  ;;  %v8836_v16 = vunpack.i.h.bf16 %v10810_v11 }
 0x247   :  { %8220 = vmatpush3.msra.mxu1 %v2225_v3  ;;  %v11040_v3 = vpop.f32.mrf.mxu1  ;;  %v2435_v45 = vadd.f32 %v10719_v54, %v10883_v29  ;;  %v2430_v11 = vadd.f32 %v10719_v54, %v10889_v37  ;;  %v2425_v29 = vadd.f32 %v10719_v54, %v10869_v20  ;;  %v2420_v37 = vadd.f32 %v10719_v54, %v10877_v17 }
 0x248   :  { %8221 = vmatprep.subr.mxu1 %v2220_v60  ;;  %v2400_v17 = vadd.f32 %v10719_v54, %v10845_v56  ;;  %v2380_v56 = vadd.f32 %v10719_v54, %v10814_v50  ;;  %v8851_v50 = vunpack.i.h.bf16 %v10857_v41 }
 0x249   :  { %8222 = vmatpush3.msra.mxu1 %v2220_v60  ;;  %v316_v60 = vld [vmem:[%s12713_s2 + $0xd8] sm:$0xff]  ;;  %v11054_v49 = vpop.f32.mrf.mxu1 }
 0x24a   :  { %8224 = vmatmul.mubr.f32.vlgmr.msra.gmra.mxu1 %v8789_v28  ;;  %8229 = vmatprep.subr.mxu1 %v2375_v38 }
 0x24b   :  { %8230 = vmatpush3.msra.mxu1 %v2375_v38  ;;  %8226 = vmatprep.mubr.f32.mxu1 %v8794_v31  ;;  %v12792_v38 = vld [vmem:[#allocation34_spill] sm:$0xff]  ;;  %v12793_v31 = vld [vmem:[#allocation31_spill] sm:$0xff]  ;;  %v11068_v53 = vpop.f32.mrf.mxu1 }
 0x24c   :  { %8231 = vmatprep.subr.mxu1 %v2370_v7  ;;  %v2330_v28 = vadd.f32 %v10719_v54, %v12792_v38  ;;  %v2325_v15 = vadd.f32 %v10719_v54, %v12793_v31  ;;  %7925 = vmatmul.mubr.msk.f32.gmra.mxu0 %vm428_vm0, %v316_v60  ;;  %v8848_v38 = vunpack.i.l.bf16 %v10857_v41  ;;  %v2440_v31 = vadd.f32 %v10719_v54, %v10901_v4  ;;  %v321_v4 = vld [vmem:[%s12713_s2 + $0x100] sm:$0xff]  ;;  %v324_v41 = vld [vmem:[%s12713_s2 + $0x118] sm:$0xff] }
 0x24d   :  { %8232 = vmatpush3.msra.mxu1 %v2370_v7  ;;  %v317_v7 = vld [vmem:[%s12713_s2 + $0xe0] sm:$0xff] }
 0x24e   :  { %8233 = vmatprep.subr.mxu1 %v2365_v1  ;;  %8227 = vmatmul.mubr.f32.gmra.mxu1 %v8799_v36 }
 0x24f   :  { %8234 = vmatpush3.msra.mxu1 %v2365_v1  ;;  %8261 = vmatprep.mubr.f32.mxu1 %v8833_v24  ;;  %v318_v24 = vld [vmem:[%s12713_s2 + $0xe8] sm:$0xff]  ;;  %v12794_v1 = vld [vmem:[#allocation32_spill] sm:$0xff] }
 0x250   :  { %8235 = vmatprep.subr.mxu1 %v2360_v18  ;;  %7927 = vmatprep.mubr.msk.f32.mxu0 %vm428_vm0, %v317_v7  ;;  %v2320_v36 = vadd.f32 %v10719_v54, %v12794_v1  ;;  %v322_v7 = vld [vmem:[%s12713_s2 + $0x108] sm:$0xff]  ;;  %v2415_v1 = vadd.f32 %v10719_v54, %v10853_v62  ;;  %v2395_v62 = vadd.f32 %v10719_v54, %v10827_v0 }
 0x251   :  { %8236 = vmatpush3.msra.mxu1 %v2360_v18  ;;  %v2315_v18 = vadd.f32 %v10719_v54, %v12795_v42  ;;  %7928 = vmatmul.mubr.msk.f32.gmra.mxu0 %vm428_vm0, %v318_v24  ;;  %v2405_v42 = vadd.f32 %v10719_v54, %v10839_v43  ;;  %v2385_v43 = vadd.f32 %v10719_v54, %v10801_v2 }
 0x252   :  { %8237 = vmatprep.subr.mxu1 %v2355_v40 }
 0x253   :  { %8238 = vmatpush3.msra.mxu1 %v2355_v40  ;;  %v319_v40 = vld [vmem:[%s12713_s2 + $0xf0] sm:$0xff] }
 0x254   :  { %8239 = vmatprep.subr.mxu1 %v2350_v47  ;;  %7930 = vmatprep.mubr.msk.f32.mxu0 %vm428_vm0, %v319_v40 }
 0x255   :  { %8240 = vmatpush3.msra.mxu1 %v2350_v47  ;;  %v11082_v47 = vpop.f32.mrf.mxu1  ;;  %7931 = vmatmul.mubr.msk.f32.gmra.mxu0 %vm428_vm0, %v320_v35  ;;  %v8841_v35 = vunpack.i.h.bf16 %v10823_v46  ;;  %v8885_v46 = vunpack.i.l.bf16 %v10927_v59 }
 0x256   :  { %8241 = vmatprep.subr.mxu1 %v2345_v26  ;;  %7933 = vmatprep.mubr.msk.f32.mxu0 %vm428_vm0, %v321_v4  ;;  %v2535_v0 = vadd.f32 %v10719_v54, %v11082_v47  ;;  %v323_v47 = vld [vmem:[%s12713_s2 + $0x110] sm:$0xff]  ;;  %v334_v4 = vld [vmem:[%s12713_s2 + $0x168] sm:$0xff] }
 0x257   :  { %8242 = vmatpush3.msra.mxu1 %v2345_v26  ;;  %v2305_v26 = vadd.f32 %v10719_v54, %v12797_v9  ;;  %v2520_v9 = vadd.f32 %v10719_v54, %v11068_v53  ;;  %v2510_v53 = vadd.f32 %v10719_v54, %v11040_v3  ;;  %v2505_v3 = vadd.f32 %v10719_v54, %v10992_v57  ;;  %v331_v57 = vld [vmem:[%s12713_s2 + $0x150] sm:$0xff] }
 0x258   :  { %8243 = vmatprep.subr.mxu1 %v2340_v8 }
 0x259   :  { %8244 = vmatpush3.msra.mxu1 %v2340_v8  ;;  %v11091_v8 = vpop.f32.mrf.mxu1  ;;  %7934 = vmatmul.mubr.msk.f32.gmra.mxu0 %vm428_vm0, %v322_v7 }
 0x25a   :  { %8245 = vmatprep.subr.mxu1 %v2335_v14  ;;  %v2530_v2 = vadd.f32 %v10719_v54, %v11091_v8  ;;  %7936 = vmatprep.mubr.msk.f32.mxu0 %vm428_vm0, %v323_v47  ;;  %v327_v8 = vld [vmem:[%s12713_s2 + $0x130] sm:$0xff]  ;;  %v8888_v47 = vunpack.i.h.bf16 %v10927_v59  ;;  %v341_v59 = vld [vmem:[%s12713_s2 + $0x1a0] sm:$0xff] }
 0x25b   :  { %8246 = vmatpush3.msra.mxu1 %v2335_v14  ;;  %v8843_v14 = vunpack.i.l.bf16 %v10849_v13  ;;  %v11097_v60 = vpop.f32.mrf.mxu1 }
 0x25c   :  { %8247 = vmatprep.subr.mxu1 %v2330_v28 }
 0x25d   :  { %8248 = vmatpush3.msra.mxu1 %v2330_v28  ;;  %v2445_v28 = vadd.f32 %v10719_v54, %v10895_v19  ;;  %7937 = vmatmul.mubr.msk.f32.gmra.mxu0 %vm428_vm0, %v324_v41 }
 0x25e   :  { %8249 = vmatprep.subr.mxu1 %v2325_v15 }
 0x25f   :  { %8250 = vmatpush3.msra.mxu1 %v2325_v15  ;;  %v11105_v15 = vpop.f32.mrf.mxu1 }
 0x260   :  { %8251 = vmatprep.subr.mxu1 %v2320_v36 }
 0x261   :  { %8252 = vmatpush3.msra.mxu1 %v2320_v36  ;;  %v11111_v19 = vpop.f32.mrf.mxu1  ;;  %v2410_v36 = vadd.f32 %v10719_v54, %v10863_v22  ;;  %v2390_v22 = vadd.f32 %v10719_v54, %v10833_v44  ;;  %v8846_v44 = vunpack.i.h.bf16 %v10849_v13  ;;  %v2525_v13 = vadd.f32 %v10719_v54, %v11054_v49  ;;  %v325_v49 = vld [vmem:[%s12713_s2 + $0x120] sm:$0xff] }
 0x262   :  { %8253 = vmatprep.subr.mxu1 %v2315_v18  ;;  %7939 = vmatprep.mubr.msk.f32.mxu0 %vm428_vm0, %v325_v49 }
 0x263   :  { %8254 = vmatpush3.msra.mxu1 %v2315_v18  ;;  %v11125_v24 = vpop.f32.mrf.mxu1  ;;  %7940 = vmatmul.mubr.msk.f32.gmra.mxu0 %vm428_vm0, %v326_v5 }
 0x264   :  { %8255 = vmatprep.subr.mxu1 %v2310_v61  ;;  %7942 = vmatprep.mubr.msk.f32.mxu0 %vm428_vm0, %v327_v8 }
 0x265   :  { %8256 = vmatpush3.msra.mxu1 %v2310_v61  ;;  %v11131_v20 = vpop.f32.mrf.mxu1 }
 0x266   :  { %8257 = vmatprep.subr.mxu1 %v2305_v26 }
 0x267   :  { %8258 = vmatpush3.msra.mxu1 %v2305_v26  ;;  %v11137_v18 = vpop.f32.mrf.mxu1 }
 0x268   :  { %8259 = vmatprep.subr.mxu1 %v2300_v25 }
 0x269   :  { %8260 = vmatpush3.msra.mxu1 %v2300_v25  ;;  %v11143_v40 = vpop.f32.mrf.mxu1  ;;  %v2515_v25 = vadd.f32 %v10719_v54, %v11026_v33  ;;  %v328_v33 = vld [vmem:[%s12713_s2 + $0x138] sm:$0xff] }
 0x26a   :  { %8262 = vmatmul.mubr.f32.vlgmr.msra.gmra.mxu1 %v8838_v55  ;;  %8267 = vmatprep.subr.mxu1 %v2455_v52  ;;  %v329_v55 = vld [vmem:[%s12713_s2 + $0x140] sm:$0xff] }
 0x26b   :  { %8268 = vmatpush3.msra.mxu1 %v2455_v52  ;;  %8264 = vmatprep.mubr.f32.mxu1 %v8843_v14  ;;  %v11152_v48 = vpop.f32.mrf.mxu1  ;;  %v2500_v14 = vadd.f32 %v10719_v54, %v11010_v6  ;;  %v2490_v6 = vadd.f32 %v10719_v54, %v10978_v63 }
 0x26c   :  { %8269 = vmatprep.subr.mxu1 %v2450_v34  ;;  %7943 = vmatmul.mubr.msk.f32.gmra.mxu0 %vm428_vm0, %v328_v33  ;;  %v343_v33 = vld [vmem:[%s12713_s2 + $0x1b0] sm:$0xff] }
 0x26d   :  { %8270 = vmatpush3.msra.mxu1 %v2450_v34  ;;  %v11157_v61 = vpop.f32.mrf.mxu1  ;;  %7945 = vmatprep.mubr.msk.f32.mxu0 %vm428_vm0, %v329_v55 }
 0x26e   :  { %8271 = vmatprep.subr.mxu1 %v2445_v28  ;;  %8265 = vmatmul.mubr.f32.gmra.mxu1 %v8848_v38  ;;  %v330_v38 = vld [vmem:[%s12713_s2 + $0x148] sm:$0xff] }
 0x26f   :  { %8272 = vmatpush3.msra.mxu1 %v2445_v28  ;;  %8299 = vmatprep.mubr.f32.mxu1 %v8836_v16  ;;  %v11173_v26 = vpop.f32.mrf.mxu1  ;;  %v2495_v16 = vadd.f32 %v10719_v54, %v10963_v23  ;;  %v333_v23 = vld [vmem:[%s12713_s2 + $0x160] sm:$0xff] }
 0x270   :  { %8273 = vmatprep.subr.mxu1 %v2440_v31  ;;  %7946 = vmatmul.mubr.msk.f32.gmra.mxu0 %vm428_vm0, %v330_v38 }
 0x271   :  { %8274 = vmatpush3.msra.mxu1 %v2440_v31  ;;  %v11187_v52 = vpop.f32.mrf.mxu1  ;;  %7948 = vmatprep.mubr.msk.f32.mxu0 %vm428_vm0, %v331_v57  ;;  %v332_v31 = vld [vmem:[%s12713_s2 + $0x158] sm:$0xff] }
 0x272   :  { %8275 = vmatprep.subr.mxu1 %v2435_v45 }
 0x273   :  { %8276 = vmatpush3.msra.mxu1 %v2435_v45  ;;  %v11204_v34 = vpop.f32.mrf.mxu1  ;;  %v11228_v45 = vld [vmem:[%s12717_s6] ss:$0 sm:$0xff] }
 0x274   :  { %8277 = vmatprep.subr.mxu1 %v2430_v11  ;;  %v2485_v54 = vadd.f32 %v11228_v45, %v10951_v39  ;;  %7949 = vmatmul.mubr.msk.f32.gmra.mxu0 %vm428_vm0, %v332_v31  ;;  %v2480_v63 = vadd.f32 %v11228_v45, %v10957_v10  ;;  %v335_v39 = vld [vmem:[%s12713_s2 + $0x170] sm:$0xff]  ;;  %v2475_v7 = vadd.f32 %v11228_v45, %v10939_v27  ;;  %v337_v27 = vld [vmem:[%s12713_s2 + $0x180] sm:$0xff] }
 0x275   :  { %8278 = vmatpush3.msra.mxu1 %v2430_v11  ;;  %v7873_v28 = vpop.f32.mrf.mxu1  ;;  %7951 = vmatprep.mubr.msk.f32.mxu0 %vm428_vm0, %v333_v23  ;;  %v2470_v10 = vadd.f32 %v11228_v45, %v10945_v12  ;;  %v2460_v12 = vadd.f32 %v11228_v45, %v10931_v21  ;;  %v2595_v49 = vadd.f32 %v11228_v45, %v11187_v52 }
 0x276   :  { %8279 = vmatprep.subr.mxu1 %v2425_v29  ;;  %v2590_v52 = vadd.f32 %v11228_v45, %v11204_v34  ;;  %v2580_v34 = vadd.f32 %v11228_v45, %v11173_v26  ;;  %v2575_v57 = vadd.f32 %v11228_v45, %v11143_v40  ;;  %v346_v26 = vld [vmem:[%s12713_s2 + $0x1c8] sm:$0xff]  ;;  %v347_v40 = vld [vmem:[%s12713_s2 + $0x1d0] sm:$0xff]  ;;  %v2560_v23 = vadd.f32 %v11228_v45, %v11137_v18 }
 0x277   :  { %8280 = vmatpush3.msra.mxu1 %v2425_v29  ;;  %v2599_v11 = vpop.f32.mrf.mxu1  ;;  %v350_v18 = vld [vmem:[%s12713_s2 + $0x1e8] sm:$0xff] }
 0x278   :  { %8281 = vmatprep.subr.mxu1 %v2420_v37  ;;  %7952 = vmatmul.mubr.msk.f32.gmra.mxu0 %vm428_vm0, %v334_v4  ;;  %v2550_v4 = vadd.f32 %v11228_v45, %v11125_v24  ;;  %v352_v24 = vld [vmem:[%s12713_s2 + $0x1f8] sm:$0xff] }
 0x279   :  { %8282 = vmatpush3.msra.mxu1 %v2420_v37  ;;  %v7876_v29 = vpop.f32.mrf.mxu1  ;;  %7954 = vmatprep.mubr.msk.f32.mxu0 %vm428_vm0, %v335_v39  ;;  %v336_v37 = vld [vmem:[%s12713_s2 + $0x178] sm:$0xff] }
 0x27a   :  { %8283 = vmatprep.subr.mxu1 %v2415_v1 }
 0x27b   :  { %8284 = vmatpush3.msra.mxu1 %v2415_v1  ;;  %v2465_v1 = vadd.f32 %v11228_v45, %v10922_v32  ;;  %v8895_v32 = vunpack.i.l.bf16 %v10995_v30 }
 0x27c   :  { %8285 = vmatprep.subr.mxu1 %v2410_v36  ;;  %7955 = vmatmul.mubr.msk.f32.gmra.mxu0 %vm428_vm0, %v336_v37  ;;  %v8893_v37 = vunpack.i.h.bf16 %v10935_v58 }
 0x27d   :  { %8286 = vmatpush3.msra.mxu1 %v2410_v36  ;;  %v2615_v36 = vadd.f32 %v11228_v45, %v7876_v29  ;;  %7957 = vmatprep.mubr.msk.f32.mxu0 %vm428_vm0, %v337_v27  ;;  %v2540_v29 = vadd.f32 %v11228_v45, %v11105_v15 }
 0x27e   :  { %8287 = vmatprep.subr.mxu1 %v2405_v42 }
 0x27f   :  { %8288 = vmatpush3.msra.mxu1 %v2405_v42  ;;  %v2609_v42 = vpop.f32.mrf.mxu1 }
 0x280   :  { %8289 = vmatprep.subr.mxu1 %v2400_v17  ;;  %v2610_v21 = vadd.f32 %v11228_v45, %v2609_v42 }
 0x281   :  { %8290 = vmatpush3.msra.mxu1 %v2400_v17  ;;  %v8890_v17 = vunpack.i.l.bf16 %v10935_v58  ;;  %v354_v58 = vld [vmem:[%s12713_s2 + $0x208] sm:$0xff] }
 0x282   :  { %8291 = vmatprep.subr.mxu1 %v2395_v62 }
 0x283   :  { %8292 = vmatpush3.msra.mxu1 %v2395_v62  ;;  %v338_v62 = vld [vmem:[%s12713_s2 + $0x188] sm:$0xff] }
 0x284   :  { %8293 = vmatprep.subr.mxu1 %v2390_v22  ;;  %7958 = vmatmul.mubr.msk.f32.gmra.mxu0 %vm428_vm0, %v338_v62 }
 0x285   :  { %8294 = vmatpush3.msra.mxu1 %v2390_v22 }
 0x286   :  { %8295 = vmatprep.subr.mxu1 %v2385_v43 }
 0x287   :  { %8296 = vmatpush3.msra.mxu1 %v2385_v43  ;;  %v339_v43 = vld [vmem:[%s12713_s2 + $0x190] sm:$0xff] }
 0x288   :  { %8297 = vmatprep.subr.mxu1 %v2380_v56  ;;  %7960 = vmatprep.mubr.msk.f32.mxu0 %vm428_vm0, %v339_v43 }
 0x289   :  { %8298 = vmatpush3.msra.mxu1 %v2380_v56 }
 0x28a   :  { %8300 = vmatmul.mubr.f32.vlgmr.msra.gmra.mxu1 %v8841_v35  ;;  %8305 = vmatprep.subr.mxu1 %v2535_v0  ;;  %v2605_v35 = vadd.f32 %v11228_v45, %v7873_v28  ;;  %v2565_v28 = vadd.f32 %v11228_v45, %v11131_v20  ;;  %v349_v20 = vld [vmem:[%s12713_s2 + $0x1e0] sm:$0xff] }
 0x28b   :  { %8306 = vmatpush3.msra.mxu1 %v2535_v0  ;;  %8302 = vmatprep.mubr.f32.mxu1 %v8846_v44 }
 0x28c   :  { %8307 = vmatprep.subr.mxu1 %v2530_v2 }
 0x28d   :  { %8308 = vmatpush3.msra.mxu1 %v2530_v2  ;;  %v8900_v2 = vunpack.i.l.bf16 %v11012_v51 }
 0x28e   :  { %8309 = vmatprep.subr.mxu1 %v2525_v13  ;;  %8303 = vmatmul.mubr.f32.gmra.mxu1 %v8851_v50  ;;  %v11273_v56 = vpop.f32.mrf.mxu0  ;;  %v340_v50 = vld [vmem:[%s12713_s2 + $0x198] sm:$0xff] }
 0x28f   :  { %8310 = vmatpush3.msra.mxu1 %v2525_v13  ;;  %8337 = vmatprep.mubr.f32.mxu1 %v8885_v46  ;;  %v2600_v13 = vadd.f32 %v11228_v45, %v2599_v11 }
 0x290   :  { %8311 = vmatprep.subr.mxu1 %v2520_v9  ;;  %7961 = vmatmul.mubr.msk.f32.gmra.mxu0 %vm428_vm0, %v340_v50 }
 0x291   :  { %8312 = vmatpush3.msra.mxu1 %v2520_v9  ;;  %v11291_v9 = vpop.f32.mrf.mxu0  ;;  %7963 = vmatprep.mubr.msk.f32.mxu0 %vm428_vm0, %v341_v59 }
 0x292   :  { %8313 = vmatprep.subr.mxu1 %v2515_v25 }
 0x293   :  { %8314 = vmatpush3.msra.mxu1 %v2515_v25  ;;  %v11308_v8 = vpop.f32.mrf.mxu0 }
 0x294   :  { %8315 = vmatprep.subr.mxu1 %v2510_v53 }
 0x295   :  { %8316 = vmatpush3.msra.mxu1 %v2510_v53  ;;  %v342_v53 = vld [vmem:[%s12713_s2 + $0x1a8] sm:$0xff]  ;;  %v11325_v38 = vpop.f32.mrf.mxu0 }
 0x296   :  { %8317 = vmatprep.subr.mxu1 %v2505_v3  ;;  %7964 = vmatmul.mubr.msk.f32.gmra.mxu0 %vm428_vm0, %v342_v53 }
 0x297   :  { %8318 = vmatpush3.msra.mxu1 %v2505_v3  ;;  %v2585_v3 = vadd.f32 %v11228_v45, %v11157_v61  ;;  %7966 = vmatprep.mubr.msk.f32.mxu0 %vm428_vm0, %v343_v33  ;;  %v345_v61 = vld [vmem:[%s12713_s2 + $0x1c0] sm:$0xff] }
 0x298   :  { %8319 = vmatprep.subr.mxu1 %v2500_v14  ;;  %v361_v33 = vld [vmem:[%s12713_s2 + $0x240] sm:$0xff] }
 0x299   :  { %8320 = vmatpush3.msra.mxu1 %v2500_v14  ;;  %v344_v14 = vld [vmem:[%s12713_s2 + $0x1b8] sm:$0xff] }
 0x29a   :  { %8321 = vmatprep.subr.mxu1 %v2495_v16  ;;  %7967 = vmatmul.mubr.msk.f32.gmra.mxu0 %vm428_vm0, %v344_v14 }
 0x29b   :  { %8322 = vmatpush3.msra.mxu1 %v2495_v16  ;;  %7969 = vmatprep.mubr.msk.f32.mxu0 %vm428_vm0, %v345_v61  ;;  %v2570_v16 = vadd.f32 %v11228_v45, %v11152_v48  ;;  %v348_v48 = vld [vmem:[%s12713_s2 + $0x1d8] sm:$0xff] }
 0x29c   :  { %8323 = vmatprep.subr.mxu1 %v2490_v6  ;;  %v364_v61 = vld [vmem:[%s12713_s2 + $0x258] sm:$0xff] }
 0x29d   :  { %8324 = vmatpush3.msra.mxu1 %v2490_v6  ;;  %v11339_v6 = vpop.f32.mrf.mxu0 }
 0x29e   :  { %8325 = vmatprep.subr.mxu1 %v2485_v54  ;;  %7970 = vmatmul.mubr.msk.f32.gmra.mxu0 %vm428_vm0, %v346_v26  ;;  %v365_v26 = vld [vmem:[%s12713_s2 + $0x260] sm:$0xff] }
 0x29f   :  { %8326 = vmatpush3.msra.mxu1 %v2485_v54  ;;  %v11346_v31 = vpop.f32.mrf.mxu0  ;;  %7972 = vmatprep.mubr.msk.f32.mxu0 %vm428_vm0, %v347_v40 }
 0x2a0   :  { %8327 = vmatprep.subr.mxu1 %v2480_v63 }
 0x2a1   :  { %8328 = vmatpush3.msra.mxu1 %v2480_v63  ;;  %v11355_v54 = vpop.f32.mrf.mxu0  ;;  %v2555_v63 = vadd.f32 %v11228_v45, %v11111_v19  ;;  %v351_v19 = vld [vmem:[%s12713_s2 + $0x1f0] sm:$0xff] }
 0x2a2   :  { %8329 = vmatprep.subr.mxu1 %v2475_v7  ;;  %7973 = vmatmul.mubr.msk.f32.gmra.mxu0 %vm428_vm0, %v348_v48  ;;  %v368_v48 = vld [vmem:[%s12713_s2 + $0x278] sm:$0xff] }
 0x2a3   :  { %8330 = vmatpush3.msra.mxu1 %v2475_v7  ;;  %v11362_v11 = vpop.f32.mrf.mxu0  ;;  %7975 = vmatprep.mubr.msk.f32.mxu0 %vm428_vm0, %v349_v20  ;;  %v2545_v7 = vadd.f32 %v11228_v45, %v11097_v60  ;;  %v8898_v60 = vunpack.i.h.bf16 %v10995_v30  ;;  %v8903_v45 = vunpack.i.h.bf16 %v11012_v51  ;;  %v369_v20 = vld [vmem:[%s12713_s2 + $0x280] sm:$0xff] }
 0x2a4   :  { %8331 = vmatprep.subr.mxu1 %v2470_v10 }
 0x2a5   :  { %8332 = vmatpush3.msra.mxu1 %v2470_v10  ;;  %v11371_v39 = vpop.f32.mrf.mxu0 }
 0x2a6   :  { %8333 = vmatprep.subr.mxu1 %v2465_v1  ;;  %7976 = vmatmul.mubr.msk.f32.gmra.mxu0 %vm428_vm0, %v350_v18 }
 0x2a7   :  { %8334 = vmatpush3.msra.mxu1 %v2465_v1  ;;  %v11378_v10 = vpop.f32.mrf.mxu0  ;;  %7978 = vmatprep.mubr.msk.f32.mxu0 %vm428_vm0, %v351_v19  ;;  %v353_v1 = vld [vmem:[%s12713_s2 + $0x200] sm:$0xff] }
 0x2a8   :  { %8335 = vmatprep.subr.mxu1 %v2460_v12 }
 0x2a9   :  { %8336 = vmatpush3.msra.mxu1 %v2460_v12  ;;  %v7902_v27 = vpop.f32.mrf.mxu0 }
 0x2aa   :  { %v11268_v22 = vpop.f32.mrf.mxu1  ;;  %8338 = vmatmul.mubr.f32.vlgmr.msra.gmra.mxu1 %v8890_v17  ;;  %8343 = vmatprep.subr.mxu1 %v2615_v36  ;;  %v11408_v17 = vld [vmem:[%s12719_s8] ss:$0 sm:$0xff] }
 0x2ab   :  { %v4657_v0 = vsel %vm428_vm0, %v11268_v22, -inf  ;;  %8344 = vmatpush3.msra.mxu1 %v2615_v36  ;;  %8340 = vmatprep.mubr.f32.mxu1 %v8895_v32  ;;  %v3129_v12 = vpop.f32.mrf.mxu0  ;;  %v355_v36 = vld [vmem:[%s12713_s2 + $0x210] sm:$0xff]  ;;  %v356_v32 = vld [vmem:[%s12713_s2 + $0x218] sm:$0xff]  ;;  %v3135_v14 = vadd.f32 %v7902_v27, %v11408_v17  ;;  %v3125_v40 = vadd.f32 %v11371_v39, %v11408_v17 }
 0x2ac   :  { %4658 = vmax.xlane.f32.xlu1 %v4657_v0  ;;  %v11278_v44 = vpop.f32.mrf.mxu1  ;;  %8345 = vmatprep.subr.mxu1 %v2610_v21  ;;  %v357_v0 = vld [vmem:[%s12713_s2 + $0x220] sm:$0xff]  ;;  %v371_v39 = vld [vmem:[%s12713_s2 + $0x290] sm:$0xff] }
 0x2ad   :  { %v4654_v46 = vsel %vm428_vm0, %v11278_v44, -inf  ;;  %8346 = vmatpush3.msra.mxu1 %v2610_v21  ;;  %7979 = vmatmul.mubr.msk.f32.gmra.mxu0 %vm428_vm0, %v352_v24  ;;  %v7905_v30 = vpop.f32.mrf.mxu0  ;;  %v373_v24 = vld [vmem:[%s12713_s2 + $0x2a0] sm:$0xff]  ;;  %v375_v27 = vld [vmem:[%s12713_s2 + $0x2b0] sm:$0xff] }
 0x2ae   :  { %4655 = vmax.xlane.f32.xlu0 %v4654_v46  ;;  %v11289_v41 = vpop.f32.mrf.mxu1  ;;  %8347 = vmatprep.subr.mxu1 %v2605_v35  ;;  %v358_v46 = vld [vmem:[%s12713_s2 + $0x228] sm:$0xff] }
 0x2af   :  { %8348 = vmatpush3.msra.mxu1 %v2605_v35  ;;  %v4663_v55 = vsel %vm428_vm0, %v11289_v41, -inf  ;;  %7981 = vmatprep.mubr.msk.f32.mxu0 %vm428_vm0, %v353_v1  ;;  %v3139_v62 = vpop.f32.mrf.mxu0  ;;  %v3100_v1 = vadd.f32 %v11408_v17, %v11346_v31  ;;  %v379_v31 = vld [vmem:[%s12713_s2 + $0x2d0] sm:$0xff] }
 0x2b0   :  { %v11296_v5 = vpop.f32.mrf.mxu1  ;;  %8349 = vmatprep.subr.mxu1 %v2600_v13  ;;  %8341 = vmatmul.mubr.f32.gmra.mxu1 %v8900_v2 }
 0x2b1   :  { %v4660_v25 = vsel %vm428_vm0, %v11296_v5, -inf  ;;  %8350 = vmatpush3.msra.mxu1 %v2600_v13  ;;  %8375 = vmatprep.mubr.f32.mxu1 %v8888_v47  ;;  %v7908_v21 = vpop.f32.mrf.mxu0  ;;  %v3145_v13 = vadd.f32 %v7905_v30, %v11408_v17  ;;  %v3090_v30 = vadd.f32 %v11408_v17, %v11325_v38  ;;  %v383_v38 = vld [vmem:[%s12713_s2 + $0x2f0] sm:$0xff] }
 0x2b2   :  { %4661 = vmax.xlane.f32.xlu0 %v4660_v25  ;;  %8351 = vmatprep.subr.mxu1 %v2595_v49  ;;  %v3155_v43 = vadd.f32 %v7908_v21, %v11408_v17  ;;  %v360_v25 = vld [vmem:[%s12713_s2 + $0x238] sm:$0xff] }
 0x2b3   :  { %8352 = vmatpush3.msra.mxu1 %v2595_v49  ;;  %7982 = vmatmul.mubr.msk.f32.gmra.mxu0 %vm428_vm0, %v354_v58  ;;  %v3149_v35 = vpop.f32.mrf.mxu0  ;;  %v359_v49 = vld [vmem:[%s12713_s2 + $0x230] sm:$0xff]  ;;  %v3095_v58 = vadd.f32 %v11308_v8, %v11408_v17  ;;  %v381_v8 = vld [vmem:[%s12713_s2 + $0x2e0] sm:$0xff] }
 0x2b4   :  { %8353 = vmatprep.subr.mxu1 %v2590_v52  ;;  %7984 = vmatprep.mubr.msk.f32.mxu0 %vm428_vm0, %v355_v36  ;;  %v3150_v50 = vadd.f32 %v11408_v17, %v3149_v35  ;;  %v382_v36 = vld [vmem:[%s12713_s2 + $0x2e8] sm:$0xff] }
 0x2b5   :  { %8354 = vmatpush3.msra.mxu1 %v2590_v52  ;;  %8381 = vmatprep.subr.msk.mxu0 %vm428_vm0, %v3155_v43  ;;  %v3140_v52 = vadd.f32 %v11408_v17, %v3139_v62  ;;  %v3085_v62 = vadd.f32 %v11273_v56, %v11408_v17  ;;  %v3080_v56 = vadd.f32 %v11408_v17, %v11291_v9 }
 0x2b6   :  { %4664 = vmax.xlane.f32.xlu0 %v4663_v55  ;;  %8355 = vmatprep.subr.mxu1 %v2585_v3 }
 0x2b7   :  { %8356 = vmatpush3.msra.mxu1 %v2585_v3  ;;  %7985 = vmatmul.mubr.msk.f32.gmra.mxu0 %vm428_vm0, %v356_v32  ;;  %v362_v3 = vld [vmem:[%s12713_s2 + $0x248] sm:$0xff]  ;;  %v384_v32 = vld [vmem:[%s12713_s2 + $0x2f8] sm:$0xff] }
 0x2b8   :  { %8357 = vmatprep.subr.mxu1 %v2580_v34  ;;  %7987 = vmatprep.mubr.msk.f32.mxu0 %vm428_vm0, %v357_v0 }
 0x2b9   :  { %8358 = vmatpush3.msra.mxu1 %v2580_v34  ;;  %8382 = vmatpush3.xpose.msk.msra.mxu0 %vm428_vm0, %v3155_v43  ;;  %v363_v34 = vld [vmem:[%s12713_s2 + $0x250] sm:$0xff] }
 0x2ba   :  { %8359 = vmatprep.subr.mxu1 %v2575_v57  ;;  %8383 = vmatprep.subr.msk.mxu0 %vm428_vm0, %v3150_v50 }
 0x2bb   :  { %8360 = vmatpush3.msra.mxu1 %v2575_v57  ;;  %7988 = vmatmul.mubr.msk.f32.gmra.mxu0 %vm428_vm0, %v358_v46  ;;  %v3130_v57 = vadd.f32 %v11408_v17, %v3129_v12  ;;  %v378_v12 = vld [vmem:[%s12713_s2 + $0x2c8] sm:$0xff] }
 0x2bc   :  { %8361 = vmatprep.subr.mxu1 %v2570_v16  ;;  %7990 = vmatprep.mubr.msk.f32.mxu0 %vm428_vm0, %v359_v49 }
 0x2bd   :  { %8362 = vmatpush3.msra.mxu1 %v2570_v16  ;;  %8384 = vmatpush3.xpose.msk.msra.mxu0 %vm428_vm0, %v3150_v50  ;;  %v366_v16 = vld [vmem:[%s12713_s2 + $0x268] sm:$0xff] }
 0x2be   :  { %8363 = vmatprep.subr.mxu1 %v2565_v28  ;;  %8385 = vmatprep.subr.msk.mxu0 %vm428_vm0, %v3145_v13 }
 0x2bf   :  { %8364 = vmatpush3.msra.mxu1 %v2565_v28  ;;  %7991 = vmatmul.mubr.msk.f32.gmra.mxu0 %vm428_vm0, %v360_v25  ;;  %v367_v28 = vld [vmem:[%s12713_s2 + $0x270] sm:$0xff] }
 0x2c0   :  { %8365 = vmatprep.subr.mxu1 %v2560_v23  ;;  %7993 = vmatprep.mubr.msk.f32.mxu0 %vm428_vm0, %v361_v33 }
 0x2c1   :  { %8366 = vmatpush3.msra.mxu1 %v2560_v23  ;;  %8386 = vmatpush3.xpose.msk.msra.mxu0 %vm428_vm0, %v3145_v13  ;;  %v3120_v23 = vadd.f32 %v11408_v17, %v11378_v10  ;;  %v372_v10 = vld [vmem:[%s12713_s2 + $0x298] sm:$0xff] }
 0x2c2   :  { %8367 = vmatprep.subr.mxu1 %v2555_v63  ;;  %8387 = vmatprep.subr.msk.mxu0 %vm428_vm0, %v3140_v52 }
 0x2c3   :  { %8368 = vmatpush3.msra.mxu1 %v2555_v63  ;;  %7994 = vmatmul.mubr.msk.f32.gmra.mxu0 %vm428_vm0, %v362_v3  ;;  %v370_v63 = vld [vmem:[%s12713_s2 + $0x288] sm:$0xff] }
 0x2c4   :  { %8369 = vmatprep.subr.mxu1 %v2550_v4  ;;  %7996 = vmatprep.mubr.msk.f32.mxu0 %vm428_vm0, %v363_v34 }
 0x2c5   :  { %8370 = vmatpush3.msra.mxu1 %v2550_v4  ;;  %8388 = vmatpush3.xpose.msk.msra.mxu0 %vm428_vm0, %v3140_v52  ;;  %v3115_v4 = vadd.f32 %v11355_v54, %v11408_v17  ;;  %v3110_v54 = vadd.f32 %v11408_v17, %v11362_v11  ;;  %v3105_v11 = vadd.f32 %v11339_v6, %v11408_v17  ;;  %v377_v6 = vld [vmem:[%s12713_s2 + $0x2c0] sm:$0xff] }
 0x2c6   :  { %8371 = vmatprep.subr.mxu1 %v2545_v7  ;;  %8389 = vmatprep.subr.msk.mxu0 %vm428_vm0, %v3135_v14 }
 0x2c7   :  { %8372 = vmatpush3.msra.mxu1 %v2545_v7  ;;  %7997 = vmatmul.mubr.msk.f32.gmra.mxu0 %vm428_vm0, %v364_v61 }
 0x2c8   :  { %8373 = vmatprep.subr.mxu1 %v2540_v29  ;;  %7999 = vmatprep.mubr.msk.f32.mxu0 %vm428_vm0, %v365_v26 }
 0x2c9   :  { %8374 = vmatpush3.msra.mxu1 %v2540_v29  ;;  %8390 = vmatpush3.xpose.msk.msra.mxu0 %vm428_vm0, %v3135_v14 }
 0x2ca   :  { %v11397_v15 = vpop.f32.mrf.mxu1  ;;  %8376 = vmatmul.mubr.f32.vlgmr.msra.gmra.mxu1 %v8893_v37  ;;  %8391 = vmatprep.subr.msk.mxu0 %vm428_vm0, %v3130_v57  ;;  %v374_v37 = vld [vmem:[%s12713_s2 + $0x2a8] sm:$0xff] }
 0x2cb   :  { %8378 = vmatprep.mubr.f32.mxu1 %v8898_v60  ;;  %v4669_v2 = vsel %vm428_vm0, %v11397_v15, -inf  ;;  %8000 = vmatmul.mubr.msk.f32.gmra.mxu0 %vm428_vm0, %v366_v16  ;;  %v376_v60 = vld [vmem:[%s12713_s2 + $0x2b8] sm:$0xff] }
 0x2cc   :  { %v11403_v42 = vpop.f32.mrf.mxu1  ;;  %8002 = vmatprep.mubr.msk.f32.mxu0 %vm428_vm0, %v367_v28  ;;  %v386_v28 = vld [vmem:[%s12713_s2 + $0x308] sm:$0xff] }
 0x2cd   :  { %v4666_v51 = vsel %vm428_vm0, %v11403_v42, -inf  ;;  %8392 = vmatpush3.xpose.msk.msra.mxu0 %vm428_vm0, %v3130_v57  ;;  %v385_v57 = vld [vmem:[%s12713_s2 + $0x300] sm:$0xff] }
 0x2ce   :  { %4667 = vmax.xlane.f32.xlu1 %v4666_v51  ;;  %8379 = vmatmul.mubr.f32.gmra.mxu1 %v8903_v45  ;;  %v11430_v47 = vpop.f32.mrf.mxu1  ;;  %v380_v45 = vld [vmem:[%s12713_s2 + $0x2d8] sm:$0xff] }
 0x2cf   :  { %v4675_v59 = vsel %vm428_vm0, %v11430_v47, -inf  ;;  %8393 = vmatprep.subr.msk.mxu0 %vm428_vm0, %v3125_v40  ;;  %8003 = vmatmul.mubr.msk.f32.gmra.mxu0 %vm428_vm0, %v368_v48  ;;  %v387_v48 = vld [vmem:[%s12713_s2 + $0x310] sm:$0xff] }
 0x2d0   :  { %v11445_v53 = vpop.f32.mrf.mxu1  ;;  %8005 = vmatprep.mubr.msk.f32.mxu0 %vm428_vm0, %v369_v20  ;;  %v388_v20 = vld [vmem:[%s12713_s2 + $0x318] sm:$0xff] }
 0x2d1   :  { %v4672_v55 = vsel %vm428_vm0, %v11445_v53, -inf  ;;  %8394 = vmatpush3.xpose.msk.msra.mxu0 %vm428_vm0, %v3125_v40 }
 0x2d2   :  { %4670 = vmax.xlane.f32.xlu1 %v4669_v2  ;;  %8395 = vmatprep.subr.msk.mxu0 %vm428_vm0, %v3120_v23 }
 0x2d3   :  { %8006 = vmatmul.mubr.msk.f32.gmra.mxu0 %vm428_vm0, %v370_v63  ;;  %v389_v63 = vld [vmem:[%s12713_s2 + $0x320] sm:$0xff] }
 0x2d4   :  { %8008 = vmatprep.mubr.msk.f32.mxu0 %vm428_vm0, %v371_v39  ;;  %v390_v39 = vld [vmem:[%s12713_s2 + $0x328] sm:$0xff] }
 0x2d5   :  { %8396 = vmatpush3.xpose.msk.msra.mxu0 %vm428_vm0, %v3120_v23 }
 0x2d6   :  { %4676 = vmax.xlane.f32.xlu1 %v4675_v59  ;;  %8397 = vmatprep.subr.msk.mxu0 %vm428_vm0, %v3115_v4 }
 0x2d7   :  { %8009 = vmatmul.mubr.msk.f32.gmra.mxu0 %vm428_vm0, %v372_v10 }
 0x2d8   :  { %8011 = vmatprep.mubr.msk.f32.mxu0 %vm428_vm0, %v373_v24  ;;  %v393_v24 = vld [vmem:[%s12713_s2 + $0x340] sm:$0xff] }
 0x2d9   :  { %8398 = vmatpush3.xpose.msk.msra.mxu0 %vm428_vm0, %v3115_v4 }
 0x2da   :  { %4673 = vmax.xlane.f32.xlu1 %v4672_v55  ;;  %8399 = vmatprep.subr.msk.mxu0 %vm428_vm0, %v3110_v54 }
 0x2db   :  { %8012 = vmatmul.mubr.msk.f32.gmra.mxu0 %vm428_vm0, %v374_v37 }
 0x2dc   :  { %8014 = vmatprep.mubr.msk.f32.mxu0 %vm428_vm0, %v375_v27 }
 0x2dd   :  { %8400 = vmatpush3.xpose.msk.msra.mxu0 %vm428_vm0, %v3110_v54  ;;  %v392_v54 = vld [vmem:[%s12713_s2 + $0x338] sm:$0xff] }
 0x2de   :  { %8401 = vmatprep.subr.msk.mxu0 %vm428_vm0, %v3105_v11 }
 0x2df   :  { %8015 = vmatmul.mubr.msk.f32.gmra.mxu0 %vm428_vm0, %v376_v60  ;;  %v394_v60 = vld [vmem:[%s12713_s2 + $0x348] sm:$0xff] }
 0x2e0   :  { %8017 = vmatprep.mubr.msk.f32.mxu0 %vm428_vm0, %v377_v6 }
 0x2e1   :  { %8402 = vmatpush3.xpose.msk.msra.mxu0 %vm428_vm0, %v3105_v11 }
 0x2e2   :  { %8403 = vmatprep.subr.msk.mxu0 %vm428_vm0, %v3100_v1 }
 0x2e3   :  { %8018 = vmatmul.mubr.msk.f32.gmra.mxu0 %vm428_vm0, %v378_v12 }
 0x2e4   :  { %8020 = vmatprep.mubr.msk.f32.mxu0 %vm428_vm0, %v379_v31 }
 0x2e5   :  { %8404 = vmatpush3.xpose.msk.msra.mxu0 %vm428_vm0, %v3100_v1  ;;  %v395_v1 = vld [vmem:[%s12713_s2 + $0x350] sm:$0xff] }
 0x2e6   :  { %8405 = vmatprep.subr.msk.mxu0 %vm428_vm0, %v3095_v58 }
 0x2e7   :  { %8021 = vmatmul.mubr.msk.f32.gmra.mxu0 %vm428_vm0, %v380_v45  ;;  %v396_v45 = vld [vmem:[%s12713_s2 + $0x358] sm:$0xff] }
 0x2e8   :  { %8023 = vmatprep.mubr.msk.f32.mxu0 %vm428_vm0, %v381_v8  ;;  %v398_v8 = vld [vmem:[%s12713_s2 + $0x368] sm:$0xff] }
 0x2e9   :  { %8406 = vmatpush3.xpose.msk.msra.mxu0 %vm428_vm0, %v3095_v58 }
 0x2ea   :  { %v11506_v18 = vpop.f32.mrf.mxu1  ;;  %8407 = vmatprep.subr.msk.mxu0 %vm428_vm0, %v3090_v30 }
 0x2eb   :  { %v4681_v29 = vsel %vm428_vm0, %v11506_v18, -inf  ;;  %8024 = vmatmul.mubr.msk.f32.gmra.mxu0 %vm428_vm0, %v382_v36  ;;  %v399_v36 = vld [vmem:[%s12713_s2 + $0x370] sm:$0xff] }
 0x2ec   :  { %v11515_v19 = vpop.f32.mrf.mxu1  ;;  %8026 = vmatprep.mubr.msk.f32.mxu0 %vm428_vm0, %v383_v38  ;;  %v400_v38 = vld [vmem:[%s12713_s2 + $0x378] sm:$0xff] }
 0x2ed   :  { %v4678_v7 = vsel %vm428_vm0, %v11515_v19, -inf  ;;  %8408 = vmatpush3.xpose.msk.msra.mxu0 %vm428_vm0, %v3090_v30 }
 0x2ee   :  { %4679 = vmax.xlane.f32.xlu0 %v4678_v7  ;;  %v11593_v51 = vpop.f32.mrf.mxu1  ;;  %8409 = vmatprep.subr.msk.mxu0 %vm428_vm0, %v3085_v62  ;;  %v391_v7 = vld [vmem:[%s12713_s2 + $0x330] sm:$0xff] }
 0x2ef   :  { %8027 = vmatmul.mubr.msk.f32.gmra.mxu0 %vm428_vm0, %v384_v32  ;;  %v401_v32 = vld [vmem:[%s12713_s2 + $0x380] sm:$0xff] }
 0x2f0   :  { %v11606_v43 = vpop.f32.mrf.mxu1  ;;  %8029 = vmatprep.mubr.msk.f32.mxu0 %vm428_vm0, %v385_v57  ;;  %v405_v57 = vld [vmem:[%s12713_s2 + $0x3a0] sm:$0xff] }
 0x2f1   :  { %v11601_v21 = vpop.f32.mrf.mxu0  ;;  %8410 = vmatpush3.xpose.msk.msra.mxu0 %vm428_vm0, %v3085_v62 }
 0x2f2   :  { %4682 = vmax.xlane.f32.xlu0 %v4681_v29  ;;  %8411 = vmatprep.subr.msk.mxu0 %vm428_vm0, %v3080_v56 }
 0x2f3   :  { %v11609_v0 = vpop.f32.mrf.mxu0  ;;  %8030 = vmatmul.mubr.msk.f32.gmra.mxu0 %vm428_vm0, %v386_v28  ;;  %v406_v28 = vld [vmem:[%s12713_s2 + $0x3a8] sm:$0xff] }
 0x2f4   :  { %8032 = vmatprep.mubr.msk.f32.mxu0 %vm428_vm0, %v387_v48 }
 0x2f5   :  { %8412 = vmatpush3.xpose.msk.msra.mxu0 %vm428_vm0, %v3080_v56 }
 0x2f7   :  { %v11617_v50 = vpop.f32.mrf.mxu0  ;;  %8033 = vmatmul.mubr.msk.f32.gmra.mxu0 %vm428_vm0, %v388_v20 }
 0x2f8   :  { %8035 = vmatprep.mubr.msk.f32.mxu0 %vm428_vm0, %v389_v63 }
 0x2f9   :  { %v11622_v46 = vpop.f32.mrf.mxu0 }
 0x2fb   :  { %8036 = vmatmul.mubr.msk.f32.gmra.mxu0 %vm428_vm0, %v390_v39  ;;  %v3175_v39 = vadd.f32 %v11617_v50, %v11408_v17  ;;  %v3170_v50 = vadd.f32 %v11408_v17, %v11622_v46 }
 0x2fc   :  { %v11624_v13 = vpop.f32.mrf.mxu0  ;;  %8038 = vmatprep.mubr.msk.f32.mxu0 %vm428_vm0, %v391_v7  ;;  %v408_v7 = vld [vmem:[%s12713_s2 + $0x3b8] sm:$0xff] }
 0x2fe   :  { %v11628_v59 = vpop.f32.mrf.mxu0 }
 0x2ff   :  { %8039 = vmatmul.mubr.msk.f32.gmra.mxu0 %vm428_vm0, %v392_v54  ;;  %v4684_v54 = vsel %vm428_vm0, %v11606_v43, -inf }
 0x300   :  { %v11630_v25 = vpop.f32.mrf.mxu0  ;;  %8041 = vmatprep.mubr.msk.f32.mxu0 %vm428_vm0, %v393_v24 }
 0x301   :  { %v3195_v62 = vadd.f32 %v11630_v25, %v11408_v17 }
 0x302   :  { %v11632_v52 = vpop.f32.mrf.mxu0 }
 0x303   :  { %8042 = vmatmul.mubr.msk.f32.gmra.mxu0 %vm428_vm0, %v394_v60  ;;  %v4687_v60 = vsel %vm428_vm0, %v11593_v51, -inf }
 0x304   :  { %8044 = vmatprep.mubr.msk.f32.mxu0 %vm428_vm0, %v395_v1 }
 0x305   :  { %v7923_v33 = vpop.f32.mrf.mxu0 }
 0x306   :  { %v3205_v58 = vadd.f32 %v7923_v33, %v11408_v17  ;;  %v403_v33 = vld [vmem:[%s12713_s2 + $0x390] sm:$0xff] }
 0x307   :  { %v3199_v55 = vpop.f32.mrf.mxu0  ;;  %8045 = vmatmul.mubr.msk.f32.gmra.mxu0 %vm428_vm0, %v396_v45 }
 0x308   :  { %v3200_v30 = vadd.f32 %v11408_v17, %v3199_v55 }
 0x30a   :  { %v11611_v35 = vpop.f32.mrf.mxu1 }
 0x30b   :  { %v4693_v49 = vsel %vm428_vm0, %v11611_v35, -inf }
 0x30c   :  { %v11615_v2 = vpop.f32.mrf.mxu1  ;;  %v7926_v3 = vpop.f32.mrf.mxu0 }
 0x30d   :  { %v4690_v9 = vsel %vm428_vm0, %v11615_v2, -inf  ;;  %v3215_v29 = vadd.f32 %v7926_v3, %v11408_v17 }
 0x30e   :  { %4691 = vmax.xlane.f32.xlu1 %v4690_v9  ;;  %v3209_v14 = vpop.f32.mrf.mxu0  ;;  %v3190_v9 = vadd.f32 %v11408_v17, %v11632_v52  ;;  %v3185_v52 = vadd.f32 %v11624_v13, %v11408_v17 }
 0x30f   :  { %v3210_v6 = vadd.f32 %v11408_v17, %v3209_v14  ;;  %v404_v14 = vld [vmem:[%s12713_s2 + $0x398] sm:$0xff] }
 0x311   :  { %v7929_v34 = vpop.f32.mrf.mxu0 }
 0x312   :  { %4694 = vmax.xlane.f32.xlu1 %v4693_v49  ;;  %v3225_v4 = vadd.f32 %v7929_v34, %v11408_v17  ;;  %v402_v49 = vld [vmem:[%s12713_s2 + $0x388] sm:$0xff] }
 0x313   :  { %v3219_v61 = vpop.f32.mrf.mxu0 }
 0x314   :  { %v3220_v10 = vadd.f32 %v11408_v17, %v3219_v61 }
 0x315   :  { %v7932_v26 = vpop.f32.mrf.mxu0 }
 0x316   :  { %v3235_v16 = vadd.f32 %v7932_v26, %v11408_v17 }
 0x317   :  { %v3229_v40 = vpop.f32.mrf.mxu0 }
 0x318   :  { %v3230_v23 = vadd.f32 %v11408_v17, %v3229_v40  ;;  %8419 = vmatprep.subr.msk.mxu1 %vm428_vm0, %v3235_v16 }
 0x319   :  { %8420 = vmatpush3.xpose.msk.msra.mxu1 %vm428_vm0, %v3235_v16  ;;  %v11736_v25 = vpop.f32.mrf.mxu0  ;;  %v11762_v16 = vpop.f32.mrf.mxu1 }
 0x31a   :  { %8421 = vmatprep.subr.msk.mxu1 %vm428_vm0, %v3230_v23 }
 0x31b   :  { %v11748_v3 = vpop.f32.mrf.mxu0 }
 0x31d   :  { %8422 = vmatpush3.xpose.msk.msra.mxu1 %vm428_vm0, %v3230_v23  ;;  %v11768_v40 = vpop.f32.mrf.mxu0 }
 0x31e   :  { %8423 = vmatprep.subr.msk.mxu1 %vm428_vm0, %v3225_v4 }
 0x31f   :  { %v11781_v63 = vpop.f32.mrf.mxu0 }
 0x321   :  { %8424 = vmatpush3.xpose.msk.msra.mxu1 %vm428_vm0, %v3225_v4  ;;  %v11783_v4 = vpop.f32.mrf.mxu1 }
 0x322   :  { %8425 = vmatprep.subr.msk.mxu1 %vm428_vm0, %v3220_v10 }
 0x325   :  { %8426 = vmatpush3.xpose.msk.msra.mxu1 %vm428_vm0, %v3220_v10 }
 0x326   :  { %8427 = vmatprep.subr.msk.mxu1 %vm428_vm0, %v3215_v29 }
 0x329   :  { %8428 = vmatpush3.xpose.msk.msra.mxu1 %vm428_vm0, %v3215_v29 }
 0x32a   :  { %8429 = vmatprep.subr.msk.mxu1 %vm428_vm0, %v3210_v6  ;;  %v11798_v24 = vpop.f32.mrf.mxu1 }
 0x32c   :  { %v11817_v1 = vpop.f32.mrf.mxu1 }
 0x32d   :  { %8430 = vmatpush3.xpose.msk.msra.mxu1 %vm428_vm0, %v3210_v6 }
 0x32e   :  { %8431 = vmatprep.subr.msk.mxu1 %vm428_vm0, %v3205_v58 }
 0x331   :  { %8432 = vmatpush3.xpose.msk.msra.mxu1 %vm428_vm0, %v3205_v58  ;;  %v4702_v58 = vsel %vm428_vm0, %v11817_v1, -inf }
 0x332   :  { %8433 = vmatprep.subr.msk.mxu1 %vm428_vm0, %v3200_v30 }
 0x335   :  { %v4659_v37 = vpop.xlane.xlu1 %4658  ;;  %8434 = vmatpush3.xpose.msk.msra.mxu1 %vm428_vm0, %v3200_v30 }
 0x336   :  { %v4751_v11 = vsub.f32 %v11268_v22, %v4659_v37  ;;  %8435 = vmatprep.subr.msk.mxu1 %vm428_vm0, %v3195_v62 }
 0x337   :  { %v4656_v27 = vpop.xlane.xlu0 %4655 }
 0x338   :  { %v4750_v12 = vsub.f32 %v11278_v44, %v4656_v27  ;;  %v4784_v22 = vmul.f32 1.442695, %v4751_v11  ;;  %v397_v44 = vld [vmem:[%s12713_s2 + $0x360] sm:$0xff]  ;;  %v410_v27 = vld [vmem:[%s12713_s2 + $0x3c8] sm:$0xff] }
 0x339   :  { %8047 = vmatprep.mubr.msk.f32.mxu0 %vm428_vm0, %v397_v44  ;;  %8436 = vmatpush3.xpose.msk.msra.mxu1 %vm428_vm0, %v3195_v62  ;;  %v409_v11 = vld [vmem:[%s12713_s2 + $0x3c0] sm:$0xff]  ;;  %v411_v44 = vld [vmem:[%s12713_s2 + $0x3d0] sm:$0xff] }
 0x33a   :  { %v4782_v31 = vmul.f32 1.442695, %v4750_v12  ;;  %8048 = vmatmul.mubr.msk.f32.gmra.mxu0 %vm428_vm0, %v398_v8  ;;  %8437 = vmatprep.subr.msk.mxu1 %vm428_vm0, %v3190_v9  ;;  %v412_v8 = vld [vmem:[%s12713_s2 + $0x3d8] sm:$0xff] }
 0x33b   :  { %8050 = vmatprep.mubr.msk.f32.mxu0 %vm428_vm0, %v399_v36  ;;  %v4662_v56 = vpop.xlane.xlu0 %4661  ;;  %v3160_v36 = vadd.f32 %v11408_v17, %v11609_v0  ;;  %v414_v0 = vld [vmem:[%s12713_s2 + $0x3e8] sm:$0xff] }
 0x33c   :  { %8904 = vpow2.f32 %v4782_v31  ;;  %v4752_v34 = vsub.f32 %v11296_v5, %v4662_v56  ;;  %v3180_v5 = vadd.f32 %v11408_v17, %v11628_v59  ;;  %v407_v59 = vld [vmem:[%s12713_s2 + $0x3b0] sm:$0xff]  ;;  %v413_v56 = vld [vmem:[%s12713_s2 + $0x3e0] sm:$0xff] }
 0x33d   :  { %8906 = vpow2.f32 %v4784_v22  ;;  %8438 = vmatpush3.xpose.msk.msra.mxu1 %vm428_vm0, %v3190_v9  ;;  %v3165_v22 = vadd.f32 %v11601_v21, %v11408_v17 }
 0x33e   :  { %8051 = vmatmul.mubr.msk.f32.gmra.mxu0 %vm428_vm0, %v400_v38  ;;  %8439 = vmatprep.subr.msk.mxu1 %vm428_vm0, %v3185_v52  ;;  %v4786_v48 = vmul.f32 1.442695, %v4752_v34 }
 0x33f   :  { %8053 = vmatprep.mubr.msk.f32.mxu0 %vm428_vm0, %v401_v32  ;;  %v4665_v26 = vpop.xlane.xlu0 %4664  ;;  %v4705_v32 = vsel %vm428_vm0, %v11798_v24, -inf }
 0x340   :  { %v4753_v23 = vsub.f32 %v11289_v41, %v4665_v26  ;;  %v11789_v41 = vpop.f32.mrf.mxu0  ;;  %8908 = vpow2.f32 %v4786_v48 }
 0x341   :  { %8440 = vmatpush3.xpose.msk.msra.mxu1 %vm428_vm0, %v3185_v52  ;;  %v415_v52 = vld [vmem:[%s12713_s2 + $0x3f0] sm:$0xff] }
 0x342   :  { %8054 = vmatmul.mubr.msk.f32.gmra.mxu0 %vm428_vm0, %v402_v49  ;;  %8441 = vmatprep.subr.msk.mxu1 %vm428_vm0, %v3180_v5  ;;  %v4788_v10 = vmul.f32 1.442695, %v4753_v23  ;;  %v11800_v29 = vpop.f32.mrf.mxu0 }
 0x343   :  { %8056 = vmatprep.mubr.msk.f32.mxu0 %vm428_vm0, %v403_v33 }
 0x344   :  { %v11806_v37 = vpop.f32.mrf.mxu0  ;;  %8910 = vpow2.f32 %v4788_v10  ;;  %v11898_v10 = vpop.f32.mrf.mxu1 }
 0x345   :  { %8442 = vmatpush3.xpose.msk.msra.mxu1 %vm428_vm0, %v3180_v5 }
 0x346   :  { %8057 = vmatmul.mubr.msk.f32.gmra.mxu0 %vm428_vm0, %v404_v14  ;;  %8443 = vmatprep.subr.msk.mxu1 %vm428_vm0, %v3175_v39  ;;  %v11820_v6 = vpop.f32.mrf.mxu0 }
 0x347   :  { %8059 = vmatprep.mubr.msk.f32.mxu0 %vm428_vm0, %v405_v57 }
 0x348   :  { %v11829_v31 = vpop.f32.mrf.mxu0 }
 0x349   :  { %v11743_v55 = vpop.eup %8904  ;;  %8444 = vmatpush3.xpose.msk.msra.mxu1 %vm428_vm0, %v3175_v39 }
 0x34a   :  { %v4846_v61 = vsel %vm428_vm0, %v11743_v55, 0.0  ;;  %v11760_v13 = vpop.eup %8906  ;;  %8060 = vmatmul.mubr.msk.f32.gmra.mxu0 %vm428_vm0, %v406_v28  ;;  %8445 = vmatprep.subr.msk.mxu1 %vm428_vm0, %v3170_v50  ;;  %v11836_v30 = vpop.f32.mrf.mxu0 }
 0x34b   :  { %4847 = vadd.xlane.f32.xlu0 %v4846_v61  ;;  %v4849_v20 = vsel %vm428_vm0, %v11760_v13, 0.0  ;;  %8062 = vmatprep.mubr.msk.f32.mxu0 %vm428_vm0, %v407_v59  ;;  %v416_v61 = vld [vmem:[%s12713_s2 + $0x3f8] sm:$0xff] }
 0x34c   :  { %v11846_v62 = vpop.f32.mrf.mxu0 }
 0x34d   :  { %8446 = vmatpush3.xpose.msk.msra.mxu1 %vm428_vm0, %v3170_v50 }
 0x34e   :  { %8063 = vmatmul.mubr.msk.f32.gmra.mxu0 %vm428_vm0, %v408_v7  ;;  %8447 = vmatprep.subr.msk.mxu1 %vm428_vm0, %v3165_v22  ;;  %v11857_v9 = vpop.f32.mrf.mxu0 }
 0x34f   :  { %4850 = vadd.xlane.f32.xlu0 %v4849_v20  ;;  %8065 = vmatprep.mubr.msk.f32.mxu0 %vm428_vm0, %v409_v11 }
 0x350   :  { %v11864_v49 = vpop.f32.mrf.mxu0 }
 0x351   :  { %8448 = vmatpush3.xpose.msk.msra.mxu1 %vm428_vm0, %v3165_v22  ;;  %v4696_v22 = vsel %vm428_vm0, %v11783_v4, -inf }
 0x352   :  { %8066 = vmatmul.mubr.msk.f32.gmra.mxu0 %vm428_vm0, %v410_v27  ;;  %8449 = vmatprep.subr.msk.mxu1 %vm428_vm0, %v3160_v36  ;;  %v11875_v34 = vpop.f32.mrf.mxu0 }
 0x353   :  { %4685 = vmax.xlane.f32.xlu0 %v4684_v54  ;;  %8068 = vmatprep.mubr.msk.f32.mxu0 %vm428_vm0, %v411_v44 }
 0x354   :  { %v7956_v26 = vpop.f32.mrf.mxu0 }
 0x355   :  { %8450 = vmatpush3.xpose.msk.msra.mxu1 %vm428_vm0, %v3160_v36  ;;  %v11885_v28 = vadd.f32 %v7956_v26, %v11408_v17 }
 0x356   :  { %8069 = vmatmul.mubr.msk.f32.gmra.mxu0 %vm428_vm0, %v412_v8  ;;  %v11887_v48 = vpop.f32.mrf.mxu0 }
 0x357   :  { %v4668_v46 = vpop.xlane.xlu1 %4667  ;;  %4688 = vmax.xlane.f32.xlu0 %v4687_v60  ;;  %8071 = vmatprep.mubr.msk.f32.mxu0 %vm428_vm0, %v413_v56 }
 0x358   :  { %v4754_v12 = vsub.f32 %v11403_v42, %v4668_v46  ;;  %8457 = vmatprep.subr.msk.mxu0 %vm428_vm0, %v11885_v28  ;;  %v11893_v20 = vpop.f32.mrf.mxu0  ;;  %v11907_v46 = vpop.f32.mrf.mxu1 }
 0x359   :  { %12799 = vst [vmem:[#allocation7_spill] sm:$0xff] %v11893_v20 }
 0x35a   :  { %v4790_v45 = vmul.f32 1.442695, %v4754_v12  ;;  %8072 = vmatmul.mubr.msk.f32.gmra.mxu0 %vm428_vm0, %v414_v0  ;;  %v11900_v54 = vpop.f32.mrf.mxu0 }
 0x35b   :  { %v4671_v42 = vpop.xlane.xlu1 %4670  ;;  %4703 = vmax.xlane.f32.xlu0 %v4702_v58  ;;  %8074 = vmatprep.mubr.msk.f32.mxu0 %vm428_vm0, %v415_v52  ;;  %12800 = vst [vmem:[#allocation8_spill] sm:$0xff] %v11900_v54 }
 0x35c   :  { %8912 = vpow2.f32 %v4790_v45  ;;  %v4755_v21 = vsub.f32 %v11397_v15, %v4671_v42  ;;  %v11854_v15 = vpop.eup %8908  ;;  %v11915_v45 = vpop.f32.mrf.mxu1 }
 0x35d   :  { %v4852_v33 = vsel %vm428_vm0, %v11854_v15, 0.0  ;;  %v11872_v14 = vpop.eup %8910  ;;  %v4717_v26 = vsel %vm428_vm0, %v11915_v45, -inf }
 0x35e   :  { %v4792_v38 = vmul.f32 1.442695, %v4755_v21  ;;  %8075 = vmatmul.mubr.msk.f32.gmra.mxu0 %vm428_vm0, %v416_v61  ;;  %v4855_v5 = vsel %vm428_vm0, %v11872_v14, 0.0  ;;  %v11923_v21 = vpop.f32.mrf.mxu1 }
 0x35f   :  { %4706 = vmax.xlane.f32.xlu0 %v4705_v32  ;;  %v4677_v57 = vpop.xlane.xlu1 %4676  ;;  %v4714_v56 = vsel %vm428_vm0, %v11923_v21, -inf }
 0x360   :  { %8914 = vpow2.f32 %v4792_v38  ;;  %v4757_v59 = vsub.f32 %v11430_v47, %v4677_v57  ;;  %v11909_v47 = vpop.f32.mrf.mxu0 }
 0x361   :  { %12801 = vst [vmem:[#allocation5_spill] sm:$0xff] %v11909_v47 }
 0x362   :  { %v4796_v11 = vmul.f32 1.442695, %v4757_v59  ;;  %v11911_v12 = vpop.f32.mrf.mxu0 }
 0x363   :  { %4853 = vadd.xlane.f32.xlu0 %v4852_v33  ;;  %v4674_v7 = vpop.xlane.xlu1 %4673  ;;  %12802 = vst [vmem:[#allocation6_spill] sm:$0xff] %v11911_v12 }
 0x364   :  { %v4756_v27 = vsub.f32 %v11445_v53, %v4674_v7  ;;  %8916 = vpow2.f32 %v4796_v11  ;;  %v11917_v44 = vpop.f32.mrf.mxu0  ;;  %v4699_v53 = vsel %vm428_vm0, %v11762_v16, -inf }
 0x365   :  { %12803 = vst [vmem:[#allocation23_spill] sm:$0xff] %v11917_v44 }
 0x366   :  { %v4794_v58 = vmul.f32 1.442695, %v4756_v27  ;;  %v11921_v42 = vpop.f32.mrf.mxu0 }
 0x367   :  { %4856 = vadd.xlane.f32.xlu0 %v4855_v5  ;;  %12804 = vst [vmem:[#allocation27_spill] sm:$0xff] %v11921_v42 }
 0x368   :  { %8918 = vpow2.f32 %v4794_v58  ;;  %v11926_v38 = vpop.f32.mrf.mxu0 }
 0x369   :  { %v11891_v23 = vpop.eup %8912 }
 0x36a   :  { %v4858_v39 = vsel %vm428_vm0, %v11891_v23, 0.0  ;;  %v11930_v0 = vpop.f32.mrf.mxu0 }
 0x36b   :  { %4859 = vadd.xlane.f32.xlu1 %v4858_v39 }
 0x36c   :  { %v11933_v61 = vpop.f32.mrf.mxu0 }
 0x36d   :  { %v11902_v50 = vpop.eup %8914 }
 0x36e   :  { %v4861_v60 = vsel %vm428_vm0, %v11902_v50, 0.0 }
 0x36f   :  { %4862 = vadd.xlane.f32.xlu1 %v4861_v60 }
 0x371   :  { %v11939_v5 = vpop.eup %8916 }
 0x372   :  { %v4867_v39 = vsel %vm428_vm0, %v11939_v5, 0.0 }
 0x373   :  { %4697 = vmax.xlane.f32.xlu1 %v4696_v22 }
 0x377   :  { %v4680_v8 = vpop.xlane.xlu0 %4679  ;;  %4700 = vmax.xlane.f32.xlu1 %v4699_v53 }
 0x378   :  { %v4758_v36 = vsub.f32 %v11515_v19, %v4680_v8  ;;  %v11937_v19 = vpop.f32.mrf.mxu0 }
 0x37a   :  { %v4798_v32 = vmul.f32 1.442695, %v4758_v36  ;;  %v11941_v59 = vpop.f32.mrf.mxu0 }
 0x37b   :  { %v4683_v33 = vpop.xlane.xlu0 %4682  ;;  %4715 = vmax.xlane.f32.xlu1 %v4714_v56 }
 0x37c   :  { %8920 = vpow2.f32 %v4798_v32  ;;  %v4759_v52 = vsub.f32 %v11506_v18, %v4683_v33  ;;  %v11945_v7 = vpop.f32.mrf.mxu0  ;;  %v11947_v18 = vpop.eup %8918 }
 0x37d   :  { %v4864_v27 = vsel %vm428_vm0, %v11947_v18, 0.0  ;;  %v11966_v32 = vpop.f32.mrf.mxu1 }
 0x37e   :  { %v4800_v57 = vmul.f32 1.442695, %v4759_v52  ;;  %v11949_v11 = vpop.f32.mrf.mxu0  ;;  %12805 = vst [vmem:[#allocation29_spill] sm:$0xff] %v11966_v32 }
 0x37f   :  { %4718 = vmax.xlane.f32.xlu1 %v4717_v26  ;;  %v4708_v26 = vsel %vm428_vm0, %v11907_v46, -inf }
 0x380   :  { %8922 = vpow2.f32 %v4800_v57  ;;  %v11953_v60 = vpop.f32.mrf.mxu0  ;;  %v11974_v57 = vpop.f32.mrf.mxu1 }
 0x381   :  { %12807 = vst [vmem:[#allocation21_spill] sm:$0xff] %v11974_v57 }
 0x382   :  { %v7980_v58 = vpop.f32.mrf.mxu0 }
 0x383   :  { %4868 = vadd.xlane.f32.xlu1 %v4867_v39  ;;  %v11958_v53 = vadd.f32 %v7980_v58, %v11408_v17  ;;  %v11978_v39 = vpop.f32.mrf.mxu1  ;;  %v4711_v58 = vsel %vm428_vm0, %v11898_v10, -inf }
 0x384   :  { %v11964_v36 = vpop.f32.mrf.mxu0 }
 0x385   :  { %8495 = vmatprep.subr.msk.mxu1 %vm428_vm0, %v11958_v53 }
 0x386   :  { %v11972_v52 = vpop.f32.mrf.mxu0 }
 0x387   :  { %4865 = vadd.xlane.f32.xlu1 %v4864_v27  ;;  %12806 = vst [vmem:[#allocation24_spill] sm:$0xff] %v11972_v52 }
 0x388   :  { %v11980_v27 = vpop.f32.mrf.mxu0 }
 0x389   :  { %v11955_v22 = vpop.eup %8920  ;;  %12808 = vst [vmem:[#allocation22_spill] sm:$0xff] %v11980_v27 }
 0x38a   :  { %v4870_v8 = vsel %vm428_vm0, %v11955_v22, 0.0 }
 0x38b   :  { %4871 = vadd.xlane.f32.xlu0 %v4870_v8  ;;  %v11984_v8 = vpop.f32.mrf.mxu1 }
 0x38c   :  { %v4726_v20 = vsel %vm428_vm0, %v11984_v8, -inf }
 0x38d   :  { %v11968_v56 = vpop.eup %8922  ;;  %v11991_v47 = vpop.f32.mrf.mxu1 }
 0x38e   :  { %v4873_v33 = vsel %vm428_vm0, %v11968_v56, 0.0  ;;  %12810 = vst [vmem:[#allocation20_spill] sm:$0xff] %v11991_v47 }
 0x38f   :  { %4874 = vadd.xlane.f32.xlu0 %v4873_v33  ;;  %v11986_v33 = vpop.f32.mrf.mxu0 }
 0x390   :  { %12809 = vst [vmem:[#allocation19_spill] sm:$0xff] %v11986_v33  ;;  %v11998_v33 = vpop.f32.mrf.mxu1 }
 0x391   :  { %v11993_v27 = vpop.f32.mrf.mxu0  ;;  %12812 = vst [vmem:[#allocation18_spill] sm:$0xff] %v11998_v33 }
 0x392   :  { %12811 = vst [vmem:[#allocation17_spill] sm:$0xff] %v11993_v27  ;;  %v12024_v27 = vpop.f32.mrf.mxu1 }
 0x393   :  { %4709 = vmax.xlane.f32.xlu0 %v4708_v26  ;;  %12820 = vst [vmem:[#allocation10_spill] sm:$0xff] %v12024_v27 }
 0x397   :  { %v4692_v54 = vpop.xlane.xlu1 %4691  ;;  %4712 = vmax.xlane.f32.xlu0 %v4711_v58  ;;  %v4729_v58 = vsel %vm428_vm0, %v11978_v39, -inf }
 0x398   :  { %v4762_v52 = vsub.f32 %v11615_v2, %v4692_v54  ;;  %v12000_v2 = vpop.f32.mrf.mxu0  ;;  %v4732_v54 = vsel %vm428_vm0, %v11998_v33, -inf }
 0x399   :  { %12813 = vst [vmem:[#allocation15_spill] sm:$0xff] %v12000_v2  ;;  %v12030_v2 = vpop.f32.mrf.mxu1 }
 0x39a   :  { %v4806_v12 = vmul.f32 1.442695, %v4762_v52  ;;  %12822 = vst [vmem:[#allocation35_spill] sm:$0xff] %v12030_v2 }
 0x39b   :  { %v4695_v26 = vpop.xlane.xlu1 %4694  ;;  %4727 = vmax.xlane.f32.xlu0 %v4726_v20  ;;  %v12004_v20 = vpop.f32.mrf.mxu0 }
 0x39c   :  { %8924 = vpow2.f32 %v4806_v12  ;;  %v4763_v42 = vsub.f32 %v11611_v35, %v4695_v26  ;;  %12814 = vst [vmem:[#allocation16_spill] sm:$0xff] %v12004_v20  ;;  %v4735_v12 = vsel %vm428_vm0, %v11991_v47, -inf }
 0x39d   :  { %v12008_v35 = vpop.f32.mrf.mxu0 }
 0x39e   :  { %v4808_v44 = vmul.f32 1.442695, %v4763_v42  ;;  %12815 = vst [vmem:[#allocation13_spill] sm:$0xff] %v12008_v35 }
 0x39f   :  { %4730 = vmax.xlane.f32.xlu0 %v4729_v58  ;;  %v12014_v26 = vpop.f32.mrf.mxu0 }
 0x3a0   :  { %8926 = vpow2.f32 %v4808_v44  ;;  %12817 = vst [vmem:[#allocation11_spill] sm:$0xff] %v12014_v26 }
 0x3a3   :  { %4733 = vmax.xlane.f32.xlu0 %v4732_v54  ;;  %v12020_v54 = vpop.f32.mrf.mxu0 }
 0x3a4   :  { %12819 = vst [vmem:[#allocation9_spill] sm:$0xff] %v12020_v54 }
 0x3a5   :  { %v12026_v20 = vpop.f32.mrf.mxu0 }
 0x3a6   :  { %12821 = vst [vmem:[#allocation37_spill] sm:$0xff] %v12026_v20 }
 0x3a7   :  { %4736 = vmax.xlane.f32.xlu0 %v4735_v12  ;;  %v4720_v12 = vsel %vm428_vm0, %v11974_v57, -inf  ;;  %v12032_v26 = vpop.f32.mrf.mxu0 }
 0x3a8   :  { %12823 = vst [vmem:[#allocation36_spill] sm:$0xff] %v12032_v26 }
 0x3a9   :  { %v12010_v42 = vpop.eup %8924 }
 0x3aa   :  { %12816 = vst [vmem:[#allocation14_spill] sm:$0xff] %v12010_v42  ;;  %v4882_v52 = vsel %vm428_vm0, %v12010_v42, 0.0  ;;  %v12038_v42 = vpop.f32.mrf.mxu0 }
 0x3ab   :  { %4883 = vadd.xlane.f32.xlu1 %v4882_v52  ;;  %v4723_v52 = vsel %vm428_vm0, %v11966_v32, -inf  ;;  %12825 = vst [vmem:[#allocation34_spill] sm:$0xff] %v12038_v42 }
 0x3ac   :  { %v12044_v32 = vpop.f32.mrf.mxu0 }
 0x3ad   :  { %v12016_v44 = vpop.eup %8926  ;;  %12827 = vst [vmem:[#allocation32_spill] sm:$0xff] %v12044_v32 }
 0x3ae   :  { %12818 = vst [vmem:[#allocation12_spill] sm:$0xff] %v12016_v44  ;;  %v4885_v58 = vsel %vm428_vm0, %v12016_v44, 0.0  ;;  %v12036_v44 = vpop.f32.mrf.mxu1  ;;  %v12048_v57 = vpop.f32.mrf.mxu0 }
 0x3af   :  { %4886 = vadd.xlane.f32.xlu1 %v4885_v58  ;;  %v4738_v58 = vsel %vm428_vm0, %v12030_v2, -inf  ;;  %12824 = vst [vmem:[#allocation33_spill] sm:$0xff] %v12036_v44  ;;  %12828 = vst [vmem:[#allocation28_spill] sm:$0xff] %v12048_v57 }
 0x3b0   :  { %v12042_v35 = vpop.f32.mrf.mxu1  ;;  %v12052_v2 = vpop.f32.mrf.mxu0 }
 0x3b1   :  { %12826 = vst [vmem:[#allocation31_spill] sm:$0xff] %v12042_v35 }
 0x3b2   :  { %v12054_v20 = vpop.f32.mrf.mxu0 }
 0x3b3   :  { %4721 = vmax.xlane.f32.xlu1 %v4720_v12  ;;  %v4741_v12 = vsel %vm428_vm0, %v12024_v27, -inf }
 0x3b4   :  { %v12056_v27 = vpop.f32.mrf.mxu0 }
 0x3b5   :  { %12829 = vst [vmem:[#allocation30_spill] sm:$0xff] %v12056_v27 }
 0x3b7   :  { %4724 = vmax.xlane.f32.xlu1 %v4723_v52  ;;  %v4744_v52 = vsel %vm428_vm0, %v12042_v35, -inf }
 0x3bb   :  { %4739 = vmax.xlane.f32.xlu1 %v4738_v58  ;;  %v4747_v58 = vsel %vm428_vm0, %v12036_v44, -inf }
 0x3bf   :  { %4742 = vmax.xlane.f32.xlu1 %v4741_v12  ;;  %v12058_v12 = vpop.f32.mrf.mxu0 }
 0x3c0   :  { %12830 = vst [vmem:[#allocation25_spill] sm:$0xff] %v12058_v12 }
 0x3c1   :  { %v12060_v42 = vpop.f32.mrf.mxu0 }
 0x3c2   :  { %12831 = vst [vmem:[#allocation26_spill] sm:$0xff] %v12060_v42 }
 0x3c3   :  { %4745 = vmax.xlane.f32.xlu1 %v4744_v52  ;;  %v12062_v52 = vpop.f32.mrf.mxu0 }
 0x3c5   :  { %v12065_v47 = vpop.f32.mrf.mxu0 }
 0x3c7   :  { %4748 = vmax.xlane.f32.xlu1 %v4747_v58  ;;  %v12069_v32 = vpop.f32.mrf.mxu0 }
 0x3d4   :  { %v4848_v54 = vpop.xlane.xlu0 %4847 }
 0x3d5   :  { %8928 = vrcp.f32 %v4848_v54 }
 0x3d8   :  { %v4851_v35 = vpop.xlane.xlu0 %4850 }
 0x3d9   :  { %8930 = vrcp.f32 %v4851_v35 }
 0x3dc   :  { %v4686_v26 = vpop.xlane.xlu0 %4685 }
 0x3dd   :  { %v4760_v44 = vsub.f32 %v11606_v43, %v4686_v26 }
 0x3df   :  { %v4802_v58 = vmul.f32 1.442695, %v4760_v44 }
 0x3e0   :  { %v4689_v57 = vpop.xlane.xlu0 %4688 }
 0x3e1   :  { %8932 = vpow2.f32 %v4802_v58  ;;  %v4761_v27 = vsub.f32 %v11593_v51, %v4689_v57  ;;  %v3310_v58 = vadd.f32 %v11408_v17, %v11887_v48  ;;  %v12076_v51 = vpop.f32.mrf.mxu0 }
 0x3e2   :  { %v8929_v33 = vpop.eup %8928 }
 0x3e3   :  { %v4804_v12 = vmul.f32 1.442695, %v4761_v27  ;;  %v4974_v54 = vmul.f32 %v8929_v33, %v11743_v55 }
 0x3e4   :  { %v4704_v42 = vpop.xlane.xlu0 %4703 }
 0x3e5   :  { %8934 = vpow2.f32 %v4804_v12  ;;  %v4766_v35 = vsub.f32 %v11817_v1, %v4704_v42  ;;  %8413 = vmatprep.mubr.msk.f32.mxu0 %vm428_vm0, %v4974_v54  ;;  %v3305_v1 = vadd.f32 %v11864_v49, %v11408_v17  ;;  %v3295_v54 = vadd.f32 %v11846_v62, %v11408_v17 }
 0x3e6   :  { %v8931_v43 = vpop.eup %8930 }
 0x3e7   :  { %v4975_v26 = vmul.f32 %v8931_v43, %v11760_v13  ;;  %v4814_v44 = vmul.f32 1.442695, %v4766_v35  ;;  %v12085_v13 = vpop.f32.mrf.mxu0 }
 0x3e8   :  { %v4707_v57 = vpop.xlane.xlu0 %4706 }
 0x3e9   :  { %8936 = vpow2.f32 %v4814_v44  ;;  %v4767_v55 = vsub.f32 %v11798_v24, %v4707_v57  ;;  %8414 = vmatmul.mubr.msk.f32.vlgmr.msra.gmra.mxu0 %vm428_vm0, %v4975_v26  ;;  %v3300_v24 = vadd.f32 %v11408_v17, %v11875_v34  ;;  %v12095_v49 = vpop.f32.mrf.mxu0  ;;  %v12113_v44 = vld [vmem:[%s12719_s8] ss:$0 sm:$0xff] }
 0x3ea   :  { %8458 = vmatpush3.xpose.msk.msra.mxu0 %vm428_vm0, %v11885_v28  ;;  %v3290_v17 = vadd.f32 %v12113_v44, %v11857_v9 }
 0x3eb   :  { %v4816_v27 = vmul.f32 1.442695, %v4767_v55  ;;  %8459 = vmatprep.subr.msk.mxu0 %vm428_vm0, %v3310_v58  ;;  %v12105_v35 = vpop.f32.mrf.mxu0 }
 0x3ec   :  { %v4854_v48 = vpop.xlane.xlu0 %4853 }
 0x3ed   :  { %8938 = vpow2.f32 %v4816_v27  ;;  %v3285_v27 = vadd.f32 %v12113_v44, %v11829_v31 }
 0x3ee   :  { %v12087_v33 = vpop.eup %8932  ;;  %8940 = vrcp.f32 %v4854_v48  ;;  %8460 = vmatpush3.xpose.msk.msra.mxu0 %vm428_vm0, %v3310_v58  ;;  %v12120_v58 = vpop.f32.mrf.mxu0 }
 0x3ef   :  { %v4876_v28 = vsel %vm428_vm0, %v12087_v33, 0.0  ;;  %8461 = vmatprep.subr.msk.mxu0 %vm428_vm0, %v3305_v1 }
 0x3f0   :  { %v4857_v42 = vpop.xlane.xlu0 %4856  ;;  %4877 = vadd.xlane.f32.xlu0 %v4876_v28  ;;  %v12130_v48 = vpop.f32.mrf.mxu0 }
 0x3f1   :  { %8942 = vrcp.f32 %v4857_v42 }
 0x3f2   :  { %v12097_v12 = vpop.eup %8934  ;;  %8462 = vmatpush3.xpose.msk.msra.mxu0 %vm428_vm0, %v3305_v1 }
 0x3f3   :  { %v4879_v34 = vsel %vm428_vm0, %v12097_v12, 0.0  ;;  %8463 = vmatprep.subr.msk.mxu0 %vm428_vm0, %v3300_v24 }
 0x3f4   :  { %v4860_v43 = vpop.xlane.xlu1 %4859  ;;  %4880 = vadd.xlane.f32.xlu0 %v4879_v34 }
 0x3f5   :  { %8944 = vrcp.f32 %v4860_v43  ;;  %v12140_v43 = vpop.f32.mrf.mxu0 }
 0x3f6   :  { %v12107_v26 = vpop.eup %8936  ;;  %8464 = vmatpush3.xpose.msk.msra.mxu0 %vm428_vm0, %v3300_v24 }
 0x3f7   :  { %v4894_v62 = vsel %vm428_vm0, %v12107_v26, 0.0  ;;  %8465 = vmatprep.subr.msk.mxu0 %vm428_vm0, %v3295_v54 }
 0x3f8   :  { %v4863_v57 = vpop.xlane.xlu1 %4862  ;;  %4895 = vadd.xlane.f32.xlu0 %v4894_v62 }
 0x3f9   :  { %8946 = vrcp.f32 %v4863_v57 }
 0x3fa   :  { %v12122_v55 = vpop.eup %8938  ;;  %8466 = vmatpush3.xpose.msk.msra.mxu0 %vm428_vm0, %v3295_v54  ;;  %v3280_v54 = vadd.f32 %v12113_v44, %v11836_v30 }
 0x3fb   :  { %v8941_v1 = vpop.eup %8940  ;;  %v4897_v9 = vsel %vm428_vm0, %v12122_v55, 0.0  ;;  %8467 = vmatprep.subr.msk.mxu0 %vm428_vm0, %v3290_v17 }
 0x3fc   :  { %v4698_v24 = vpop.xlane.xlu1 %4697  ;;  %4898 = vadd.xlane.f32.xlu0 %v4897_v9  ;;  %v4976_v28 = vmul.f32 %v8941_v1, %v11854_v15 }
 0x3fd   :  { %v4764_v31 = vsub.f32 %v11783_v4, %v4698_v24 }
 0x3fe   :  { %v8943_v42 = vpop.eup %8942  ;;  %8416 = vmatprep.mubr.msk.f32.mxu0 %vm428_vm0, %v4976_v28  ;;  %8468 = vmatpush3.xpose.msk.msra.mxu0 %vm428_vm0, %v3290_v17  ;;  %v3275_v17 = vadd.f32 %v12113_v44, %v11806_v37  ;;  %v3390_v28 = vadd.f32 %v12113_v44, %v11964_v36 }
 0x3ff   :  { %v4977_v34 = vmul.f32 %v8943_v42, %v11872_v14  ;;  %8469 = vmatprep.subr.msk.mxu0 %vm428_vm0, %v3285_v27  ;;  %v4810_v30 = vmul.f32 1.442695, %v4764_v31  ;;  %v12149_v14 = vpop.f32.mrf.mxu0 }
 0x400   :  { %v4701_v62 = vpop.xlane.xlu1 %4700 }
 0x401   :  { %v4765_v57 = vsub.f32 %v11762_v16, %v4701_v62  ;;  %8417 = vmatmul.mubr.msk.f32.gmra.mxu0 %vm428_vm0, %v4977_v34  ;;  %v12160_v42 = vpop.f32.mrf.mxu0 }
 0x402   :  { %v8945_v15 = vpop.eup %8944  ;;  %8470 = vmatpush3.xpose.msk.msra.mxu0 %vm428_vm0, %v3285_v27  ;;  %v3270_v27 = vadd.f32 %v12113_v44, %v11820_v6  ;;  %v3385_v6 = vadd.f32 %v12113_v44, %v11949_v11 }
 0x403   :  { %v4812_v1 = vmul.f32 1.442695, %v4765_v57  ;;  %v4978_v4 = vmul.f32 %v8945_v15, %v11891_v23  ;;  %8471 = vmatprep.subr.msk.mxu0 %vm428_vm0, %v3280_v54  ;;  %v12164_v34 = vpop.f32.mrf.mxu0  ;;  %v3260_v57 = vadd.f32 %v12113_v44, %v11800_v29 }
 0x404   :  { %v4716_v9 = vpop.xlane.xlu1 %4715 }
 0x405   :  { %8948 = vpow2.f32 %v4812_v1  ;;  %v4770_v16 = vsub.f32 %v11923_v21, %v4716_v9  ;;  %8451 = vmatprep.mubr.msk.f32.mxu1 %vm428_vm0, %v4978_v4  ;;  %v12173_v36 = vpop.f32.mrf.mxu0  ;;  %v3255_v1 = vadd.f32 %v12113_v44, %v11768_v40 }
 0x406   :  { %v8947_v24 = vpop.eup %8946  ;;  %8472 = vmatpush3.xpose.msk.msra.mxu0 %vm428_vm0, %v3280_v54  ;;  %8950 = vpow2.f32 %v4810_v30  ;;  %v3265_v54 = vadd.f32 %v12113_v44, %v11789_v41 }
 0x407   :  { %v4979_v37 = vmul.f32 %v8947_v24, %v11902_v50  ;;  %v4822_v23 = vmul.f32 1.442695, %v4770_v16  ;;  %8473 = vmatprep.subr.msk.mxu0 %vm428_vm0, %v3275_v17  ;;  %v12183_v11 = vpop.f32.mrf.mxu0  ;;  %v3250_v24 = vadd.f32 %v12113_v44, %v11781_v63 }
 0x408   :  { %v4719_v21 = vpop.xlane.xlu1 %4718 }
 0x409   :  { %v4771_v31 = vsub.f32 %v11915_v45, %v4719_v21  ;;  %8452 = vmatmul.mubr.msk.f32.vlgmr.msra.gmra.mxu1 %vm428_vm0, %v4979_v37  ;;  %8952 = vpow2.f32 %v4822_v23  ;;  %v3245_v21 = vadd.f32 %v12113_v44, %v11736_v25  ;;  %v3360_v25 = vadd.f32 %v12113_v44, %v11937_v19 }
 0x40a   :  { %8474 = vmatpush3.xpose.msk.msra.mxu0 %vm428_vm0, %v3275_v17  ;;  %8496 = vmatpush3.xpose.msk.msra.mxu1 %vm428_vm0, %v11958_v53  ;;  %v3380_v53 = vadd.f32 %v12113_v44, %v11953_v60  ;;  %v3375_v60 = vadd.f32 %v12113_v44, %v11941_v59  ;;  %v12197_v17 = vpop.f32.mrf.mxu0  ;;  %v3370_v59 = vadd.f32 %v12113_v44, %v11945_v7 }
 0x40b   :  { %v4824_v50 = vmul.f32 1.442695, %v4771_v31  ;;  %8475 = vmatprep.subr.msk.mxu0 %vm428_vm0, %v3270_v27  ;;  %8497 = vmatprep.subr.msk.mxu1 %vm428_vm0, %v3390_v28  ;;  %v3365_v7 = vadd.f32 %v12113_v44, %v11933_v61 }
 0x40c   :  { %v4869_v45 = vpop.xlane.xlu1 %4868  ;;  %v12211_v9 = vpop.f32.mrf.mxu0 }
 0x40d   :  { %8954 = vpow2.f32 %v4824_v50 }
 0x40e   :  { %8476 = vmatpush3.xpose.msk.msra.mxu0 %vm428_vm0, %v3270_v27  ;;  %8498 = vmatpush3.xpose.msk.msra.mxu1 %vm428_vm0, %v3390_v28  ;;  %8956 = vrcp.f32 %v4869_v45  ;;  %v12225_v37 = vpop.f32.mrf.mxu0 }
 0x40f   :  { %8477 = vmatprep.subr.msk.mxu0 %vm428_vm0, %v3265_v54  ;;  %8499 = vmatprep.subr.msk.mxu1 %vm428_vm0, %v3385_v6 }
 0x410   :  { %v4866_v62 = vpop.xlane.xlu1 %4865 }
 0x411   :  { %8958 = vrcp.f32 %v4866_v62  ;;  %v3240_v62 = vadd.f32 %v12113_v44, %v11748_v3  ;;  %v3475_v3 = vadd.f32 %v12113_v44, %v12052_v2  ;;  %v3470_v2 = vadd.f32 %v12113_v44, %v12054_v20  ;;  %v12832_v20 = vld [vmem:[#allocation32_spill] sm:$0xff] }
 0x412   :  { %v12187_v41 = vpop.eup %8948  ;;  %8478 = vmatpush3.xpose.msk.msra.mxu0 %vm428_vm0, %v3265_v54  ;;  %8500 = vmatpush3.xpose.msk.msra.mxu1 %vm428_vm0, %v3385_v6  ;;  %v12239_v54 = vpop.f32.mrf.mxu0 }
 0x413   :  { %v4891_v15 = vsel %vm428_vm0, %v12187_v41, 0.0  ;;  %8479 = vmatprep.subr.msk.mxu0 %vm428_vm0, %v3260_v57  ;;  %8501 = vmatprep.subr.msk.mxu1 %vm428_vm0, %v3380_v53  ;;  %v12199_v29 = vpop.eup %8950 }
 0x414   :  { %v4872_v30 = vpop.xlane.xlu0 %4871  ;;  %4892 = vadd.xlane.f32.xlu1 %v4891_v15  ;;  %v4888_v4 = vsel %vm428_vm0, %v12199_v29, 0.0 }
 0x415   :  { %8960 = vrcp.f32 %v4872_v30 }
 0x416   :  { %8480 = vmatpush3.xpose.msk.msra.mxu0 %vm428_vm0, %v3260_v57  ;;  %8502 = vmatpush3.xpose.msk.msra.mxu1 %vm428_vm0, %v3380_v53  ;;  %v12213_v16 = vpop.eup %8952 }
 0x417   :  { %8481 = vmatprep.subr.msk.mxu0 %vm428_vm0, %v3255_v1  ;;  %8503 = vmatprep.subr.msk.mxu1 %vm428_vm0, %v3375_v60  ;;  %v4906_v27 = vsel %vm428_vm0, %v12213_v16, 0.0 }
 0x418   :  { %v4875_v40 = vpop.xlane.xlu0 %4874  ;;  %4889 = vadd.xlane.f32.xlu1 %v4888_v4 }
 0x419   :  { %8962 = vrcp.f32 %v4875_v40 }
 0x41a   :  { %8482 = vmatpush3.xpose.msk.msra.mxu0 %vm428_vm0, %v3255_v1  ;;  %8504 = vmatpush3.xpose.msk.msra.mxu1 %vm428_vm0, %v3375_v60  ;;  %v12227_v23 = vpop.eup %8954 }
 0x41b   :  { %8483 = vmatprep.subr.msk.mxu0 %vm428_vm0, %v3250_v24  ;;  %8505 = vmatprep.subr.msk.mxu1 %vm428_vm0, %v3370_v59  ;;  %v8957_v28 = vpop.eup %8956  ;;  %v4909_v50 = vsel %vm428_vm0, %v12227_v23, 0.0 }
 0x41c   :  { %v4710_v63 = vpop.xlane.xlu0 %4709  ;;  %4907 = vadd.xlane.f32.xlu1 %v4906_v27  ;;  %v4981_v53 = vmul.f32 %v8957_v28, %v11939_v5  ;;  %v12255_v5 = vpop.f32.mrf.mxu0  ;;  %v12834_v28 = vld [vmem:[#allocation23_spill] sm:$0xff] }
 0x41d   :  { %v4768_v31 = vsub.f32 %v11907_v46, %v4710_v63 }
 0x41e   :  { %v8959_v61 = vpop.eup %8958  ;;  %8484 = vmatpush3.xpose.msk.msra.mxu0 %vm428_vm0, %v3250_v24  ;;  %8506 = vmatpush3.xpose.msk.msra.mxu1 %vm428_vm0, %v3370_v59  ;;  %v3350_v59 = vadd.f32 %v12113_v44, %v11930_v0  ;;  %v3465_v24 = vadd.f32 %v12113_v44, %v12832_v20 }
 0x41f   :  { %v4818_v6 = vmul.f32 1.442695, %v4768_v31  ;;  %v4980_v45 = vmul.f32 %v8959_v61, %v11947_v18  ;;  %8485 = vmatprep.subr.msk.mxu0 %vm428_vm0, %v3245_v21  ;;  %8507 = vmatprep.subr.msk.mxu1 %vm428_vm0, %v3365_v7 }
 0x420   :  { %v4713_v46 = vpop.xlane.xlu0 %4712  ;;  %4910 = vadd.xlane.f32.xlu1 %v4909_v50 }
 0x421   :  { %8964 = vpow2.f32 %v4818_v6  ;;  %v4769_v57 = vsub.f32 %v11898_v10, %v4713_v46  ;;  %8454 = vmatprep.mubr.msk.f32.mxu1 %vm428_vm0, %v4980_v45  ;;  %v3355_v10 = vadd.f32 %v12113_v44, %v11926_v38  ;;  %v12268_v38 = vpop.f32.mrf.mxu0  ;;  %v12835_v6 = vld [vmem:[#allocation28_spill] sm:$0xff] }
 0x422   :  { %v8961_v18 = vpop.eup %8960  ;;  %8455 = vmatmul.mubr.msk.f32.gmra.mxu1 %vm428_vm0, %v4981_v53  ;;  %8486 = vmatpush3.xpose.msk.msra.mxu0 %vm428_vm0, %v3245_v21  ;;  %v3345_v21 = vadd.f32 %v12113_v44, %v12834_v28  ;;  %v3460_v50 = vadd.f32 %v12113_v44, %v12835_v6  ;;  %v12836_v46 = vld [vmem:[#allocation20_spill] sm:$0xff]  ;;  %v12844_v6 = vld [vmem:[#allocation37_spill] sm:$0xff] }
 0x423   :  { %v4820_v60 = vmul.f32 1.442695, %v4769_v57  ;;  %8508 = vmatpush3.xpose.msk.msra.mxu1 %vm428_vm0, %v3365_v7  ;;  %8487 = vmatprep.subr.msk.mxu0 %vm428_vm0, %v3240_v62  ;;  %v4982_v19 = vmul.f32 %v8961_v18, %v11955_v22  ;;  %v12280_v7 = vpop.f32.mrf.mxu0  ;;  %v12837_v57 = vld [vmem:[#allocation27_spill] sm:$0xff] }
 0x424   :  { %v4728_v15 = vpop.xlane.xlu0 %4727  ;;  %8509 = vmatprep.subr.msk.mxu1 %vm428_vm0, %v3360_v25  ;;  %v3340_v18 = vadd.f32 %v12113_v44, %v12837_v57 }
 0x425   :  { %8966 = vpow2.f32 %v4820_v60  ;;  %8489 = vmatprep.mubr.msk.f32.mxu0 %vm428_vm0, %v4982_v19  ;;  %v4774_v22 = vsub.f32 %v11984_v8, %v4728_v15  ;;  %v12295_v45 = vpop.f32.mrf.mxu0 }
 0x426   :  { %v8963_v30 = vpop.eup %8962  ;;  %8488 = vmatpush3.xpose.msk.msra.mxu0 %vm428_vm0, %v3240_v62 }
 0x427   :  { %v4983_v1 = vmul.f32 %v8963_v30, %v11968_v56  ;;  %8510 = vmatpush3.xpose.msk.msra.mxu1 %vm428_vm0, %v3360_v25  ;;  %8533 = vmatprep.subr.msk.mxu0 %vm428_vm0, %v3475_v3  ;;  %v4830_v56 = vmul.f32 1.442695, %v4774_v22  ;;  %v12310_v15 = vpop.f32.mrf.mxu0 }
 0x428   :  { %v4731_v4 = vpop.xlane.xlu0 %4730  ;;  %8511 = vmatprep.subr.msk.mxu1 %vm428_vm0, %v3355_v10 }
 0x429   :  { %v4775_v40 = vsub.f32 %v11978_v39, %v4731_v4  ;;  %8490 = vmatmul.mubr.msk.f32.vlgmr.msra.gmra.mxu0 %vm428_vm0, %v4983_v1  ;;  %v12833_v39 = vld [vmem:[#allocation18_spill] sm:$0xff]  ;;  %v12839_v1 = vld [vmem:[#allocation5_spill] sm:$0xff]  ;;  %v12320_v4 = vpop.f32.mrf.mxu0 }
 0x42a   :  { %8534 = vmatpush3.xpose.msk.msra.mxu0 %vm428_vm0, %v3475_v3  ;;  %v12838_v3 = vld [vmem:[#allocation36_spill] sm:$0xff]  ;;  %v3335_v22 = vadd.f32 %v12113_v44, %v12839_v1 }
 0x42b   :  { %v4832_v8 = vmul.f32 1.442695, %v4775_v40  ;;  %8512 = vmatpush3.xpose.msk.msra.mxu1 %vm428_vm0, %v3355_v10  ;;  %8535 = vmatprep.subr.msk.mxu0 %vm428_vm0, %v3470_v2  ;;  %v3455_v10 = vadd.f32 %v12113_v44, %v12838_v3 }
 0x42c   :  { %v4734_v0 = vpop.xlane.xlu0 %4733  ;;  %8513 = vmatprep.subr.msk.mxu1 %vm428_vm0, %v3350_v59 }
 0x42d   :  { %8968 = vpow2.f32 %v4832_v8  ;;  %v4776_v27 = vsub.f32 %v12833_v39, %v4734_v0  ;;  %v12841_v8 = vld [vmem:[#allocation6_spill] sm:$0xff] }
 0x42e   :  { %v12284_v63 = vpop.eup %8964  ;;  %8536 = vmatpush3.xpose.msk.msra.mxu0 %vm428_vm0, %v3470_v2  ;;  %8970 = vpow2.f32 %v4830_v56  ;;  %v12840_v2 = vld [vmem:[#allocation34_spill] sm:$0xff]  ;;  %v3330_v20 = vadd.f32 %v12113_v44, %v12841_v8 }
 0x42f   :  { %v4834_v31 = vmul.f32 1.442695, %v4776_v27  ;;  %8514 = vmatpush3.xpose.msk.msra.mxu1 %vm428_vm0, %v3350_v59  ;;  %v4900_v61 = vsel %vm428_vm0, %v12284_v63, 0.0  ;;  %8537 = vmatprep.subr.msk.mxu0 %vm428_vm0, %v3465_v24  ;;  %v3450_v59 = vadd.f32 %v12113_v44, %v12840_v2  ;;  %v12334_v27 = vpop.f32.mrf.mxu0 }
 0x430   :  { %4901 = vadd.xlane.f32.xlu0 %v4900_v61  ;;  %v4737_v25 = vpop.xlane.xlu0 %4736  ;;  %8515 = vmatprep.subr.msk.mxu1 %vm428_vm0, %v3345_v21 }
 0x431   :  { %v4777_v53 = vsub.f32 %v12836_v46, %v4737_v25  ;;  %8972 = vpow2.f32 %v4834_v31  ;;  %v12843_v31 = vld [vmem:[#allocation7_spill] sm:$0xff]  ;;  %v12845_v25 = vld [vmem:[#allocation21_spill] sm:$0xff]  ;;  %v12349_v57 = vpop.f32.mrf.mxu0 }
 0x432   :  { %v12299_v62 = vpop.eup %8966  ;;  %8538 = vmatpush3.xpose.msk.msra.mxu0 %vm428_vm0, %v3465_v24  ;;  %v12842_v24 = vld [vmem:[#allocation9_spill] sm:$0xff]  ;;  %v3325_v61 = vadd.f32 %v12113_v44, %v12843_v31  ;;  %v3555_v31 = vadd.f32 %v12113_v44, %v12160_v42 }
 0x433   :  { %v4836_v60 = vmul.f32 1.442695, %v4777_v53  ;;  %8516 = vmatpush3.xpose.msk.msra.mxu1 %vm428_vm0, %v3345_v21  ;;  %v4903_v19 = vsel %vm428_vm0, %v12299_v62, 0.0  ;;  %8539 = vmatprep.subr.msk.mxu0 %vm428_vm0, %v3460_v50  ;;  %v3445_v0 = vadd.f32 %v12113_v44, %v12842_v24 }
 0x434   :  { %v4884_v30 = vpop.xlane.xlu1 %4883  ;;  %4904 = vadd.xlane.f32.xlu0 %v4903_v19  ;;  %8517 = vmatprep.subr.msk.mxu1 %vm428_vm0, %v3340_v18  ;;  %v12846_v19 = vld [vmem:[#allocation29_spill] sm:$0xff] }
 0x435   :  { %8974 = vrcp.f32 %v4884_v30 }
 0x436   :  { %8540 = vmatpush3.xpose.msk.msra.mxu0 %vm428_vm0, %v3460_v50  ;;  %8976 = vpow2.f32 %v4836_v60  ;;  %v3440_v50 = vadd.f32 %v12113_v44, %v12844_v6  ;;  %v12850_v6 = vld [vmem:[#allocation11_spill] sm:$0xff] }
 0x437   :  { %8518 = vmatpush3.xpose.msk.msra.mxu1 %vm428_vm0, %v3340_v18  ;;  %8541 = vmatprep.subr.msk.mxu0 %vm428_vm0, %v3455_v10 }
 0x438   :  { %v4887_v40 = vpop.xlane.xlu1 %4886  ;;  %8519 = vmatprep.subr.msk.mxu1 %vm428_vm0, %v3335_v22 }
 0x439   :  { %8978 = vrcp.f32 %v4887_v40 }
 0x43a   :  { %v12323_v56 = vpop.eup %8968  ;;  %8542 = vmatpush3.xpose.msk.msra.mxu0 %vm428_vm0, %v3455_v10  ;;  %v12847_v10 = vld [vmem:[#allocation8_spill] sm:$0xff] }
 0x43b   :  { %8520 = vmatpush3.xpose.msk.msra.mxu1 %vm428_vm0, %v3335_v22  ;;  %v4921_v39 = vsel %vm428_vm0, %v12323_v56, 0.0  ;;  %8543 = vmatprep.subr.msk.mxu0 %vm428_vm0, %v3450_v59  ;;  %v12336_v28 = vpop.eup %8970  ;;  %v3320_v30 = vadd.f32 %v12113_v44, %v12847_v10  ;;  %v12848_v22 = vld [vmem:[#allocation13_spill] sm:$0xff] }
 0x43c   :  { %v4722_v21 = vpop.xlane.xlu1 %4721  ;;  %4922 = vadd.xlane.f32.xlu0 %v4921_v39  ;;  %8521 = vmatprep.subr.msk.mxu1 %vm428_vm0, %v3330_v20  ;;  %v4918_v53 = vsel %vm428_vm0, %v12336_v28, 0.0  ;;  %v3435_v2 = vadd.f32 %v12113_v44, %v12848_v22 }
 0x43d   :  { %v4772_v46 = vsub.f32 %v12845_v25, %v4722_v21  ;;  %v3430_v25 = vadd.f32 %v12113_v44, %v12850_v6 }
 0x43e   :  { %8544 = vmatpush3.xpose.msk.msra.mxu0 %vm428_vm0, %v3450_v59  ;;  %v12351_v18 = vpop.eup %8972 }
 0x43f   :  { %8522 = vmatpush3.xpose.msk.msra.mxu1 %vm428_vm0, %v3330_v20  ;;  %8545 = vmatprep.subr.msk.mxu0 %vm428_vm0, %v3445_v0  ;;  %v4826_v59 = vmul.f32 1.442695, %v4772_v46  ;;  %v4924_v8 = vsel %vm428_vm0, %v12351_v18, 0.0  ;;  %v12364_v20 = vpop.f32.mrf.mxu0  ;;  %v12851_v46 = vld [vmem:[#allocation12_spill] sm:$0xff] }
 0x440   :  { %v4725_v60 = vpop.xlane.xlu1 %4724  ;;  %4919 = vadd.xlane.f32.xlu0 %v4918_v53  ;;  %8523 = vmatprep.subr.msk.mxu1 %vm428_vm0, %v3325_v61 }
 0x441   :  { %v4773_v3 = vsub.f32 %v12846_v19, %v4725_v60  ;;  %v12852_v60 = vld [vmem:[#allocation35_spill] sm:$0xff]  ;;  %v12382_v42 = vpop.f32.mrf.mxu0 }
 0x442   :  { %8546 = vmatpush3.xpose.msk.msra.mxu0 %vm428_vm0, %v3445_v0  ;;  %v8975_v1 = vpop.eup %8974  ;;  %v12849_v0 = vld [vmem:[#allocation14_spill] sm:$0xff] }
 0x443   :  { %v4828_v40 = vmul.f32 1.442695, %v4773_v3  ;;  %8524 = vmatpush3.xpose.msk.msra.mxu1 %vm428_vm0, %v3325_v61  ;;  %8547 = vmatprep.subr.msk.mxu0 %vm428_vm0, %v3440_v50  ;;  %v12366_v24 = vpop.eup %8976  ;;  %v4986_v21 = vmul.f32 %v8975_v1, %v12849_v0  ;;  %v3550_v1 = vadd.f32 %v12113_v44, %v12164_v34  ;;  %v3545_v34 = vadd.f32 %v12113_v44, %v12140_v43 }
 0x444   :  { %4925 = vadd.xlane.f32.xlu0 %v4924_v8  ;;  %v4740_v39 = vpop.xlane.xlu1 %4739  ;;  %8525 = vmatprep.subr.msk.mxu1 %vm428_vm0, %v3320_v30  ;;  %v4927_v3 = vsel %vm428_vm0, %v12366_v24, 0.0  ;;  %v3540_v43 = vadd.f32 %v12113_v44, %v12149_v14 }
 0x445   :  { %8980 = vpow2.f32 %v4828_v40  ;;  %8527 = vmatprep.mubr.msk.f32.mxu1 %vm428_vm0, %v4986_v21  ;;  %v4778_v19 = vsub.f32 %v12852_v60, %v4740_v39  ;;  %v12392_v40 = vpop.f32.mrf.mxu0  ;;  %v12854_v39 = vld [vmem:[#allocation15_spill] sm:$0xff]  ;;  %v12857_v60 = vld [vmem:[#allocation33_spill] sm:$0xff] }
 0x446   :  { %v8979_v61 = vpop.eup %8978  ;;  %8548 = vmatpush3.xpose.msk.msra.mxu0 %vm428_vm0, %v3440_v50  ;;  %8982 = vpow2.f32 %v4826_v59  ;;  %v12853_v50 = vld [vmem:[#allocation10_spill] sm:$0xff]  ;;  %v3425_v0 = vadd.f32 %v12113_v44, %v12854_v39  ;;  %v12855_v21 = vld [vmem:[#allocation31_spill] sm:$0xff] }
 0x447   :  { %v4987_v53 = vmul.f32 %v8979_v61, %v12851_v46  ;;  %8526 = vmatpush3.xpose.msk.msra.mxu1 %vm428_vm0, %v3320_v30  ;;  %8549 = vmatprep.subr.msk.mxu0 %vm428_vm0, %v3435_v2  ;;  %v4838_v30 = vmul.f32 1.442695, %v4778_v19  ;;  %v12856_v46 = vld [vmem:[#allocation16_spill] sm:$0xff] }
 0x448   :  { %4928 = vadd.xlane.f32.xlu0 %v4927_v3  ;;  %v4743_v10 = vpop.xlane.xlu1 %4742  ;;  %8571 = vmatprep.subr.msk.mxu1 %vm428_vm0, %v3555_v31 }
 0x449   :  { %v4779_v22 = vsub.f32 %v12853_v50, %v4743_v10  ;;  %v3535_v50 = vadd.f32 %v12113_v44, %v12120_v58  ;;  %v3530_v58 = vadd.f32 %v12113_v44, %v12130_v48  ;;  %v3525_v48 = vadd.f32 %v12113_v44, %v12095_v49 }
 0x44a   :  { %8528 = vmatmul.mubr.msk.f32.vlgmr.msra.gmra.mxu1 %vm428_vm0, %v4987_v53  ;;  %8550 = vmatpush3.xpose.msk.msra.mxu0 %vm428_vm0, %v3435_v2  ;;  %v3420_v53 = vadd.f32 %v12113_v44, %v12856_v46  ;;  %v3520_v49 = vadd.f32 %v12113_v44, %v12105_v35 }
 0x44b   :  { %v4840_v59 = vmul.f32 1.442695, %v4779_v22  ;;  %8551 = vmatprep.subr.msk.mxu0 %vm428_vm0, %v3430_v25  ;;  %8572 = vmatpush3.xpose.msk.msra.mxu1 %vm428_vm0, %v3555_v31  ;;  %v12403_v31 = vpop.f32.mrf.mxu0  ;;  %v12858_v22 = vld [vmem:[#allocation19_spill] sm:$0xff] }
 0x44c   :  { %v4746_v8 = vpop.xlane.xlu1 %4745  ;;  %8573 = vmatprep.subr.msk.mxu1 %vm428_vm0, %v3550_v1 }
 0x44d   :  { %8984 = vpow2.f32 %v4840_v59  ;;  %v4780_v2 = vsub.f32 %v12855_v21, %v4746_v8  ;;  %v12418_v14 = vpop.f32.mrf.mxu0 }
 0x44e   :  { %8552 = vmatpush3.xpose.msk.msra.mxu0 %vm428_vm0, %v3430_v25  ;;  %8986 = vpow2.f32 %v4838_v30  ;;  %v3415_v30 = vadd.f32 %v12113_v44, %v12858_v22 }
 0x44f   :  { %v4842_v61 = vmul.f32 1.442695, %v4780_v2  ;;  %8553 = vmatprep.subr.msk.mxu0 %vm428_vm0, %v3425_v0  ;;  %8574 = vmatpush3.xpose.msk.msra.mxu1 %vm428_vm0, %v3550_v1  ;;  %v12432_v8 = vpop.f32.mrf.mxu0 }
 0x450   :  { %v4749_v6 = vpop.xlane.xlu1 %4748  ;;  %8575 = vmatprep.subr.msk.mxu1 %vm428_vm0, %v3545_v34 }
 0x451   :  { %v4781_v19 = vsub.f32 %v12857_v60, %v4749_v6  ;;  %8988 = vpow2.f32 %v4842_v61  ;;  %v12446_v2 = vpop.f32.mrf.mxu0  ;;  %v12860_v6 = vld [vmem:[#allocation24_spill] sm:$0xff] }
 0x452   :  { %v12411_v25 = vpop.eup %8980  ;;  %8554 = vmatpush3.xpose.msk.msra.mxu0 %vm428_vm0, %v3425_v0 }
 0x453   :  { %v4844_v3 = vmul.f32 1.442695, %v4781_v19  ;;  %v4915_v10 = vsel %vm428_vm0, %v12411_v25, 0.0  ;;  %8555 = vmatprep.subr.msk.mxu0 %vm428_vm0, %v3420_v53  ;;  %8576 = vmatpush3.xpose.msk.msra.mxu1 %vm428_vm0, %v3545_v34  ;;  %v12420_v1 = vpop.eup %8982  ;;  %v12859_v34 = vld [vmem:[#allocation17_spill] sm:$0xff]  ;;  %v12861_v19 = vld [vmem:[#allocation22_spill] sm:$0xff] }
 0x454   :  { %4916 = vadd.xlane.f32.xlu1 %v4915_v10  ;;  %8577 = vmatprep.subr.msk.mxu1 %vm428_vm0, %v3540_v43  ;;  %v4912_v59 = vsel %vm428_vm0, %v12420_v1, 0.0  ;;  %v3410_v39 = vadd.f32 %v12113_v44, %v12859_v34  ;;  %v3505_v34 = vadd.f32 %v12113_v44, %v12065_v47 }
 0x455   :  { %8990 = vpow2.f32 %v4844_v3  ;;  %v3400_v3 = vadd.f32 %v12113_v44, %v12861_v19  ;;  %v12863_v19 = vld [vmem:[#allocation30_spill] sm:$0xff] }
 0x456   :  { %8556 = vmatpush3.xpose.msk.msra.mxu0 %vm428_vm0, %v3420_v53  ;;  %v12460_v53 = vpop.f32.mrf.mxu0 }
 0x457   :  { %8557 = vmatprep.subr.msk.mxu0 %vm428_vm0, %v3415_v30  ;;  %8578 = vmatpush3.xpose.msk.msra.mxu1 %vm428_vm0, %v3540_v43  ;;  %v3405_v43 = vadd.f32 %v12113_v44, %v12860_v6 }
 0x458   :  { %4913 = vadd.xlane.f32.xlu1 %v4912_v59  ;;  %8579 = vmatprep.subr.msk.mxu1 %vm428_vm0, %v3535_v50  ;;  %v12478_v35 = vpop.f32.mrf.mxu0 }
 0x45a   :  { %v12439_v0 = vpop.eup %8984  ;;  %8558 = vmatpush3.xpose.msk.msra.mxu0 %vm428_vm0, %v3415_v30  ;;  %v3515_v30 = vadd.f32 %v12113_v44, %v12076_v51  ;;  %v12488_v59 = vpop.f32.mrf.mxu0 }
 0x45b   :  { %v4933_v21 = vsel %vm428_vm0, %v12439_v0, 0.0  ;;  %8559 = vmatprep.subr.msk.mxu0 %vm428_vm0, %v3410_v39  ;;  %8580 = vmatpush3.xpose.msk.msra.mxu1 %vm428_vm0, %v3535_v50  ;;  %v12448_v61 = vpop.eup %8986  ;;  %v12474_v50 = vadd.f32 %v12113_v44, %v12364_v20 }
 0x45c   :  { %4934 = vadd.xlane.f32.xlu1 %v4933_v21  ;;  %8581 = vmatprep.subr.msk.mxu1 %vm428_vm0, %v3530_v58  ;;  %v4930_v46 = vsel %vm428_vm0, %v12448_v61, 0.0  ;;  %v12496_v51 = vpop.f32.mrf.mxu0 }
 0x45e   :  { %8560 = vmatpush3.xpose.msk.msra.mxu0 %vm428_vm0, %v3410_v39  ;;  %v12462_v60 = vpop.eup %8988  ;;  %v12502_v39 = vpop.f32.mrf.mxu0 }
 0x45f   :  { %8561 = vmatprep.subr.msk.mxu0 %vm428_vm0, %v3405_v43  ;;  %8582 = vmatpush3.xpose.msk.msra.mxu1 %vm428_vm0, %v3530_v58  ;;  %v4936_v10 = vsel %vm428_vm0, %v12462_v60, 0.0  ;;  %v3510_v58 = vadd.f32 %v12113_v44, %v12085_v13  ;;  %v3500_v13 = vadd.f32 %v12113_v44, %v12069_v32 }
 0x460   :  { %4931 = vadd.xlane.f32.xlu1 %v4930_v46  ;;  %8583 = vmatprep.subr.msk.mxu1 %vm428_vm0, %v3525_v48  ;;  %v12508_v21 = vpop.f32.mrf.mxu0  ;;  %v3490_v46 = vadd.f32 %v12113_v44, %v12062_v52  ;;  %v12864_v52 = vld [vmem:[#allocation25_spill] sm:$0xff] }
 0x462   :  { %8562 = vmatpush3.xpose.msk.msra.mxu0 %vm428_vm0, %v3405_v43  ;;  %v12480_v22 = vpop.eup %8990  ;;  %v12514_v43 = vpop.f32.mrf.mxu0 }
 0x463   :  { %8563 = vmatprep.subr.msk.mxu0 %vm428_vm0, %v3400_v3  ;;  %8584 = vmatpush3.xpose.msk.msra.mxu1 %vm428_vm0, %v3525_v48  ;;  %v4939_v20 = vsel %vm428_vm0, %v12480_v22, 0.0  ;;  %v12862_v48 = vld [vmem:[#allocation26_spill] sm:$0xff] }
 0x464   :  { %4937 = vadd.xlane.f32.xlu1 %v4936_v10  ;;  %8585 = vmatprep.subr.msk.mxu1 %vm428_vm0, %v3520_v49  ;;  %v3495_v6 = vadd.f32 %v12113_v44, %v12862_v48  ;;  %v12520_v32 = vpop.f32.mrf.mxu0 }
 0x466   :  { %8564 = vmatpush3.xpose.msk.msra.mxu0 %vm428_vm0, %v3400_v3  ;;  %v3485_v3 = vadd.f32 %v12113_v44, %v12863_v19  ;;  %v12526_v10 = vpop.f32.mrf.mxu0 }
 0x467   :  { %8586 = vmatpush3.xpose.msk.msra.mxu1 %vm428_vm0, %v3520_v49  ;;  %8609 = vmatprep.subr.msk.mxu0 %vm428_vm0, %v12474_v50 }
 0x468   :  { %4940 = vadd.xlane.f32.xlu1 %v4939_v20  ;;  %8587 = vmatprep.subr.msk.mxu1 %vm428_vm0, %v3515_v30  ;;  %v3480_v20 = vadd.f32 %v12113_v44, %v12864_v52 }
 0x46b   :  { %8588 = vmatpush3.xpose.msk.msra.mxu1 %vm428_vm0, %v3515_v30 }
 0x46c   :  { %8589 = vmatprep.subr.msk.mxu1 %vm428_vm0, %v3510_v58 }
 0x46f   :  { %8590 = vmatpush3.xpose.msk.msra.mxu1 %vm428_vm0, %v3510_v58  ;;  %v8076_v58 = vpop.f32.mrf.mxu0 }
 0x470   :  { %8591 = vmatprep.subr.msk.mxu1 %vm428_vm0, %v3505_v34 }
 0x471   :  { %v3709_v52 = vpop.f32.mrf.mxu0 }
 0x473   :  { %8592 = vmatpush3.xpose.msk.msra.mxu1 %vm428_vm0, %v3505_v34  ;;  %v12534_v34 = vadd.f32 %v12113_v44, %v8076_v58 }
 0x474   :  { %8593 = vmatprep.subr.msk.mxu1 %vm428_vm0, %v3500_v13 }
 0x477   :  { %8594 = vmatpush3.xpose.msk.msra.mxu1 %vm428_vm0, %v3500_v13 }
 0x478   :  { %8595 = vmatprep.subr.msk.mxu1 %vm428_vm0, %v3495_v6 }
 0x479   :  { %v4878_v47 = vpop.xlane.xlu0 %4877 }
 0x47a   :  { %8992 = vrcp.f32 %v4878_v47 }
 0x47b   :  { %8596 = vmatpush3.xpose.msk.msra.mxu1 %vm428_vm0, %v3495_v6 }
 0x47c   :  { %8597 = vmatprep.subr.msk.mxu1 %vm428_vm0, %v3490_v46 }
 0x47d   :  { %v4881_v49 = vpop.xlane.xlu0 %4880 }
 0x47e   :  { %8994 = vrcp.f32 %v4881_v49 }
 0x47f   :  { %8598 = vmatpush3.xpose.msk.msra.mxu1 %vm428_vm0, %v3490_v46 }
 0x480   :  { %8599 = vmatprep.subr.msk.mxu1 %vm428_vm0, %v3485_v3 }
 0x481   :  { %v4896_v30 = vpop.xlane.xlu0 %4895 }
 0x482   :  { %8996 = vrcp.f32 %v4896_v30 }
 0x483   :  { %8600 = vmatpush3.xpose.msk.msra.mxu1 %vm428_vm0, %v3485_v3 }
 0x484   :  { %8601 = vmatprep.subr.msk.mxu1 %vm428_vm0, %v3480_v20 }
 0x485   :  { %v4899_v13 = vpop.xlane.xlu0 %4898 }
 0x486   :  { %8998 = vrcp.f32 %v4899_v13 }
 0x487   :  { %v8993_v48 = vpop.eup %8992  ;;  %8602 = vmatpush3.xpose.msk.msra.mxu1 %vm428_vm0, %v3480_v20  ;;  %v3610_v20 = vadd.f32 %v12113_v44, %v12320_v4  ;;  %v3600_v4 = vadd.f32 %v12113_v44, %v12295_v45 }
 0x488   :  { %v4984_v6 = vmul.f32 %v8993_v48, %v12087_v33  ;;  %8647 = vmatprep.subr.msk.mxu1 %vm428_vm0, %v12534_v34  ;;  %v3630_v33 = vadd.f32 %v12113_v44, %v12382_v42 }
 0x48a   :  { %8492 = vmatprep.mubr.msk.f32.mxu0 %vm428_vm0, %v4984_v6 }
 0x48b   :  { %v8995_v47 = vpop.eup %8994 }
 0x48c   :  { %v4985_v46 = vmul.f32 %v8995_v47, %v12097_v12  ;;  %v3625_v12 = vadd.f32 %v12113_v44, %v12334_v27 }
 0x48e   :  { %8493 = vmatmul.mubr.msk.f32.gmra.mxu0 %vm428_vm0, %v4985_v46  ;;  %v3595_v46 = vadd.f32 %v12113_v44, %v12255_v5  ;;  %v3710_v5 = vadd.f32 %v12113_v44, %v3709_v52  ;;  %v3685_v52 = vadd.f32 %v12113_v44, %v12496_v51 }
 0x48f   :  { %v8997_v49 = vpop.eup %8996 }
 0x490   :  { %v4990_v19 = vmul.f32 %v8997_v49, %v12107_v26 }
 0x492   :  { %8565 = vmatprep.mubr.msk.f32.mxu0 %vm428_vm0, %v4990_v19 }
 0x493   :  { %v8999_v3 = vpop.eup %8998 }
 0x494   :  { %v4991_v30 = vmul.f32 %v8999_v3, %v12122_v55  ;;  %v3620_v55 = vadd.f32 %v12113_v44, %v12349_v57 }
 0x496   :  { %8566 = vmatmul.mubr.msk.f32.vlgmr.msra.gmra.mxu0 %vm428_vm0, %v4991_v30  ;;  %v3705_v30 = vadd.f32 %v12113_v44, %v12520_v32 }
 0x497   :  { %8610 = vmatpush3.xpose.msk.msra.mxu0 %vm428_vm0, %v12474_v50  ;;  %v3615_v50 = vadd.f32 %v12113_v44, %v12310_v15  ;;  %v3605_v15 = vadd.f32 %v12113_v44, %v12280_v7 }
 0x498   :  { %8611 = vmatprep.subr.msk.mxu0 %vm428_vm0, %v3630_v33 }
 0x49b   :  { %8612 = vmatpush3.xpose.msk.msra.mxu0 %vm428_vm0, %v3630_v33  ;;  %v3700_v33 = vadd.f32 %v12113_v44, %v12526_v10 }
 0x49c   :  { %8613 = vmatprep.subr.msk.mxu0 %vm428_vm0, %v3625_v12 }
 0x49d   :  { %v4893_v26 = vpop.xlane.xlu1 %4892 }
 0x49e   :  { %9000 = vrcp.f32 %v4893_v26 }
 0x49f   :  { %8614 = vmatpush3.xpose.msk.msra.mxu0 %vm428_vm0, %v3625_v12  ;;  %v3570_v12 = vadd.f32 %v12113_v44, %v12211_v9  ;;  %v3565_v9 = vadd.f32 %v12113_v44, %v12173_v36 }
 0x4a0   :  { %8615 = vmatprep.subr.msk.mxu0 %vm428_vm0, %v3620_v55 }
 0x4a1   :  { %v4890_v42 = vpop.xlane.xlu1 %4889 }
 0x4a2   :  { %9002 = vrcp.f32 %v4890_v42 }
 0x4a3   :  { %8616 = vmatpush3.xpose.msk.msra.mxu0 %vm428_vm0, %v3620_v55 }
 0x4a4   :  { %8617 = vmatprep.subr.msk.mxu0 %vm428_vm0, %v3615_v50 }
 0x4a5   :  { %v4908_v27 = vpop.xlane.xlu1 %4907 }
 0x4a6   :  { %9004 = vrcp.f32 %v4908_v27 }
 0x4a7   :  { %8618 = vmatpush3.xpose.msk.msra.mxu0 %vm428_vm0, %v3615_v50 }
 0x4a8   :  { %8619 = vmatprep.subr.msk.mxu0 %vm428_vm0, %v3610_v20 }
 0x4a9   :  { %v8415_v57 = vpop.f32.mrf.mxu0  ;;  %v4911_v58 = vpop.xlane.xlu1 %4910 }
 0x4aa   :  { %6167 = vst [vmem:[#allocation2 + $0x8] sm:$0xff] %v8415_v57  ;;  %9006 = vrcp.f32 %v4911_v58 }
 0x4ab   :  { %v5132_v13 = vpop.f32.mrf.mxu0  ;;  %8620 = vmatpush3.xpose.msk.msra.mxu0 %vm428_vm0, %v3610_v20  ;;  %v9001_v48 = vpop.eup %9000  ;;  %v12648_v20 = vld [vmem:[%s12719_s8] ss:$0 sm:$0xff]  ;;  %s9059_s8 = smov [#allocation2]  }
 0x4ac   :  { %6166 = vst [vmem:[#allocation2] sm:$0xff] %v5132_v13  ;;  %8621 = vmatprep.subr.msk.mxu0 %vm428_vm0, %v3605_v15  ;;  %v4989_v7 = vmul.f32 %v9001_v48, %v12187_v41  ;;  %v3675_v51 = vadd.f32 %v12648_v20, %v12478_v35  ;;  %s6203_s28 = sshll.u32 %s9059_s8, 4  ;;  %s6204_s28 = int_to_ptr.vmem [resolvable:$true] %s6203_s28 }
 0x4ad   :  { %s9037_s29 = scalar_lea.vmem %s6204_s28, 4096  ;;  %p9042_p1 = scmp.lt.s32.totalorder %s6204_s28, %s6204_s28 }
 0x4ae   :  { %p9038_p0 = scmp.ne.s32.totalorder %s6204_s28, %s9037_s29  ;;  %p9043_p2 = scmp.lt.s32.totalorder %s9037_s29, %s9037_s29 }
 0x4af   :  { %v9003_v6 = vpop.eup %9002  ;;  %8622 = vmatpush3.xpose.msk.msra.mxu0 %vm428_vm0, %v3605_v15  ;;  %v3670_v15 = vadd.f32 %v12648_v20, %v12488_v59 }
 0x4b0   :  { %v4988_v47 = vmul.f32 %v9003_v6, %v12199_v29  ;;  %8623 = vmatprep.subr.msk.mxu0 %vm428_vm0, %v3600_v4  ;;  %v3590_v29 = vadd.f32 %v12113_v44, %v12268_v38  ;;  %p9044_p3 = por %p9043_p2, %p9042_p1 }
 0x4b2   :  { %8530 = vmatprep.mubr.msk.f32.mxu1 %vm428_vm0, %v4988_v47  ;;  %p9045_p4 = pnand %p9044_p3, %p9038_p0 }
 0x4b3   :  { %v9005_v49 = vpop.eup %9004  ;;  %8531 = vmatmul.mubr.msk.f32.gmra.mxu1 %vm428_vm0, %v4989_v7  ;;  %8624 = vmatpush3.xpose.msk.msra.mxu0 %vm428_vm0, %v3600_v4 }
 0x4b4   :  { %v4994_v45 = vmul.f32 %v9005_v49, %v12213_v16  ;;  %8625 = vmatprep.subr.msk.mxu0 %vm428_vm0, %v3595_v46  ;;  %v3585_v16 = vadd.f32 %v12113_v44, %v12225_v37 }
 0x4b6   :  { %8603 = vmatprep.mubr.msk.f32.mxu1 %vm428_vm0, %v4994_v45 }
 0x4b7   :  { %v9007_v41 = vpop.eup %9006  ;;  %8626 = vmatpush3.xpose.msk.msra.mxu0 %vm428_vm0, %v3595_v46  ;;  %v3650_v46 = vadd.f32 %v12648_v20, %v12432_v8 }
 0x4b8   :  { %v4995_v19 = vmul.f32 %v9007_v41, %v12227_v23  ;;  %8627 = vmatprep.subr.msk.mxu0 %vm428_vm0, %v3590_v29  ;;  %v3580_v23 = vadd.f32 %v12113_v44, %v12239_v54 }
 0x4b9   :  { %v4902_v3 = vpop.xlane.xlu0 %4901 }
 0x4ba   :  { %9008 = vrcp.f32 %v4902_v3  ;;  %8604 = vmatmul.mubr.msk.f32.vlgmr.msra.gmra.mxu1 %vm428_vm0, %v4995_v19  ;;  %v3640_v3 = vadd.f32 %v12648_v20, %v12403_v31 }
 0x4bb   :  { %8648 = vmatpush3.xpose.msk.msra.mxu1 %vm428_vm0, %v12534_v34  ;;  %8628 = vmatpush3.xpose.msk.msra.mxu0 %vm428_vm0, %v3590_v29  ;;  %v3575_v34 = vadd.f32 %v12113_v44, %v12197_v17  ;;  %v3695_v17 = vadd.f32 %v12113_v44, %v12508_v21  ;;  %v3690_v21 = vadd.f32 %v12113_v44, %v12514_v43 }
 0x4bc   :  { %8649 = vmatprep.subr.msk.mxu1 %vm428_vm0, %v3710_v5  ;;  %8629 = vmatprep.subr.msk.mxu0 %vm428_vm0, %v3585_v16  ;;  %v3560_v43 = vadd.f32 %v12113_v44, %v12183_v11  ;;  %v3680_v44 = vadd.f32 %v12648_v20, %v12502_v39  ;;  %v3645_v29 = vadd.f32 %v12648_v20, %v12392_v40 }
 0x4bd   :  { %v4905_v38 = vpop.xlane.xlu0 %4904 }
 0x4be   :  { %9010 = vrcp.f32 %v4905_v38 }
 0x4bf   :  { %8650 = vmatpush3.xpose.msk.msra.mxu1 %vm428_vm0, %v3710_v5  ;;  %8630 = vmatpush3.xpose.msk.msra.mxu0 %vm428_vm0, %v3585_v16 }
 0x4c0   :  { %8651 = vmatprep.subr.msk.mxu1 %vm428_vm0, %v3705_v30  ;;  %8631 = vmatprep.subr.msk.mxu0 %vm428_vm0, %v3580_v23 }
 0x4c1   :  { %v8418_v37 = vpop.f32.mrf.mxu0 }
 0x4c2   :  { %6169 = vst [vmem:[#allocation2 + $0x18] sm:$0xff] %v8418_v37 }
 0x4c3   :  { %v5142_v54 = vpop.f32.mrf.mxu0  ;;  %8652 = vmatpush3.xpose.msk.msra.mxu1 %vm428_vm0, %v3705_v30  ;;  %8632 = vmatpush3.xpose.msk.msra.mxu0 %vm428_vm0, %v3580_v23 }
 0x4c4   :  { %6168 = vst [vmem:[#allocation2 + $0x10] sm:$0xff] %v5142_v54  ;;  %8653 = vmatprep.subr.msk.mxu1 %vm428_vm0, %v3700_v33  ;;  %8633 = vmatprep.subr.msk.mxu0 %vm428_vm0, %v3575_v34 }
 0x4c5   :  { %v4923_v32 = vpop.xlane.xlu0 %4922 }
 0x4c6   :  { %9012 = vrcp.f32 %v4923_v32 }
 0x4c7   :  { %v9009_v26 = vpop.eup %9008  ;;  %8654 = vmatpush3.xpose.msk.msra.mxu1 %vm428_vm0, %v3700_v33  ;;  %8634 = vmatpush3.xpose.msk.msra.mxu0 %vm428_vm0, %v3575_v34 }
 0x4c8   :  { %v4992_v10 = vmul.f32 %v9009_v26, %v12284_v63  ;;  %8655 = vmatprep.subr.msk.mxu1 %vm428_vm0, %v3695_v17  ;;  %8635 = vmatprep.subr.msk.mxu0 %vm428_vm0, %v3570_v12 }
 0x4c9   :  { %v4920_v55 = vpop.xlane.xlu0 %4919  ;;  %v8453_v42 = vpop.f32.mrf.mxu1 }
 0x4ca   :  { %9014 = vrcp.f32 %v4920_v55  ;;  %6171 = vst [vmem:[#allocation2 + $0x28] sm:$0xff] %v8453_v42  ;;  %8568 = vmatprep.mubr.msk.f32.mxu0 %vm428_vm0, %v4992_v10 }
 0x4cb   :  { %v9011_v50 = vpop.eup %9010  ;;  %v5277_v27 = vpop.f32.mrf.mxu1  ;;  %8656 = vmatpush3.xpose.msk.msra.mxu1 %vm428_vm0, %v3695_v17  ;;  %8636 = vmatpush3.xpose.msk.msra.mxu0 %vm428_vm0, %v3570_v12 }
 0x4cc   :  { %6170 = vst [vmem:[#allocation2 + $0x20] sm:$0xff] %v5277_v27  ;;  %v4993_v63 = vmul.f32 %v9011_v50, %v12299_v62  ;;  %8657 = vmatprep.subr.msk.mxu1 %vm428_vm0, %v3690_v21  ;;  %8637 = vmatprep.subr.msk.mxu0 %vm428_vm0, %v3565_v9 }
 0x4cd   :  { %v4926_v36 = vpop.xlane.xlu0 %4925 }
 0x4ce   :  { %9016 = vrcp.f32 %v4926_v36  ;;  %8569 = vmatmul.mubr.msk.f32.gmra.mxu0 %vm428_vm0, %v4993_v63 }
 0x4cf   :  { %8658 = vmatpush3.xpose.msk.msra.mxu1 %vm428_vm0, %v3690_v21  ;;  %8638 = vmatpush3.xpose.msk.msra.mxu0 %vm428_vm0, %v3565_v9 }
 0x4d0   :  { %8659 = vmatprep.subr.msk.mxu1 %vm428_vm0, %v3685_v52  ;;  %8639 = vmatprep.subr.msk.mxu0 %vm428_vm0, %v3560_v43 }
 0x4d1   :  { %v4929_v62 = vpop.xlane.xlu0 %4928 }
 0x4d2   :  { %9018 = vrcp.f32 %v4929_v62 }
 0x4d3   :  { %8660 = vmatpush3.xpose.msk.msra.mxu1 %vm428_vm0, %v3685_v52  ;;  %8640 = vmatpush3.xpose.msk.msra.mxu0 %vm428_vm0, %v3560_v43  ;;  %v9013_v11 = vpop.eup %9012 }
 0x4d4   :  { %8661 = vmatprep.subr.msk.mxu1 %vm428_vm0, %v3680_v44  ;;  %v4999_v39 = vmul.f32 %v9013_v11, %v12323_v56 }
 0x4d7   :  { %v9015_v57 = vpop.eup %9014  ;;  %8662 = vmatpush3.xpose.msk.msra.mxu1 %vm428_vm0, %v3680_v44 }
 0x4d8   :  { %v4998_v58 = vmul.f32 %v9015_v57, %v12336_v28  ;;  %8663 = vmatprep.subr.msk.mxu1 %vm428_vm0, %v3675_v51  ;;  %v3665_v28 = vadd.f32 %v12648_v20, %v12446_v2 }
 0x4da   :  { %8641 = vmatprep.mubr.msk.f32.mxu0 %vm428_vm0, %v4998_v58 }
 0x4db   :  { %v9017_v13 = vpop.eup %9016  ;;  %8642 = vmatmul.mubr.msk.f32.vlgmr.msra.gmra.mxu0 %vm428_vm0, %v4999_v39  ;;  %8664 = vmatpush3.xpose.msk.msra.mxu1 %vm428_vm0, %v3675_v51 }
 0x4dc   :  { %v5000_v35 = vmul.f32 %v9017_v13, %v12351_v18  ;;  %8665 = vmatprep.subr.msk.mxu1 %vm428_vm0, %v3670_v15  ;;  %v3660_v18 = vadd.f32 %v12648_v20, %v12460_v53 }
 0x4dd   :  { %v4917_v48 = vpop.xlane.xlu1 %4916 }
 0x4de   :  { %8644 = vmatprep.mubr.msk.f32.mxu0 %vm428_vm0, %v5000_v35  ;;  %9020 = vrcp.f32 %v4917_v48 }
 0x4df   :  { %v9019_v56 = vpop.eup %9018  ;;  %8666 = vmatpush3.xpose.msk.msra.mxu1 %vm428_vm0, %v3670_v15 }
 0x4e0   :  { %v5001_v59 = vmul.f32 %v9019_v56, %v12366_v24  ;;  %8667 = vmatprep.subr.msk.mxu1 %vm428_vm0, %v3665_v28  ;;  %v3655_v24 = vadd.f32 %v12648_v20, %v12418_v14 }
 0x4e1   :  { %v4914_v4 = vpop.xlane.xlu1 %4913 }
 0x4e2   :  { %9022 = vrcp.f32 %v4914_v4  ;;  %v8456_v6 = vpop.f32.mrf.mxu1  ;;  %8645 = vmatmul.mubr.msk.f32.gmra.mxu0 %vm428_vm0, %v5001_v59 }
 0x4e3   :  { %6173 = vst [vmem:[#allocation2 + $0x38] sm:$0xff] %v8456_v6  ;;  %8668 = vmatpush3.xpose.msk.msra.mxu1 %vm428_vm0, %v3665_v28 }
 0x4e4   :  { %v5287_v2 = vpop.f32.mrf.mxu1  ;;  %8669 = vmatprep.subr.msk.mxu1 %vm428_vm0, %v3660_v18 }
 0x4e5   :  { %6172 = vst [vmem:[#allocation2 + $0x30] sm:$0xff] %v5287_v2  ;;  %v4935_v47 = vpop.xlane.xlu1 %4934 }
 0x4e6   :  { %9024 = vrcp.f32 %v4935_v47 }
 0x4e7   :  { %8670 = vmatpush3.xpose.msk.msra.mxu1 %vm428_vm0, %v3660_v18 }
 0x4e8   :  { %8671 = vmatprep.subr.msk.mxu1 %vm428_vm0, %v3655_v24 }
 0x4e9   :  { %v8491_v53 = vpop.f32.mrf.mxu0  ;;  %v4932_v7 = vpop.xlane.xlu1 %4931 }
 0x4ea   :  { %6175 = vst [vmem:[#allocation2 + $0x48] sm:$0xff] %v8491_v53  ;;  %9026 = vrcp.f32 %v4932_v7 }
 0x4eb   :  { %v5422_v49 = vpop.f32.mrf.mxu0  ;;  %8672 = vmatpush3.xpose.msk.msra.mxu1 %vm428_vm0, %v3655_v24  ;;  %v9021_v14 = vpop.eup %9020 }
 0x4ec   :  { %6174 = vst [vmem:[#allocation2 + $0x40] sm:$0xff] %v5422_v49  ;;  %8673 = vmatprep.subr.msk.mxu1 %vm428_vm0, %v3650_v46  ;;  %v4997_v19 = vmul.f32 %v9021_v14, %v12411_v25 }
 0x4ed   :  { %v4938_v45 = vpop.xlane.xlu1 %4937 }
 0x4ee   :  { %9028 = vrcp.f32 %v4938_v45 }
 0x4ef   :  { %v9023_v41 = vpop.eup %9022  ;;  %8674 = vmatpush3.xpose.msk.msra.mxu1 %vm428_vm0, %v3650_v46 }
 0x4f0   :  { %v4996_v5 = vmul.f32 %v9023_v41, %v12420_v1  ;;  %8675 = vmatprep.subr.msk.mxu1 %vm428_vm0, %v3645_v29 }
 0x4f1   :  { %v4941_v8 = vpop.xlane.xlu1 %4940 }
 0x4f2   :  { %9030 = vrcp.f32 %v4941_v8  ;;  %8606 = vmatprep.mubr.msk.f32.mxu1 %vm428_vm0, %v4996_v5 }
 0x4f3   :  { %8607 = vmatmul.mubr.msk.f32.gmra.mxu1 %vm428_vm0, %v4997_v19  ;;  %v9025_v40 = vpop.eup %9024 }
 0x4f4   :  { %8676 = vmatpush3.xpose.msk.msra.mxu1 %vm428_vm0, %v3645_v29  ;;  %v5003_v25 = vmul.f32 %v9025_v40, %v12439_v0 }
 0x4f5   :  { %8677 = vmatprep.subr.msk.mxu1 %vm428_vm0, %v3640_v3 }
 0x4f7   :  { %v9027_v16 = vpop.eup %9026 }
 0x4f8   :  { %8678 = vmatpush3.xpose.msk.msra.mxu1 %vm428_vm0, %v3640_v3  ;;  %v5002_v1 = vmul.f32 %v9027_v16, %v12448_v61 }
 0x4fa   :  { %8679 = vmatprep.mubr.msk.f32.mxu1 %vm428_vm0, %v5002_v1 }
 0x4fb   :  { %v9029_v38 = vpop.eup %9028  ;;  %8680 = vmatmul.mubr.msk.f32.vlgmr.msra.gmra.mxu1 %vm428_vm0, %v5003_v25 }
 0x4fc   :  { %v5004_v31 = vmul.f32 %v9029_v38, %v12462_v60 }
 0x4fe   :  { %8682 = vmatprep.mubr.msk.f32.mxu1 %vm428_vm0, %v5004_v31 }
 0x4ff   :  { %v9031_v23 = vpop.eup %9030 }
 0x500   :  { %v5005_v30 = vmul.f32 %v9031_v23, %v12480_v22 }
 0x502   :  { %8683 = vmatmul.mubr.msk.f32.gmra.mxu1 %vm428_vm0, %v5005_v30 }
 0x50a   :  { %v8529_v37 = vpop.f32.mrf.mxu1 }
 0x50b   :  { %6179 = vst [vmem:[#allocation2 + $0x68] sm:$0xff] %v8529_v37 }
 0x50c   :  { %v5567_v34 = vpop.f32.mrf.mxu1 }
 0x50d   :  { %6178 = vst [vmem:[#allocation2 + $0x60] sm:$0xff] %v5567_v34 }
 0x54e   :  { %v8494_v61 = vpop.f32.mrf.mxu0 }
 0x54f   :  { %6177 = vst [vmem:[#allocation2 + $0x58] sm:$0xff] %v8494_v61 }
 0x550   :  { %v5432_v0 = vpop.f32.mrf.mxu0 }
 0x551   :  { %6176 = vst [vmem:[#allocation2 + $0x50] sm:$0xff] %v5432_v0 }
 0x556   :  { %v8567_v33 = vpop.f32.mrf.mxu0 }
 0x557   :  { %6183 = vst [vmem:[#allocation2 + $0x88] sm:$0xff] %v8567_v33 }
 0x558   :  { %v5712_v54 = vpop.f32.mrf.mxu0 }
 0x559   :  { %6182 = vst [vmem:[#allocation2 + $0x80] sm:$0xff] %v5712_v54 }
 0x573   :  { %v8532_v60 = vpop.f32.mrf.mxu1 }
 0x574   :  { %6181 = vst [vmem:[#allocation2 + $0x78] sm:$0xff] %v8532_v60 }
 0x575   :  { %v5577_v32 = vpop.f32.mrf.mxu1 }
 0x576   :  { %6180 = vst [vmem:[#allocation2 + $0x70] sm:$0xff] %v5577_v32 }
 0x57a   :  { %v8605_v12 = vpop.f32.mrf.mxu1 }
 0x57b   :  { %6187 = vst [vmem:[#allocation2 + $0xa8] sm:$0xff] %v8605_v12 }
 0x57c   :  { %v5857_v22 = vpop.f32.mrf.mxu1 }
 0x57d   :  { %6186 = vst [vmem:[#allocation2 + $0xa0] sm:$0xff] %v5857_v22 }
 0x58e   :  { %v8570_v17 = vpop.f32.mrf.mxu0 }
 0x58f   :  { %6185 = vst [vmem:[#allocation2 + $0x98] sm:$0xff] %v8570_v17 }
 0x590   :  { %v5722_v26 = vpop.f32.mrf.mxu0 }
 0x591   :  { %6184 = vst [vmem:[#allocation2 + $0x90] sm:$0xff] %v5722_v26 }
 0x59b   :  { %v8643_v10 = vpop.f32.mrf.mxu0 }
 0x59c   :  { %6191 = vst [vmem:[#allocation2 + $0xc8] sm:$0xff] %v8643_v10 }
 0x59d   :  { %v6002_v55 = vpop.f32.mrf.mxu0 }
 0x59e   :  { %6190 = vst [vmem:[#allocation2 + $0xc0] sm:$0xff] %v6002_v55 }
 0x5a2   :  { %v8646_v42 = vpop.f32.mrf.mxu0 }
 0x5a3   :  { %6193 = vst [vmem:[#allocation2 + $0xd8] sm:$0xff] %v8646_v42 }
 0x5a4   :  { %v6012_v9 = vpop.f32.mrf.mxu0 }
 0x5a5   :  { %6192 = vst [vmem:[#allocation2 + $0xd0] sm:$0xff] %v6012_v9 }
 0x5b3   :  { %v8608_v21 = vpop.f32.mrf.mxu1 }
 0x5b4   :  { %6189 = vst [vmem:[#allocation2 + $0xb8] sm:$0xff] %v8608_v21 }
 0x5b5   :  { %v5867_v50 = vpop.f32.mrf.mxu1 }
 0x5b6   :  { %6188 = vst [vmem:[#allocation2 + $0xb0] sm:$0xff] %v5867_v50 }
 0x5bb   :  { %v8681_v27 = vpop.f32.mrf.mxu1 }
 0x5bc   :  { %6195 = vst [vmem:[#allocation2 + $0xe8] sm:$0xff] %v8681_v27 }
 0x5bd   :  { %v6147_v63 = vpop.f32.mrf.mxu1 }
 0x5be   :  { %6194 = vst [vmem:[#allocation2 + $0xe0] sm:$0xff] %v6147_v63 }
 0x5c2   :  { %v8684_v36 = vpop.f32.mrf.mxu1 }
 0x5c3   :  { %6197 = vst [vmem:[#allocation2 + $0xf8] sm:$0xff] %v8684_v36 }
 0x5c4   :  { %v6157_v43 = vpop.f32.mrf.mxu1 }
 0x5c5   :  { %6196 = vst [vmem:[#allocation2 + $0xf0] sm:$0xff] %v6157_v43 }
 0x5c6   :  { %9048 = shalt.err (!%p9045_p4)
}
 0x5c7   :  { %s9060_s1 = smov 128   ;;  %s9061_s5 = smov 8  }
 0x5c8   :  { %6209 = dma.vmem_to_hbm [thread:$0]  %s6204_s28, 4096, %s12720_s9, [#allocation3], %s9060_s1, %s9060_s1, %s9061_s5  }
 0x5c9   :  { %9057 = dma.done.wait [#allocation3], 4096  }
 0x5ca   :  { %9058 = vsyncadd [#allocation3], 4294963200 }
 0x5cb   :  { %6213 = vsyncpa [#allocation3], 1 }

</bundles_post_ra>
